<compile_context>
chip_gen: v7x
topology: tpu7x:2x2x1
jax: 0.10.0
libtpu: 0.0.40
codegen_flags: <defaults>
</compile_context>

<pallas_src>
import functools

import jax
import jax.numpy as jnp
from jax import lax
from jax.experimental import pallas as pl
from jax.experimental.pallas import tpu as pltpu


# ---------------------------------------------------------------------------
# Fused kernel: conv3x3+ReLU -> conv3x3 -> channel attention -> scale+residual
# ---------------------------------------------------------------------------
def _qrcab_fused_kernel(x_ref, w1_ref, b1_ref, w2_ref, b2_ref,
                        wd1_ref, bd1_ref, wd2_ref, bd2_ref,
                        out_ref, pad1_ref, pad2_ref, *, pad_off):
    # x_ref   : (1, H, W, C)     input feature map (NHWC block)
    # w*_ref  : (3, 3, C, C)     conv weights (HWIO),   b*_ref : (1, C)
    # wd1_ref : (C, Cr)  bd1_ref: (1, Cr)  wd2_ref: (Cr, C)  bd2_ref: (1, C)
    # out_ref : (1, H, W, C)
    # pad*_ref: (H+2, PADW, C)   VMEM scratch holding the zero-padded maps
    _, H, W, C = x_ref.shape
    HW = H * W

    x0 = x_ref[0]                                        # (H, W, C)

    def conv3x3(pad_ref, w_ref, b_ref):
        acc = jnp.zeros((HW, C), jnp.float32)
        for kh in range(3):
            for kw in range(3):
                col = pad_off - 1 + kw
                patch = pad_ref[kh:kh + H, col:col + W, :].reshape(HW, C)
                acc = acc + jnp.dot(patch, w_ref[kh, kw],
                                    preferred_element_type=jnp.float32)
        return acc + b_ref[...]                          # (HW, C)

    # ---- conv1 + bias + ReLU (input zero-padded in VMEM, never via HBM) ----
    pad1_ref[...] = jnp.zeros_like(pad1_ref)
    pad1_ref[1:H + 1, pad_off:pad_off + W, :] = x0       # tile-aligned interior
    y1 = jnp.maximum(conv3x3(pad1_ref, w1_ref, b1_ref), 0.0)

    # ---- conv2 + bias (intermediate stays resident in VMEM) ----------------
    pad2_ref[...] = jnp.zeros_like(pad2_ref)
    pad2_ref[1:H + 1, pad_off:pad_off + W, :] = y1.reshape(H, W, C)
    acc2 = conv3x3(pad2_ref, w2_ref, b2_ref)             # (HW, C)

    # ---- channel attention: avgpool -> FC -> ReLU -> FC -> sigmoid ---------
    pooled = jnp.mean(acc2, axis=0, keepdims=True)       # (1, C)
    z = jnp.maximum(
        jnp.dot(pooled, wd1_ref[...], preferred_element_type=jnp.float32)
        + bd1_ref[...], 0.0)                             # (1, Cr)
    s = jax.nn.sigmoid(
        jnp.dot(z, wd2_ref[...], preferred_element_type=jnp.float32)
        + bd2_ref[...])                                  # (1, C)

    # ---- per-channel scale + residual add ----------------------------------
    out = acc2 * s + x0.reshape(HW, C)
    out_ref[0] = out.reshape(H, W, C)


# ---------------------------------------------------------------------------
# Wrapper
# ---------------------------------------------------------------------------
def qrcab_forward(x_nhwc, attrs, params):
    """QRCAB.forward((x0, x1)) with style='standard'. Returns (res, attrs)."""
    N, H, W, C = x_nhwc.shape
    Cr = params["wd1"].shape[1]
    pad_off = 8                          # sublane-aligned interior offset in scratch
    padw = pad_off + W + pad_off         # scratch width (>= pad_off + W + 1)

    w1, b1 = params["w1"], params["b1"].reshape(1, C)
    w2, b2 = params["w2"], params["b2"].reshape(1, C)
    wd1, bd1 = params["wd1"], params["bd1"].reshape(1, Cr)
    wd2, bd2 = params["wd2"], params["bd2"].reshape(1, C)

    kernel = functools.partial(_qrcab_fused_kernel, pad_off=pad_off)

    res = pl.pallas_call(
        kernel,
        out_shape=jax.ShapeDtypeStruct((N, H, W, C), jnp.float32),
        grid=(N,),
        in_specs=[
            pl.BlockSpec((1, H, W, C), lambda b: (b, 0, 0, 0)),   # x
            pl.BlockSpec((3, 3, C, C), lambda b: (0, 0, 0, 0)),   # w1
            pl.BlockSpec((1, C), lambda b: (0, 0)),               # b1
            pl.BlockSpec((3, 3, C, C), lambda b: (0, 0, 0, 0)),   # w2
            pl.BlockSpec((1, C), lambda b: (0, 0)),               # b2
            pl.BlockSpec((C, Cr), lambda b: (0, 0)),              # wd1
            pl.BlockSpec((1, Cr), lambda b: (0, 0)),              # bd1
            pl.BlockSpec((Cr, C), lambda b: (0, 0)),              # wd2
            pl.BlockSpec((1, C), lambda b: (0, 0)),               # bd2
        ],
        out_specs=pl.BlockSpec((1, H, W, C), lambda b: (b, 0, 0, 0)),
        scratch_shapes=[pltpu.VMEM((H + 2, padw, C), jnp.float32),
                        pltpu.VMEM((H + 2, padw, C), jnp.float32)],
        compiler_params=pltpu.CompilerParams(
            dimension_semantics=("parallel",)),
    )(x_nhwc, w1, b1, w2, b2, wd1, bd1, wd2, bd2)

    # style='standard': metadata x[1] is passed through untouched.
    return res, attrs


# ---------------------------------------------------------------------------
# Pure-JAX reference (for correctness check)
# ---------------------------------------------------------------------------
def ref_forward(x_nhwc, params):
    dn = ("NHWC", "HWIO", "NHWC")
    y = lax.conv_general_dilated(x_nhwc, params["w1"], (1, 1), "SAME",
                                 dimension_numbers=dn) + params["b1"]
    y = jnp.maximum(y, 0.0)
    y = lax.conv_general_dilated(y, params["w2"], (1, 1), "SAME",
                                 dimension_numbers=dn) + params["b2"]
    pooled = jnp.mean(y, axis=(1, 2))                                  # (N,C)
    z = jnp.maximum(pooled @ params["wd1"] + params["bd1"], 0.0)       # (N,Cr)
    s = jax.nn.sigmoid(z @ params["wd2"] + params["bd2"])              # (N,C)
    return y * s[:, None, None, :] + x_nhwc


# ---------------------------------------------------------------------------
# Deterministic parameter init (shapes from QRCAB.__init__, style='standard')
# ---------------------------------------------------------------------------
def init_params(key, n_feat, reduction):
    Cr = n_feat // reduction
    ks = jax.random.split(key, 8)
    return {
        "w1": 0.05 * jax.random.normal(ks[0], (3, 3, n_feat, n_feat), jnp.float32),
        "b1": 0.01 * jax.random.normal(ks[1], (n_feat,), jnp.float32),
        "w2": 0.05 * jax.random.normal(ks[2], (3, 3, n_feat, n_feat), jnp.float32),
        "b2": 0.01 * jax.random.normal(ks[3], (n_feat,), jnp.float32),
        "wd1": 0.1 * jax.random.normal(ks[4], (n_feat, Cr), jnp.float32),
        "bd1": 0.01 * jax.random.normal(ks[5], (Cr,), jnp.float32),
        "wd2": 0.1 * jax.random.normal(ks[6], (Cr, n_feat), jnp.float32),
        "bd2": 0.01 * jax.random.normal(ks[7], (n_feat,), jnp.float32),
    }


if __name__ == "__main__":
    # QRCAB(conv=default_conv, n_feat=32, kernel_size=3, reduction=16,
    #       style='standard', pa=False, q_layer=False)
    N, C, H, W = 2, 32, 16, 16
    NUM_METADATA = 1

    key = jax.random.PRNGKey(0)
    kx, ka, kp = jax.random.split(key, 3)

    x_nchw = jax.random.normal(kx, (N, C, H, W), jnp.float32)              # x[0]
    attrs = jax.random.uniform(ka, (N, NUM_METADATA, 1, 1), jnp.float32)   # x[1]
    params = init_params(kp, n_feat=C, reduction=16)

    # NCHW (PyTorch layout) -> NHWC for the TPU kernel (channels on lanes)
    x_nhwc = jnp.transpose(x_nchw, (0, 2, 3, 1))

    res, attrs_out = qrcab_forward(x_nhwc, attrs, params)
    res = jax.block_until_ready(res)

    ref = ref_forward(x_nhwc, params)
    max_err = float(jnp.max(jnp.abs(res - ref)))
    assert max_err < 1e-3, f"mismatch vs reference: {max_err}"
    assert attrs_out.shape == (N, NUM_METADATA, 1, 1)

    print("KERNEL_OK")
</pallas_src>

<mosaic_0001>
module attributes {stable_mosaic.version = 11 : i64} {
  func.func @_qrcab_fused_kernel(%arg0: i32, %arg1: memref<1x16x16x32xf32, #tpu.memory_space<vmem>>, %arg2: memref<3x3x32x32xf32, #tpu.memory_space<vmem>>, %arg3: memref<1x32xf32, #tpu.memory_space<vmem>>, %arg4: memref<3x3x32x32xf32, #tpu.memory_space<vmem>>, %arg5: memref<1x32xf32, #tpu.memory_space<vmem>>, %arg6: memref<32x2xf32, #tpu.memory_space<vmem>>, %arg7: memref<1x2xf32, #tpu.memory_space<vmem>>, %arg8: memref<2x32xf32, #tpu.memory_space<vmem>>, %arg9: memref<1x32xf32, #tpu.memory_space<vmem>>, %arg10: memref<1x16x16x32xf32, #tpu.memory_space<vmem>>, %arg11: memref<18x32x32xf32, #tpu.memory_space<vmem>>, %arg12: memref<18x32x32xf32, #tpu.memory_space<vmem>>) attributes {dimension_semantics = [#tpu.dimension_semantics<parallel>], iteration_bounds = array<i64: 2>, scalar_prefetch = 0 : i64, scratch_operands = 2 : i64, tpu.core_type = #tpu.core_type<tc>, window_params = [{transform_indices = @transform_0, window_bounds = array<i64: 1, 16, 16, 32>}, {pipeline_mode = #tpu.pipeline_mode<synchronous>, transform_indices = @transform_1, window_bounds = array<i64: 3, 3, 32, 32>}, {pipeline_mode = #tpu.pipeline_mode<synchronous>, transform_indices = @transform_2, window_bounds = array<i64: 1, 32>}, {pipeline_mode = #tpu.pipeline_mode<synchronous>, transform_indices = @transform_3, window_bounds = array<i64: 3, 3, 32, 32>}, {pipeline_mode = #tpu.pipeline_mode<synchronous>, transform_indices = @transform_4, window_bounds = array<i64: 1, 32>}, {pipeline_mode = #tpu.pipeline_mode<synchronous>, transform_indices = @transform_5, window_bounds = array<i64: 32, 2>}, {pipeline_mode = #tpu.pipeline_mode<synchronous>, transform_indices = @transform_6, window_bounds = array<i64: 1, 2>}, {pipeline_mode = #tpu.pipeline_mode<synchronous>, transform_indices = @transform_7, window_bounds = array<i64: 2, 32>}, {pipeline_mode = #tpu.pipeline_mode<synchronous>, transform_indices = @transform_8, window_bounds = array<i64: 1, 32>}, {transform_indices = @transform_9, window_bounds = array<i64: 1, 16, 16, 32>}]} {
    %c0 = arith.constant 0 : index
    %c0_0 = arith.constant 0 : index
    %c0_1 = arith.constant 0 : index
    %c0_2 = arith.constant 0 : index
    %0 = vector.load %arg1[%c0, %c0_0, %c0_1, %c0_2] : memref<1x16x16x32xf32, #tpu.memory_space<vmem>>, vector<1x16x16x32xf32>
    %1 = vector.shape_cast %0 : vector<1x16x16x32xf32> to vector<16x16x32xf32>
    %cst = arith.constant 0.000000e+00 : f32
    %2 = vector.broadcast %cst : f32 to vector<18x32x32xf32>
    %c0_3 = arith.constant 0 : index
    %c0_4 = arith.constant 0 : index
    %c0_5 = arith.constant 0 : index
    %3 = vector.load %arg11[%c0_3, %c0_4, %c0_5] : memref<18x32x32xf32, #tpu.memory_space<vmem>>, vector<18x32x32xf32>
    tpu.vector_store %arg11[%c0_3, %c0_4, %c0_5], %2 {strides = array<i32>} : memref<18x32x32xf32, #tpu.memory_space<vmem>>, vector<18x32x32xf32>,
    %c1 = arith.constant 1 : index
    %c8 = arith.constant 8 : index
    %c0_6 = arith.constant 0 : index
    %4 = vector.load %arg11[%c1, %c8, %c0_6] : memref<18x32x32xf32, #tpu.memory_space<vmem>>, vector<16x16x32xf32>
    tpu.vector_store %arg11[%c1, %c8, %c0_6], %1 {strides = array<i32>} : memref<18x32x32xf32, #tpu.memory_space<vmem>>, vector<16x16x32xf32>,
    %cst_7 = arith.constant 0.000000e+00 : f32
    %5 = vector.broadcast %cst_7 : f32 to vector<256x32xf32>
    %c0_8 = arith.constant 0 : index
    %c7 = arith.constant 7 : index
    %c0_9 = arith.constant 0 : index
    %6 = vector.load %arg11[%c0_8, %c7, %c0_9] : memref<18x32x32xf32, #tpu.memory_space<vmem>>, vector<16x16x32xf32>
    %7 = vector.shape_cast %6 : vector<16x16x32xf32> to vector<256x32xf32>
    %c0_10 = arith.constant 0 : index
    %c0_11 = arith.constant 0 : index
    %c0_12 = arith.constant 0 : index
    %c0_13 = arith.constant 0 : index
    %8 = vector.load %arg2[%c0_10, %c0_11, %c0_12, %c0_13] : memref<3x3x32x32xf32, #tpu.memory_space<vmem>>, vector<1x1x32x32xf32>
    %9 = vector.shape_cast %8 : vector<1x1x32x32xf32> to vector<32x32xf32>
    %cst_14 = arith.constant dense<0.000000e+00> : vector<256x32xf32>
    %10 = tpu.matmul %7, %9, %cst_14 {dimension_numbers = #tpu.dot_dimension_numbers<[1], [0], [0], [1], [0, 0, 1, 1], [], []>} : vector<256x32xf32>, vector<32x32xf32>, vector<256x32xf32> -> vector<256x32xf32>
    %11 = arith.addf %5, %10 : vector<256x32xf32>
    %c0_15 = arith.constant 0 : index
    %c8_16 = arith.constant 8 : index
    %c0_17 = arith.constant 0 : index
    %12 = vector.load %arg11[%c0_15, %c8_16, %c0_17] : memref<18x32x32xf32, #tpu.memory_space<vmem>>, vector<16x16x32xf32>
    %13 = vector.shape_cast %12 : vector<16x16x32xf32> to vector<256x32xf32>
    %c0_18 = arith.constant 0 : index
    %c1_19 = arith.constant 1 : index
    %c0_20 = arith.constant 0 : index
    %c0_21 = arith.constant 0 : index
    %14 = vector.load %arg2[%c0_18, %c1_19, %c0_20, %c0_21] : memref<3x3x32x32xf32, #tpu.memory_space<vmem>>, vector<1x1x32x32xf32>
    %15 = vector.shape_cast %14 : vector<1x1x32x32xf32> to vector<32x32xf32>
    %cst_22 = arith.constant dense<0.000000e+00> : vector<256x32xf32>
    %16 = tpu.matmul %13, %15, %cst_22 {dimension_numbers = #tpu.dot_dimension_numbers<[1], [0], [0], [1], [0, 0, 1, 1], [], []>} : vector<256x32xf32>, vector<32x32xf32>, vector<256x32xf32> -> vector<256x32xf32>
    %17 = arith.addf %11, %16 : vector<256x32xf32>
    %c0_23 = arith.constant 0 : index
    %c9 = arith.constant 9 : index
    %c0_24 = arith.constant 0 : index
    %18 = vector.load %arg11[%c0_23, %c9, %c0_24] : memref<18x32x32xf32, #tpu.memory_space<vmem>>, vector<16x16x32xf32>
    %19 = vector.shape_cast %18 : vector<16x16x32xf32> to vector<256x32xf32>
    %c0_25 = arith.constant 0 : index
    %c2 = arith.constant 2 : index
    %c0_26 = arith.constant 0 : index
    %c0_27 = arith.constant 0 : index
    %20 = vector.load %arg2[%c0_25, %c2, %c0_26, %c0_27] : memref<3x3x32x32xf32, #tpu.memory_space<vmem>>, vector<1x1x32x32xf32>
    %21 = vector.shape_cast %20 : vector<1x1x32x32xf32> to vector<32x32xf32>
    %cst_28 = arith.constant dense<0.000000e+00> : vector<256x32xf32>
    %22 = tpu.matmul %19, %21, %cst_28 {dimension_numbers = #tpu.dot_dimension_numbers<[1], [0], [0], [1], [0, 0, 1, 1], [], []>} : vector<256x32xf32>, vector<32x32xf32>, vector<256x32xf32> -> vector<256x32xf32>
    %23 = arith.addf %17, %22 : vector<256x32xf32>
    %c1_29 = arith.constant 1 : index
    %c7_30 = arith.constant 7 : index
    %c0_31 = arith.constant 0 : index
    %24 = vector.load %arg11[%c1_29, %c7_30, %c0_31] : memref<18x32x32xf32, #tpu.memory_space<vmem>>, vector<16x16x32xf32>
    %25 = vector.shape_cast %24 : vector<16x16x32xf32> to vector<256x32xf32>
    %c1_32 = arith.constant 1 : index
    %c0_33 = arith.constant 0 : index
    %c0_34 = arith.constant 0 : index
    %c0_35 = arith.constant 0 : index
    %26 = vector.load %arg2[%c1_32, %c0_33, %c0_34, %c0_35] : memref<3x3x32x32xf32, #tpu.memory_space<vmem>>, vector<1x1x32x32xf32>
    %27 = vector.shape_cast %26 : vector<1x1x32x32xf32> to vector<32x32xf32>
    %cst_36 = arith.constant dense<0.000000e+00> : vector<256x32xf32>
    %28 = tpu.matmul %25, %27, %cst_36 {dimension_numbers = #tpu.dot_dimension_numbers<[1], [0], [0], [1], [0, 0, 1, 1], [], []>} : vector<256x32xf32>, vector<32x32xf32>, vector<256x32xf32> -> vector<256x32xf32>
    %29 = arith.addf %23, %28 : vector<256x32xf32>
    %c1_37 = arith.constant 1 : index
    %c8_38 = arith.constant 8 : index
    %c0_39 = arith.constant 0 : index
    %30 = vector.load %arg11[%c1_37, %c8_38, %c0_39] : memref<18x32x32xf32, #tpu.memory_space<vmem>>, vector<16x16x32xf32>
    %31 = vector.shape_cast %30 : vector<16x16x32xf32> to vector<256x32xf32>
    %c1_40 = arith.constant 1 : index
    %c1_41 = arith.constant 1 : index
    %c0_42 = arith.constant 0 : index
    %c0_43 = arith.constant 0 : index
    %32 = vector.load %arg2[%c1_40, %c1_41, %c0_42, %c0_43] : memref<3x3x32x32xf32, #tpu.memory_space<vmem>>, vector<1x1x32x32xf32>
    %33 = vector.shape_cast %32 : vector<1x1x32x32xf32> to vector<32x32xf32>
    %cst_44 = arith.constant dense<0.000000e+00> : vector<256x32xf32>
    %34 = tpu.matmul %31, %33, %cst_44 {dimension_numbers = #tpu.dot_dimension_numbers<[1], [0], [0], [1], [0, 0, 1, 1], [], []>} : vector<256x32xf32>, vector<32x32xf32>, vector<256x32xf32> -> vector<256x32xf32>
    %35 = arith.addf %29, %34 : vector<256x32xf32>
    %c1_45 = arith.constant 1 : index
    %c9_46 = arith.constant 9 : index
    %c0_47 = arith.constant 0 : index
    %36 = vector.load %arg11[%c1_45, %c9_46, %c0_47] : memref<18x32x32xf32, #tpu.memory_space<vmem>>, vector<16x16x32xf32>
    %37 = vector.shape_cast %36 : vector<16x16x32xf32> to vector<256x32xf32>
    %c1_48 = arith.constant 1 : index
    %c2_49 = arith.constant 2 : index
    %c0_50 = arith.constant 0 : index
    %c0_51 = arith.constant 0 : index
    %38 = vector.load %arg2[%c1_48, %c2_49, %c0_50, %c0_51] : memref<3x3x32x32xf32, #tpu.memory_space<vmem>>, vector<1x1x32x32xf32>
    %39 = vector.shape_cast %38 : vector<1x1x32x32xf32> to vector<32x32xf32>
    %cst_52 = arith.constant dense<0.000000e+00> : vector<256x32xf32>
    %40 = tpu.matmul %37, %39, %cst_52 {dimension_numbers = #tpu.dot_dimension_numbers<[1], [0], [0], [1], [0, 0, 1, 1], [], []>} : vector<256x32xf32>, vector<32x32xf32>, vector<256x32xf32> -> vector<256x32xf32>
    %41 = arith.addf %35, %40 : vector<256x32xf32>
    %c2_53 = arith.constant 2 : index
    %c7_54 = arith.constant 7 : index
    %c0_55 = arith.constant 0 : index
    %42 = vector.load %arg11[%c2_53, %c7_54, %c0_55] : memref<18x32x32xf32, #tpu.memory_space<vmem>>, vector<16x16x32xf32>
    %43 = vector.shape_cast %42 : vector<16x16x32xf32> to vector<256x32xf32>
    %c2_56 = arith.constant 2 : index
    %c0_57 = arith.constant 0 : index
    %c0_58 = arith.constant 0 : index
    %c0_59 = arith.constant 0 : index
    %44 = vector.load %arg2[%c2_56, %c0_57, %c0_58, %c0_59] : memref<3x3x32x32xf32, #tpu.memory_space<vmem>>, vector<1x1x32x32xf32>
    %45 = vector.shape_cast %44 : vector<1x1x32x32xf32> to vector<32x32xf32>
    %cst_60 = arith.constant dense<0.000000e+00> : vector<256x32xf32>
    %46 = tpu.matmul %43, %45, %cst_60 {dimension_numbers = #tpu.dot_dimension_numbers<[1], [0], [0], [1], [0, 0, 1, 1], [], []>} : vector<256x32xf32>, vector<32x32xf32>, vector<256x32xf32> -> vector<256x32xf32>
    %47 = arith.addf %41, %46 : vector<256x32xf32>
    %c2_61 = arith.constant 2 : index
    %c8_62 = arith.constant 8 : index
    %c0_63 = arith.constant 0 : index
    %48 = vector.load %arg11[%c2_61, %c8_62, %c0_63] : memref<18x32x32xf32, #tpu.memory_space<vmem>>, vector<16x16x32xf32>
    %49 = vector.shape_cast %48 : vector<16x16x32xf32> to vector<256x32xf32>
    %c2_64 = arith.constant 2 : index
    %c1_65 = arith.constant 1 : index
    %c0_66 = arith.constant 0 : index
    %c0_67 = arith.constant 0 : index
    %50 = vector.load %arg2[%c2_64, %c1_65, %c0_66, %c0_67] : memref<3x3x32x32xf32, #tpu.memory_space<vmem>>, vector<1x1x32x32xf32>
    %51 = vector.shape_cast %50 : vector<1x1x32x32xf32> to vector<32x32xf32>
    %cst_68 = arith.constant dense<0.000000e+00> : vector<256x32xf32>
    %52 = tpu.matmul %49, %51, %cst_68 {dimension_numbers = #tpu.dot_dimension_numbers<[1], [0], [0], [1], [0, 0, 1, 1], [], []>} : vector<256x32xf32>, vector<32x32xf32>, vector<256x32xf32> -> vector<256x32xf32>
    %53 = arith.addf %47, %52 : vector<256x32xf32>
    %c2_69 = arith.constant 2 : index
    %c9_70 = arith.constant 9 : index
    %c0_71 = arith.constant 0 : index
    %54 = vector.load %arg11[%c2_69, %c9_70, %c0_71] : memref<18x32x32xf32, #tpu.memory_space<vmem>>, vector<16x16x32xf32>
    %55 = vector.shape_cast %54 : vector<16x16x32xf32> to vector<256x32xf32>
    %c2_72 = arith.constant 2 : index
    %c2_73 = arith.constant 2 : index
    %c0_74 = arith.constant 0 : index
    %c0_75 = arith.constant 0 : index
    %56 = vector.load %arg2[%c2_72, %c2_73, %c0_74, %c0_75] : memref<3x3x32x32xf32, #tpu.memory_space<vmem>>, vector<1x1x32x32xf32>
    %57 = vector.shape_cast %56 : vector<1x1x32x32xf32> to vector<32x32xf32>
    %cst_76 = arith.constant dense<0.000000e+00> : vector<256x32xf32>
    %58 = tpu.matmul %55, %57, %cst_76 {dimension_numbers = #tpu.dot_dimension_numbers<[1], [0], [0], [1], [0, 0, 1, 1], [], []>} : vector<256x32xf32>, vector<32x32xf32>, vector<256x32xf32> -> vector<256x32xf32>
    %59 = arith.addf %53, %58 : vector<256x32xf32>
    %c0_77 = arith.constant 0 : index
    %c0_78 = arith.constant 0 : index
    %60 = vector.load %arg3[%c0_77, %c0_78] : memref<1x32xf32, #tpu.memory_space<vmem>>, vector<1x32xf32>
    %61 = vector.broadcast %60 : vector<1x32xf32> to vector<256x32xf32>
    %62 = arith.addf %59, %61 : vector<256x32xf32>
    %cst_79 = arith.constant 0.000000e+00 : f32
    %63 = vector.broadcast %cst_79 : f32 to vector<256x32xf32>
    %64 = arith.maximumf %62, %63 : vector<256x32xf32>
    %cst_80 = arith.constant 0.000000e+00 : f32
    %65 = vector.broadcast %cst_80 : f32 to vector<18x32x32xf32>
    %c0_81 = arith.constant 0 : index
    %c0_82 = arith.constant 0 : index
    %c0_83 = arith.constant 0 : index
    %66 = vector.load %arg12[%c0_81, %c0_82, %c0_83] : memref<18x32x32xf32, #tpu.memory_space<vmem>>, vector<18x32x32xf32>
    tpu.vector_store %arg12[%c0_81, %c0_82, %c0_83], %65 {strides = array<i32>} : memref<18x32x32xf32, #tpu.memory_space<vmem>>, vector<18x32x32xf32>,
    %67 = vector.shape_cast %64 : vector<256x32xf32> to vector<16x16x32xf32>
    %c1_84 = arith.constant 1 : index
    %c8_85 = arith.constant 8 : index
    %c0_86 = arith.constant 0 : index
    %68 = vector.load %arg12[%c1_84, %c8_85, %c0_86] : memref<18x32x32xf32, #tpu.memory_space<vmem>>, vector<16x16x32xf32>
    tpu.vector_store %arg12[%c1_84, %c8_85, %c0_86], %67 {strides = array<i32>} : memref<18x32x32xf32, #tpu.memory_space<vmem>>, vector<16x16x32xf32>,
    %cst_87 = arith.constant 0.000000e+00 : f32
    %69 = vector.broadcast %cst_87 : f32 to vector<256x32xf32>
    %c0_88 = arith.constant 0 : index
    %c7_89 = arith.constant 7 : index
    %c0_90 = arith.constant 0 : index
    %70 = vector.load %arg12[%c0_88, %c7_89, %c0_90] : memref<18x32x32xf32, #tpu.memory_space<vmem>>, vector<16x16x32xf32>
    %71 = vector.shape_cast %70 : vector<16x16x32xf32> to vector<256x32xf32>
    %c0_91 = arith.constant 0 : index
    %c0_92 = arith.constant 0 : index
    %c0_93 = arith.constant 0 : index
    %c0_94 = arith.constant 0 : index
    %72 = vector.load %arg4[%c0_91, %c0_92, %c0_93, %c0_94] : memref<3x3x32x32xf32, #tpu.memory_space<vmem>>, vector<1x1x32x32xf32>
    %73 = vector.shape_cast %72 : vector<1x1x32x32xf32> to vector<32x32xf32>
    %cst_95 = arith.constant dense<0.000000e+00> : vector<256x32xf32>
    %74 = tpu.matmul %71, %73, %cst_95 {dimension_numbers = #tpu.dot_dimension_numbers<[1], [0], [0], [1], [0, 0, 1, 1], [], []>} : vector<256x32xf32>, vector<32x32xf32>, vector<256x32xf32> -> vector<256x32xf32>
    %75 = arith.addf %69, %74 : vector<256x32xf32>
    %c0_96 = arith.constant 0 : index
    %c8_97 = arith.constant 8 : index
    %c0_98 = arith.constant 0 : index
    %76 = vector.load %arg12[%c0_96, %c8_97, %c0_98] : memref<18x32x32xf32, #tpu.memory_space<vmem>>, vector<16x16x32xf32>
    %77 = vector.shape_cast %76 : vector<16x16x32xf32> to vector<256x32xf32>
    %c0_99 = arith.constant 0 : index
    %c1_100 = arith.constant 1 : index
    %c0_101 = arith.constant 0 : index
    %c0_102 = arith.constant 0 : index
    %78 = vector.load %arg4[%c0_99, %c1_100, %c0_101, %c0_102] : memref<3x3x32x32xf32, #tpu.memory_space<vmem>>, vector<1x1x32x32xf32>
    %79 = vector.shape_cast %78 : vector<1x1x32x32xf32> to vector<32x32xf32>
    %cst_103 = arith.constant dense<0.000000e+00> : vector<256x32xf32>
    %80 = tpu.matmul %77, %79, %cst_103 {dimension_numbers = #tpu.dot_dimension_numbers<[1], [0], [0], [1], [0, 0, 1, 1], [], []>} : vector<256x32xf32>, vector<32x32xf32>, vector<256x32xf32> -> vector<256x32xf32>
    %81 = arith.addf %75, %80 : vector<256x32xf32>
    %c0_104 = arith.constant 0 : index
    %c9_105 = arith.constant 9 : index
    %c0_106 = arith.constant 0 : index
    %82 = vector.load %arg12[%c0_104, %c9_105, %c0_106] : memref<18x32x32xf32, #tpu.memory_space<vmem>>, vector<16x16x32xf32>
    %83 = vector.shape_cast %82 : vector<16x16x32xf32> to vector<256x32xf32>
    %c0_107 = arith.constant 0 : index
    %c2_108 = arith.constant 2 : index
    %c0_109 = arith.constant 0 : index
    %c0_110 = arith.constant 0 : index
    %84 = vector.load %arg4[%c0_107, %c2_108, %c0_109, %c0_110] : memref<3x3x32x32xf32, #tpu.memory_space<vmem>>, vector<1x1x32x32xf32>
    %85 = vector.shape_cast %84 : vector<1x1x32x32xf32> to vector<32x32xf32>
    %cst_111 = arith.constant dense<0.000000e+00> : vector<256x32xf32>
    %86 = tpu.matmul %83, %85, %cst_111 {dimension_numbers = #tpu.dot_dimension_numbers<[1], [0], [0], [1], [0, 0, 1, 1], [], []>} : vector<256x32xf32>, vector<32x32xf32>, vector<256x32xf32> -> vector<256x32xf32>
    %87 = arith.addf %81, %86 : vector<256x32xf32>
    %c1_112 = arith.constant 1 : index
    %c7_113 = arith.constant 7 : index
    %c0_114 = arith.constant 0 : index
    %88 = vector.load %arg12[%c1_112, %c7_113, %c0_114] : memref<18x32x32xf32, #tpu.memory_space<vmem>>, vector<16x16x32xf32>
    %89 = vector.shape_cast %88 : vector<16x16x32xf32> to vector<256x32xf32>
    %c1_115 = arith.constant 1 : index
    %c0_116 = arith.constant 0 : index
    %c0_117 = arith.constant 0 : index
    %c0_118 = arith.constant 0 : index
    %90 = vector.load %arg4[%c1_115, %c0_116, %c0_117, %c0_118] : memref<3x3x32x32xf32, #tpu.memory_space<vmem>>, vector<1x1x32x32xf32>
    %91 = vector.shape_cast %90 : vector<1x1x32x32xf32> to vector<32x32xf32>
    %cst_119 = arith.constant dense<0.000000e+00> : vector<256x32xf32>
    %92 = tpu.matmul %89, %91, %cst_119 {dimension_numbers = #tpu.dot_dimension_numbers<[1], [0], [0], [1], [0, 0, 1, 1], [], []>} : vector<256x32xf32>, vector<32x32xf32>, vector<256x32xf32> -> vector<256x32xf32>
    %93 = arith.addf %87, %92 : vector<256x32xf32>
    %c1_120 = arith.constant 1 : index
    %c8_121 = arith.constant 8 : index
    %c0_122 = arith.constant 0 : index
    %94 = vector.load %arg12[%c1_120, %c8_121, %c0_122] : memref<18x32x32xf32, #tpu.memory_space<vmem>>, vector<16x16x32xf32>
    %95 = vector.shape_cast %94 : vector<16x16x32xf32> to vector<256x32xf32>
    %c1_123 = arith.constant 1 : index
    %c1_124 = arith.constant 1 : index
    %c0_125 = arith.constant 0 : index
    %c0_126 = arith.constant 0 : index
    %96 = vector.load %arg4[%c1_123, %c1_124, %c0_125, %c0_126] : memref<3x3x32x32xf32, #tpu.memory_space<vmem>>, vector<1x1x32x32xf32>
    %97 = vector.shape_cast %96 : vector<1x1x32x32xf32> to vector<32x32xf32>
    %cst_127 = arith.constant dense<0.000000e+00> : vector<256x32xf32>
    %98 = tpu.matmul %95, %97, %cst_127 {dimension_numbers = #tpu.dot_dimension_numbers<[1], [0], [0], [1], [0, 0, 1, 1], [], []>} : vector<256x32xf32>, vector<32x32xf32>, vector<256x32xf32> -> vector<256x32xf32>
    %99 = arith.addf %93, %98 : vector<256x32xf32>
    %c1_128 = arith.constant 1 : index
    %c9_129 = arith.constant 9 : index
    %c0_130 = arith.constant 0 : index
    %100 = vector.load %arg12[%c1_128, %c9_129, %c0_130] : memref<18x32x32xf32, #tpu.memory_space<vmem>>, vector<16x16x32xf32>
    %101 = vector.shape_cast %100 : vector<16x16x32xf32> to vector<256x32xf32>
    %c1_131 = arith.constant 1 : index
    %c2_132 = arith.constant 2 : index
    %c0_133 = arith.constant 0 : index
    %c0_134 = arith.constant 0 : index
    %102 = vector.load %arg4[%c1_131, %c2_132, %c0_133, %c0_134] : memref<3x3x32x32xf32, #tpu.memory_space<vmem>>, vector<1x1x32x32xf32>
    %103 = vector.shape_cast %102 : vector<1x1x32x32xf32> to vector<32x32xf32>
    %cst_135 = arith.constant dense<0.000000e+00> : vector<256x32xf32>
    %104 = tpu.matmul %101, %103, %cst_135 {dimension_numbers = #tpu.dot_dimension_numbers<[1], [0], [0], [1], [0, 0, 1, 1], [], []>} : vector<256x32xf32>, vector<32x32xf32>, vector<256x32xf32> -> vector<256x32xf32>
    %105 = arith.addf %99, %104 : vector<256x32xf32>
    %c2_136 = arith.constant 2 : index
    %c7_137 = arith.constant 7 : index
    %c0_138 = arith.constant 0 : index
    %106 = vector.load %arg12[%c2_136, %c7_137, %c0_138] : memref<18x32x32xf32, #tpu.memory_space<vmem>>, vector<16x16x32xf32>
    %107 = vector.shape_cast %106 : vector<16x16x32xf32> to vector<256x32xf32>
    %c2_139 = arith.constant 2 : index
    %c0_140 = arith.constant 0 : index
    %c0_141 = arith.constant 0 : index
    %c0_142 = arith.constant 0 : index
    %108 = vector.load %arg4[%c2_139, %c0_140, %c0_141, %c0_142] : memref<3x3x32x32xf32, #tpu.memory_space<vmem>>, vector<1x1x32x32xf32>
    %109 = vector.shape_cast %108 : vector<1x1x32x32xf32> to vector<32x32xf32>
    %cst_143 = arith.constant dense<0.000000e+00> : vector<256x32xf32>
    %110 = tpu.matmul %107, %109, %cst_143 {dimension_numbers = #tpu.dot_dimension_numbers<[1], [0], [0], [1], [0, 0, 1, 1], [], []>} : vector<256x32xf32>, vector<32x32xf32>, vector<256x32xf32> -> vector<256x32xf32>
    %111 = arith.addf %105, %110 : vector<256x32xf32>
    %c2_144 = arith.constant 2 : index
    %c8_145 = arith.constant 8 : index
    %c0_146 = arith.constant 0 : index
    %112 = vector.load %arg12[%c2_144, %c8_145, %c0_146] : memref<18x32x32xf32, #tpu.memory_space<vmem>>, vector<16x16x32xf32>
    %113 = vector.shape_cast %112 : vector<16x16x32xf32> to vector<256x32xf32>
    %c2_147 = arith.constant 2 : index
    %c1_148 = arith.constant 1 : index
    %c0_149 = arith.constant 0 : index
    %c0_150 = arith.constant 0 : index
    %114 = vector.load %arg4[%c2_147, %c1_148, %c0_149, %c0_150] : memref<3x3x32x32xf32, #tpu.memory_space<vmem>>, vector<1x1x32x32xf32>
    %115 = vector.shape_cast %114 : vector<1x1x32x32xf32> to vector<32x32xf32>
    %cst_151 = arith.constant dense<0.000000e+00> : vector<256x32xf32>
    %116 = tpu.matmul %113, %115, %cst_151 {dimension_numbers = #tpu.dot_dimension_numbers<[1], [0], [0], [1], [0, 0, 1, 1], [], []>} : vector<256x32xf32>, vector<32x32xf32>, vector<256x32xf32> -> vector<256x32xf32>
    %117 = arith.addf %111, %116 : vector<256x32xf32>
    %c2_152 = arith.constant 2 : index
    %c9_153 = arith.constant 9 : index
    %c0_154 = arith.constant 0 : index
    %118 = vector.load %arg12[%c2_152, %c9_153, %c0_154] : memref<18x32x32xf32, #tpu.memory_space<vmem>>, vector<16x16x32xf32>
    %119 = vector.shape_cast %118 : vector<16x16x32xf32> to vector<256x32xf32>
    %c2_155 = arith.constant 2 : index
    %c2_156 = arith.constant 2 : index
    %c0_157 = arith.constant 0 : index
    %c0_158 = arith.constant 0 : index
    %120 = vector.load %arg4[%c2_155, %c2_156, %c0_157, %c0_158] : memref<3x3x32x32xf32, #tpu.memory_space<vmem>>, vector<1x1x32x32xf32>
    %121 = vector.shape_cast %120 : vector<1x1x32x32xf32> to vector<32x32xf32>
    %cst_159 = arith.constant dense<0.000000e+00> : vector<256x32xf32>
    %122 = tpu.matmul %119, %121, %cst_159 {dimension_numbers = #tpu.dot_dimension_numbers<[1], [0], [0], [1], [0, 0, 1, 1], [], []>} : vector<256x32xf32>, vector<32x32xf32>, vector<256x32xf32> -> vector<256x32xf32>
    %123 = arith.addf %117, %122 : vector<256x32xf32>
    %c0_160 = arith.constant 0 : index
    %c0_161 = arith.constant 0 : index
    %124 = vector.load %arg5[%c0_160, %c0_161] : memref<1x32xf32, #tpu.memory_space<vmem>>, vector<1x32xf32>
    %125 = vector.broadcast %124 : vector<1x32xf32> to vector<256x32xf32>
    %126 = arith.addf %123, %125 : vector<256x32xf32>
    %cst_162 = arith.constant dense<0.000000e+00> : vector<32xf32>
    %127 = vector.multi_reduction <add>, %126, %cst_162 [0] : vector<256x32xf32> to vector<32xf32>
    %128 = vector.shape_cast %127 : vector<32xf32> to vector<1x32xf32>
    %cst_163 = arith.constant 2.560000e+02 : f32
    %129 = vector.broadcast %cst_163 : f32 to vector<1x32xf32>
    %130 = arith.divf %128, %129 : vector<1x32xf32>
    %c0_164 = arith.constant 0 : index
    %c0_165 = arith.constant 0 : index
    %131 = vector.load %arg6[%c0_164, %c0_165] : memref<32x2xf32, #tpu.memory_space<vmem>>, vector<32x2xf32>
    %cst_166 = arith.constant dense<0.000000e+00> : vector<1x2xf32>
    %132 = tpu.matmul %130, %131, %cst_166 {dimension_numbers = #tpu.dot_dimension_numbers<[1], [0], [0], [1], [0, 0, 1, 1], [], []>} : vector<1x32xf32>, vector<32x2xf32>, vector<1x2xf32> -> vector<1x2xf32>
    %c0_167 = arith.constant 0 : index
    %c0_168 = arith.constant 0 : index
    %133 = vector.load %arg7[%c0_167, %c0_168] : memref<1x2xf32, #tpu.memory_space<vmem>>, vector<1x2xf32>
    %134 = arith.addf %132, %133 : vector<1x2xf32>
    %cst_169 = arith.constant 0.000000e+00 : f32
    %135 = vector.broadcast %cst_169 : f32 to vector<1x2xf32>
    %136 = arith.maximumf %134, %135 : vector<1x2xf32>
    %c0_170 = arith.constant 0 : index
    %c0_171 = arith.constant 0 : index
    %137 = vector.load %arg8[%c0_170, %c0_171] : memref<2x32xf32, #tpu.memory_space<vmem>>, vector<2x32xf32>
    %cst_172 = arith.constant dense<0.000000e+00> : vector<1x32xf32>
    %138 = tpu.matmul %136, %137, %cst_172 {dimension_numbers = #tpu.dot_dimension_numbers<[1], [0], [0], [1], [0, 0, 1, 1], [], []>} : vector<1x2xf32>, vector<2x32xf32>, vector<1x32xf32> -> vector<1x32xf32>
    %c0_173 = arith.constant 0 : index
    %c0_174 = arith.constant 0 : index
    %139 = vector.load %arg9[%c0_173, %c0_174] : memref<1x32xf32, #tpu.memory_space<vmem>>, vector<1x32xf32>
    %140 = arith.addf %138, %139 : vector<1x32xf32>
    %141 = arith.negf %140 : vector<1x32xf32>
    %142 = math.exp %141 : vector<1x32xf32>
    %cst_175 = arith.constant 1.000000e+00 : f32
    %143 = vector.broadcast %cst_175 : f32 to vector<1x32xf32>
    %144 = arith.addf %143, %142 : vector<1x32xf32>
    %145 = arith.divf %143, %144 : vector<1x32xf32>
    %146 = vector.broadcast %145 : vector<1x32xf32> to vector<256x32xf32>
    %147 = arith.mulf %126, %146 : vector<256x32xf32>
    %148 = vector.shape_cast %1 : vector<16x16x32xf32> to vector<256x32xf32>
    %149 = arith.addf %147, %148 : vector<256x32xf32>
    %150 = vector.shape_cast %149 : vector<256x32xf32> to vector<16x16x32xf32>
    %c0_176 = arith.constant 0 : index
    %c0_177 = arith.constant 0 : index
    %c0_178 = arith.constant 0 : index
    %c0_179 = arith.constant 0 : index
    %151 = vector.load %arg10[%c0_176, %c0_177, %c0_178, %c0_179] : memref<1x16x16x32xf32, #tpu.memory_space<vmem>>, vector<1x16x16x32xf32>
    %152 = vector.shape_cast %151 : vector<1x16x16x32xf32> to vector<16x16x32xf32>
    %153 = vector.shape_cast %150 : vector<16x16x32xf32> to vector<1x16x16x32xf32>
    tpu.vector_store %arg10[%c0_176, %c0_177, %c0_178, %c0_179], %153 {strides = array<i32>} : memref<1x16x16x32xf32, #tpu.memory_space<vmem>>, vector<1x16x16x32xf32>,
    return
  }
  func.func @transform_0(%arg0: i32) -> (i32, i32, i32, i32) {
    %c0_i32 = arith.constant 0 : i32
    %c0_i32_0 = arith.constant 0 : i32
    %c0_i32_1 = arith.constant 0 : i32
    %c0_i32_2 = arith.constant 0 : i32
    return %arg0, %c0_i32, %c0_i32_0, %c0_i32_1 : i32, i32, i32, i32
  }
  func.func @transform_1(%arg0: i32) -> (i32, i32, i32, i32) {
    %c0_i32 = arith.constant 0 : i32
    %c0_i32_0 = arith.constant 0 : i32
    %c0_i32_1 = arith.constant 0 : i32
    %c0_i32_2 = arith.constant 0 : i32
    %c0_i32_3 = arith.constant 0 : i32
    return %c0_i32, %c0_i32_0, %c0_i32_1, %c0_i32_2 : i32, i32, i32, i32
  }
  func.func @transform_2(%arg0: i32) -> (i32, i32) {
    %c0_i32 = arith.constant 0 : i32
    %c0_i32_0 = arith.constant 0 : i32
    %c0_i32_1 = arith.constant 0 : i32
    return %c0_i32, %c0_i32_0 : i32, i32
  }
  func.func @transform_3(%arg0: i32) -> (i32, i32, i32, i32) {
    %c0_i32 = arith.constant 0 : i32
    %c0_i32_0 = arith.constant 0 : i32
    %c0_i32_1 = arith.constant 0 : i32
    %c0_i32_2 = arith.constant 0 : i32
    %c0_i32_3 = arith.constant 0 : i32
    return %c0_i32, %c0_i32_0, %c0_i32_1, %c0_i32_2 : i32, i32, i32, i32
  }
  func.func @transform_4(%arg0: i32) -> (i32, i32) {
    %c0_i32 = arith.constant 0 : i32
    %c0_i32_0 = arith.constant 0 : i32
    %c0_i32_1 = arith.constant 0 : i32
    return %c0_i32, %c0_i32_0 : i32, i32
  }
  func.func @transform_5(%arg0: i32) -> (i32, i32) {
    %c0_i32 = arith.constant 0 : i32
    %c0_i32_0 = arith.constant 0 : i32
    %c0_i32_1 = arith.constant 0 : i32
    return %c0_i32, %c0_i32_0 : i32, i32
  }
  func.func @transform_6(%arg0: i32) -> (i32, i32) {
    %c0_i32 = arith.constant 0 : i32
    %c0_i32_0 = arith.constant 0 : i32
    %c0_i32_1 = arith.constant 0 : i32
    return %c0_i32, %c0_i32_0 : i32, i32
  }
  func.func @transform_7(%arg0: i32) -> (i32, i32) {
    %c0_i32 = arith.constant 0 : i32
    %c0_i32_0 = arith.constant 0 : i32
    %c0_i32_1 = arith.constant 0 : i32
    return %c0_i32, %c0_i32_0 : i32, i32
  }
  func.func @transform_8(%arg0: i32) -> (i32, i32) {
    %c0_i32 = arith.constant 0 : i32
    %c0_i32_0 = arith.constant 0 : i32
    %c0_i32_1 = arith.constant 0 : i32
    return %c0_i32, %c0_i32_0 : i32, i32
  }
  func.func @transform_9(%arg0: i32) -> (i32, i32, i32, i32) {
    %c0_i32 = arith.constant 0 : i32
    %c0_i32_0 = arith.constant 0 : i32
    %c0_i32_1 = arith.constant 0 : i32
    %c0_i32_2 = arith.constant 0 : i32
    return %arg0, %c0_i32, %c0_i32_0, %c0_i32_1 : i32, i32, i32, i32
  }
}

</mosaic_0001>

<bundles_post_ra>
// kernel: tpu_custom_call.1
= control target key start
LH: loop header
LB: loop body
LE: loop exit
PB: predicated region body
PF: predicated region fallthrough
CT: control target
= control target key end

     0   :  { %14 = vsyncpa [#allocation5], 0  ;;  %s13876_s0 = inlined_call_operand.hbm [shape: f32[2,16,16,32], index: 0, kind: input, shape index: {}]   ;;  %s13877_s1 = inlined_call_operand.hbm [shape: f32[3,3,32,32], index: 1, kind: input, shape index: {}]   ;;  %s13878_s2 = inlined_call_operand.vmem [shape: f32[1,32], index: 2, kind: input, shape index: {}]   ;;  %s13879_s3 = inlined_call_operand.hbm [shape: f32[3,3,32,32], index: 3, kind: input, shape index: {}]   ;;  %s13880_s4 = inlined_call_operand.vmem [shape: f32[1,32], index: 4, kind: input, shape index: {}]   ;;  %s13881_s5 = inlined_call_operand.vmem [shape: f32[32,2], index: 5, kind: input, shape index: {}]   ;;  %s13882_s6 = inlined_call_operand.vmem [shape: f32[1,2], index: 6, kind: input, shape index: {}]   ;;  %s13883_s7 = inlined_call_operand.vmem [shape: f32[2,32], index: 7, kind: input, shape index: {}]   ;;  %s13884_s8 = inlined_call_operand.vmem [shape: f32[1,32], index: 8, kind: input, shape index: {}]   ;;  %s13885_s9 = inlined_call_operand.hbm [shape: f32[2,16,16,32], index: 9, kind: output, shape index: {}]  }
   0x1   :  { %16 = vsyncpa [#allocation5 + $0x1], 0 }
   0x2   :  { %17 = vsyncpa [#allocation8], 0 }
   0x3   :  { %18 = vsyncpa [#allocation6], 0 }
   0x4   :  { %20 = vsyncpa [#allocation6 + $0x1], 0  ;;  %s11307_s30 = smov 0   ;;  %s11309_s10 = smov 0  }
   0x5   :  { %s11311_s11 = smov 0   ;;  %s11313_s12 = smov 0  }
   0x6 LB: > { %s11328_s13 = sadd.s32 4294967295, %s11244_s12   ;;  %s8067_s14 = sadd.s32 4294967294, %s11244_s12   ;;  %s11244_s12 = sphi %s11313_s12, %s14290_s12   ;;  %s11240_s11 = sphi %s11311_s11, %s14289_s11   ;;  %s11236_s10 = sphi %s11309_s10, %s14288_s10   ;;  %s11232_s30 = sphi %s11307_s30, %s14287_s30  }
   0x7   : > { %p46_p0 = scmp.ne.s32.totalorder %s11236_s10, %s11232_s30  ;;  %p13886_p1 = scmp.eq.s32.totalorder %s11328_s13, 0 }
   0x8   : > { %p244_p3 = scmp.eq.s32.totalorder %s8067_s14, 1  ;;  %p8068_p5 = scmp.ge.s32.totalorder %s11244_s12, 1 }
   0x9   : > { %p11337_p4 = por %p13886_p1, %p46_p0  ;;  %p251_p7 = scmp.lt.s32.totalorder %s11244_s12, 3 }
   0xa   : > { %p11342_p6 = por %p244_p3, %p46_p0  ;;  %s11246_s18 = smov [#allocation7]  }
   0xb   : > { %s14053_s15 = scalar_select %p11337_p4, 1, 0 }
   0xc   : > { %s14054_s16 = scalar_select %p11342_p6, 1, 0 }
   0xd   : > { %p11347_p8 = pnand %p8068_p5, %p251_p7  ;;  %s263_s19 = sshll.u32 %s11246_s18, 4  ;;  %s11351_s19 = int_to_ptr.vmem [resolvable:$true] %s263_s19 }
   0xe   : > { %14055 = sst [smem:[#allocation14_spill]] %s14054_s16  ;;  %s11247_s21 = smov [#allocation9]  }
   0xf   : > { %p11022_p9 = pneg %p11347_p8  ;;  %s279_s22 = sshll.u32 %s11247_s21, 4  ;;  %s11362_s22 = int_to_ptr.vmem [resolvable:$true] %s279_s22 }
  0x10   : > { %s11088_s25 = scalar_lea.hbm %s13877_s1, 4608 }
  0x11   : > { %p11358_p11 = pnand %p11022_p9, %p13886_p1  ;;  %p11089_p12 = scmp.ne.s32.totalorder %s13877_s1, %s11088_s25 }
  0x12   : > { %p11095_p5 = scmp.lt.u32.totalorder %s11088_s25, %s13877_s1 }
  0x13   : > { %p11090_p13 = pneg %p11358_p11 }
  0x15   : > { %p11091_p0 = pnand %p11090_p13, %p11089_p12 }
  0x17   : > { %p11092_p3 = pneg %p11091_p0 }
  0x19   : > { %p11097_p7 = pnand %p11095_p5, %p11092_p3 }
  0x1b   : > { %11100 = shalt.err (!%p11097_p7)
}
  0x1c   : > { %s11101_s14 = scalar_lea.vmem %s11351_s19, 4608  ;;  %p11109_p2 = scmp.lt.s32.totalorder %s11351_s19, %s11351_s19 }
  0x1d   : > { %p11102_p9 = scmp.ne.s32.totalorder %s11351_s19, %s11101_s14  ;;  %p11110_p12 = scmp.lt.s32.totalorder %s11101_s14, %s11101_s14 }
  0x1f   : > { %p11104_p10 = pnand %p11102_p9, %p11090_p13  ;;  %p11111_p0 = por %p11110_p12, %p11109_p2 }
  0x21   : > { %p11105_p1 = pneg %p11104_p10 }
  0x23   : > { %p11112_p6 = pnand %p11111_p0, %p11105_p1 }
  0x25   : > { %11115 = shalt.err (!%p11112_p6)
}
  0x26   : > { %s13888_s18 = smov 128   ;;  %s13889_s21 = smov 8  }
  0x27   : > { %11025 = dma.hbm_to_vmem [thread:$0]  (!%p11358_p11), %s13877_s1, 4608, %s11351_s19, [#allocation8], %s13888_s18, %s13888_s18, %s13889_s21  }
  0x28   : > { %s11116_s27 = scalar_lea.hbm %s13879_s3, 4608 }
  0x29   : > { %p11117_p1 = scmp.ne.s32.totalorder %s13879_s3, %s11116_s27  ;;  %p11123_p10 = scmp.lt.u32.totalorder %s11116_s27, %s13879_s3 }
  0x2b   : > { %p11119_p2 = pnand %p11117_p1, %p11090_p13 }
  0x2d   : > { %p11120_p6 = pneg %p11119_p2 }
  0x2f   : > { %p11125_p3 = pnand %p11123_p10, %p11120_p6 }
  0x31   : > { %11128 = shalt.err (!%p11125_p3)
}
  0x32   : > { %s11129_s19 = scalar_lea.vmem %s11362_s22, 4608  ;;  %p11137_p12 = scmp.lt.s32.totalorder %s11362_s22, %s11362_s22 }
  0x33   : > { %p11130_p5 = scmp.ne.s32.totalorder %s11362_s22, %s11129_s19  ;;  %p11138_p0 = scmp.lt.s32.totalorder %s11129_s19, %s11129_s19 }
  0x35   : > { %p11132_p7 = pnand %p11130_p5, %p11090_p13  ;;  %p11139_p1 = por %p11138_p0, %p11137_p12 }
  0x37   : > { %p11133_p9 = pneg %p11132_p7 }
  0x39   : > { %p11140_p2 = pnand %p11139_p1, %p11133_p9 }
  0x3b   : > { %11143 = shalt.err (!%p11140_p2)
}
  0x3c   : > { %11028 = dma.hbm_to_vmem [thread:$0]  (!%p11358_p11), %s13879_s3, 4608, %s11362_s22, [#allocation8], %s13888_s18, %s13888_s18, %s13889_s21  }
  0x3d   : > { %s11423_s20 = sadd.s32 1, %s11244_s12   ;;  %s33_s24 = sadd.s32 1, %s11240_s11 }
  0x3e   : > { %s30_s25 = ssub.s32 %s11244_s12, %s11423_s20  ;;  %p40_p13 = scmp.ne.s32.totalorder %s11240_s11, %s11236_s10 }
  0x3f   : > { %p31_p6 = scmp.eq.s32.totalorder %s30_s25, 0  ;;  %p41_p10 = scmp.eq.s32.totalorder %s11244_s12, 0 }
  0x40   : > { %p14058_p3 = scmp.eq.s32.totalorder %s11328_s13, 1  ;;  %p11039_p7 = scmp.lt.s32.totalorder %s11244_s12, 2 }
  0x41   : > { %s11439_s27 = scalar_select %p31_p6, %s11240_s11, %s33_s24  }
  0x42   : > { %p11433_p5 = por %p14058_p3, %p40_p13  ;;  %p42_p9 = por %p41_p10, %p40_p13 }
  0x43   : > { %s308_s28 = sand.u32 1, %s11240_s11   ;;  %s8667_s22 = sshll.u32 %s11244_s12, 12 }
  0x44   : > { %s14059_s26 = scalar_select %p11433_p5, 1, 0 }
  0x45   : > { %s8072_s29 = sshll.u32 %s308_s28, 8  ;;  %s11446_s16 = scalar_lea.hbm %s13876_s0, %s8667_s22 }
  0x46   : > { %s312_s23 = scalar_lea.vmem [#allocation4], %s8072_s29  ;;  %p11450_p11 = pnand %p11039_p7, %p42_p9 }
  0x47   : > { %s319_s25 = sshll.u32 %s312_s23, 4  ;;  %s11454_s18 = scalar_lea.sflag [#allocation5], %s308_s28  ;;  %s11448_s25 = int_to_ptr.vmem [resolvable:$true] %s319_s25 }
  0x48   : > { %s11144_s21 = scalar_lea.hbm %s11446_s16, 4096  ;;  %p11146_p0 = pneg %p11450_p11 }
  0x49   : > { %p11145_p12 = scmp.ne.s32.totalorder %s11446_s16, %s11144_s21  ;;  %s11149_s14 = scalar_lea.hbm %s13876_s0, 8192 }
  0x4a   : > { %p11150_p13 = scmp.lt.u32.totalorder %s11446_s16, %s13876_s0  ;;  %p11151_p6 = scmp.lt.u32.totalorder %s11149_s14, %s11144_s21 }
  0x4b   : > { %p11147_p1 = pnand %p11146_p0, %p11145_p12  ;;  %p11153_p3 = scmp.lt.u32.totalorder %s11144_s21, %s11446_s16 }
  0x4c   : > { %p11152_p10 = por %p11151_p6, %p11150_p13 }
  0x4d   : > { %p11148_p2 = pneg %p11147_p1 }
  0x4e   : > { %p11154_p7 = por %p11153_p3, %p11152_p10 }
  0x50   : > { %p11155_p9 = pnand %p11154_p7, %p11148_p2 }
  0x52   : > { %11158 = shalt.err (!%p11155_p9)
}
  0x53   : > { %s11159_s28 = scalar_lea.vmem %s11448_s25, 4096  ;;  %s11250_s29 = smov [#allocation4]  }
  0x54   : > { %p11160_p12 = scmp.ne.s32.totalorder %s11448_s25, %s11159_s28  ;;  %s11164_s22 = sshll.u32 %s11250_s29, 4  ;;  %s11165_s22 = int_to_ptr.vmem [resolvable:$false] %s11164_s22 }
  0x55   : > { %s11166_s19 = scalar_lea.vmem %s11165_s22, 8192  ;;  %p11167_p4 = scmp.lt.s32.totalorder %s11448_s25, %s11165_s22 }
  0x56   : > { %p11162_p1 = pnand %p11160_p12, %p11146_p0  ;;  %p11168_p13 = scmp.lt.s32.totalorder %s11166_s19, %s11159_s28 }
  0x58   : > { %p11163_p5 = pneg %p11162_p1  ;;  %p11169_p6 = por %p11168_p13, %p11167_p4 }
  0x5a   : > { %p11170_p10 = pnand %p11169_p6, %p11163_p5 }
  0x5c   : > { %11173 = shalt.err (!%p11170_p10)
}
  0x5d   : > { %s14061_s21 = smov 8   ;;  %s14062_s14 = smov 128  }
  0x5e   : > { %11032 = dma.hbm_to_vmem [thread:$0]  (!%p11450_p11), %s11446_s16, 4096, %s11448_s25, %s11454_s18, %s14062_s14, %s14062_s14, %s14061_s21  }
  0x5f   : > { %331 = sbr.rel (%p11347_p8) target bundleno = 2228 (0x8b4), region = 56 }
  0x66   : > { %s11488_s23 = sand.u32 1, %s11236_s10   ;;  %p14063_p4 = scmp.ne.s32.totalorder %s14053_s15, 0 }
  0x67   : > { %s8076_s28 = sshll.u32 %s11488_s23, 8  ;;  %s334_s29 = scalar_lea.sflag [#allocation5], %s11488_s23 }
  0x68   : > { %s11494_s24 = scalar_lea.vmem [#allocation4], %s8076_s28 }
  0x69   : > { %11219 = dma.done.wait (%p14063_p4), %s334_s29, 4096  }
  0x6a   : > { %11221 = vsyncadd (%p14063_p4), %s334_s29, 4294963200  ;;  %p14064_p5 = scmp.eq.s32.totalorder %s11328_s13, 0 }
  0x6c   : > { %11223 = dma.done.wait (%p14064_p5), [#allocation8], 9216   ;;  %p14065_p8 = pmov %p14064_p5 }
  0x6d   : > { %vm412_vm0 = vcmask 261120   ;;  %v13892_v0 = vmov 0.0   ;;  %v587_v1 = vld [vmem:[#allocation7 + $0x20] sm:$0xff]  ;;  %v588_v2 = vld [vmem:[#allocation7 + $0x28] sm:$0xff]  ;;  %v589_v3 = vld [vmem:[#allocation7 + $0x30] sm:$0xff]  ;;  %vm11253_vm1 = vmmov 0  }
  0x6e   : > { %11225 = vsyncadd (%p14065_p8), [#allocation8], 4294958080  ;;  %414 = vst.msk [vmem:[#allocation2 + $0x8] sm:$0xff] %vm412_vm0, %v13892_v0  ;;  %v10348_v4 = vpack.c.bf16 %v588_v2, %v587_v1  ;;  %v590_v5 = vld [vmem:[#allocation7 + $0x38] sm:$0xff]  ;;  %v550_v8 = vld [vmem:[#allocation7] sm:$0xff]  ;;  %vm7781_vm2 = vcmask 1041408  }
  0x6f   : > { %413 = vst.msk [vmem:[#allocation2] sm:$0xff] %vm412_vm0, %v13892_v0  ;;  %415 = vst.msk [vmem:[#allocation2 + $0x10] sm:$0xff] %vm412_vm0, %v13892_v0  ;;  %v10352_v7 = vpack.c.bf16 %v590_v5, %v589_v3  ;;  %v551_v9 = vld [vmem:[#allocation7 + $0x8] sm:$0xff]  ;;  %v11794_v10 = vld [vmem:[%s11494_s24] sm:$0xff]  ;;  %vm7777_vm3 = vcmask 15360   ;;  %s13739_s21 = scalar_lea.vmem [#allocation10], %s8076_s28 }
  0x70   : > { %416 = vst.msk [vmem:[#allocation2 + $0x18] sm:$0xff] %vm412_vm0, %v13892_v0  ;;  %417 = vst.msk [vmem:[#allocation2 + $0x20] sm:$0xff] %vm412_vm0, %v13892_v0  ;;  %10349 = vmatprep.subr.bf16.mxu0 %v10348_v4  ;;  %v11799_v11 = vld [vmem:[%s11494_s24 + $0x8] sm:$0xff]  ;;  %v11802_v12 = vld [vmem:[%s11494_s24 + $0x10] sm:$0xff]  ;;  %v10356_v17 = vpack.c.bf16 %v551_v9, %v550_v8  ;;  %s8668_s28 = sshll.u32 %s11328_s13, 12  ;;  %s7975_s14 = sshll.u32 %s13739_s21, 4  ;;  %s13804_s14 = int_to_ptr.vmem [resolvable:$true] %s7975_s14 }
  0x71   : > { %418 = vst.msk [vmem:[#allocation2 + $0x28] sm:$0xff] %vm412_vm0, %v13892_v0  ;;  %419 = vst.msk [vmem:[#allocation2 + $0x30] sm:$0xff] %vm412_vm0, %v13892_v0  ;;  %v11805_v13 = vld [vmem:[%s11494_s24 + $0x18] sm:$0xff]  ;;  %10351 = vmatpush3.bf16.msra.mxu0 %v10348_v4  ;;  %v11814_v14 = vld [vmem:[%s11494_s24 + $0x20] sm:$0xff]  ;;  %s7962_s15 = scalar_lea.sflag [#allocation6], %s11488_s23  ;;  %s11174_s17 = scalar_lea.vmem %s13804_s14, 4096 }
  0x72   : > { %420 = vst.msk [vmem:[#allocation2 + $0x38] sm:$0xff] %vm412_vm0, %v13892_v0  ;;  %421 = vst.msk [vmem:[#allocation2 + $0x40] sm:$0xff] %vm412_vm0, %v13892_v0  ;;  %v11817_v15 = vld [vmem:[%s11494_s24 + $0x28] sm:$0xff]  ;;  %v11820_v16 = vld [vmem:[%s11494_s24 + $0x30] sm:$0xff]  ;;  %10353 = vmatprep.subr.bf16.mxu0 %v10352_v7  ;;  %p11175_p11 = scmp.ne.s32.totalorder %s13804_s14, %s11174_s17  ;;  %p14283_p0 = scmp.ne.s32.totalorder %s14059_s26, 0 }
  0x73   : > { %422 = vst.msk [vmem:[#allocation2 + $0x48] sm:$0xff] %vm412_vm0, %v13892_v0  ;;  %423 = vst.msk [vmem:[#allocation2 + $0x50] sm:$0xff] %vm412_vm0, %v13892_v0  ;;  %v11829_v18 = vld [vmem:[%s11494_s24 + $0x38] sm:$0xff]  ;;  %v11832_v19 = vld [vmem:[%s11494_s24 + $0x40] sm:$0xff]  ;;  %s11254_s18 = smov [#allocation10]  }
  0x74   : > { %424 = vst.msk [vmem:[#allocation2 + $0x58] sm:$0xff] %vm412_vm0, %v13892_v0  ;;  %425 = vst.msk [vmem:[#allocation2 + $0x60] sm:$0xff] %vm412_vm0, %v13892_v0  ;;  %v11835_v20 = vld [vmem:[%s11494_s24 + $0x48] sm:$0xff]  ;;  %v11844_v22 = vld [vmem:[%s11494_s24 + $0x50] sm:$0xff]  ;;  %p11176_p2 = pnand %p11175_p11, %p14283_p0  ;;  %s11178_s16 = sshll.u32 %s11254_s18, 4  ;;  %s11179_s16 = int_to_ptr.vmem [resolvable:$false] %s11178_s16 }
  0x75   : > { %426 = vst.msk [vmem:[#allocation2 + $0x68] sm:$0xff] %vm412_vm0, %v13892_v0  ;;  %427 = vst.msk [vmem:[#allocation2 + $0x70] sm:$0xff] %vm412_vm0, %v13892_v0  ;;  %v554_v6 = vld [vmem:[#allocation2 + $0x8] sm:$0xff]  ;;  %v11847_v23 = vld [vmem:[%s11494_s24 + $0x58] sm:$0xff]  ;;  %10355 = vmatpush3.bf16.msra.mxu0 %v10352_v7  ;;  %s11180_s25 = scalar_lea.vmem %s11179_s16, 8192  ;;  %p11181_p7 = scmp.lt.s32.totalorder %s13804_s14, %s11179_s16 }
  0x76   : > { %428 = vst.msk [vmem:[#allocation2 + $0x78] sm:$0xff] %vm412_vm0, %v13892_v0  ;;  %429 = vst.msk [vmem:[#allocation2 + $0x80] sm:$0xff] %vm412_vm0, %v13892_v0  ;;  %9332 = vmatprep.mubr.msk.f32.mxu0 %vm412_vm0, %v554_v6  ;;  %v555_v21 = vld [vmem:[#allocation2 + $0x10] sm:$0xff]  ;;  %v11850_v24 = vld [vmem:[%s11494_s24 + $0x60] sm:$0xff]  ;;  %10357 = vmatprep.subr.bf16.mxu0 %v10356_v17  ;;  %p11177_p3 = pneg %p11176_p2  ;;  %p11182_p9 = scmp.lt.s32.totalorder %s11180_s25, %s11174_s17 }
  0x77   : > { %430 = vst.msk [vmem:[#allocation2 + $0x88] sm:$0xff] %vm412_vm0, %v13892_v0  ;;  %431 = vst.msk [vmem:[#allocation2 + $0x90] sm:$0xff] %vm412_vm0, %v13892_v0  ;;  %v11859_v25 = vld [vmem:[%s11494_s24 + $0x68] sm:$0xff]  ;;  %v11862_v26 = vld [vmem:[%s11494_s24 + $0x70] sm:$0xff] }
  0x78   : > { %432 = vst.msk [vmem:[#allocation2 + $0x98] sm:$0xff] %vm412_vm0, %v13892_v0  ;;  %433 = vst.msk [vmem:[#allocation2 + $0xa0] sm:$0xff] %vm412_vm0, %v13892_v0  ;;  %v11865_v27 = vld [vmem:[%s11494_s24 + $0x78] sm:$0xff]  ;;  %v552_v28 = vld [vmem:[#allocation7 + $0x10] sm:$0xff]  ;;  %9333 = vmatmul.mubr.msk.f32.vlgmr.msra.gmra.mrb[0].mxu0 %vm412_vm0, %v555_v21  ;;  %p11183_p12 = por %p11182_p9, %p11181_p7 }
  0x79   : > { %434 = vst.msk [vmem:[#allocation2 + $0xa8] sm:$0xff] %vm412_vm0, %v13892_v0  ;;  %435 = vst.msk [vmem:[#allocation2 + $0xb0] sm:$0xff] %vm412_vm0, %v13892_v0  ;;  %v553_v29 = vld [vmem:[#allocation7 + $0x18] sm:$0xff]  ;;  %v11874_v30 = vld [vmem:[%s11494_s24 + $0x80] sm:$0xff]  ;;  %10359 = vmatpush3.bf16.msra.mxu0 %v10356_v17 }
  0x7a   : > { %436 = vst.msk [vmem:[#allocation2 + $0xb8] sm:$0xff] %vm412_vm0, %v13892_v0  ;;  %437 = vst.msk [vmem:[#allocation2 + $0xc0] sm:$0xff] %vm412_vm0, %v13892_v0  ;;  %v10360_v31 = vpack.c.bf16 %v553_v29, %v552_v28  ;;  %v11879_v32 = vld [vmem:[%s11494_s24 + $0x88] sm:$0xff]  ;;  %v11882_v33 = vld [vmem:[%s11494_s24 + $0x90] sm:$0xff]  ;;  %p11184_p1 = pnand %p11183_p12, %p11177_p3 }
  0x7b   : > { %438 = vst.msk [vmem:[#allocation2 + $0xc8] sm:$0xff] %vm412_vm0, %v13892_v0  ;;  %439 = vst.msk [vmem:[#allocation2 + $0xd0] sm:$0xff] %vm412_vm0, %v13892_v0  ;;  %v11885_v34 = vld [vmem:[%s11494_s24 + $0x98] sm:$0xff]  ;;  %v11896_v36 = vld [vmem:[%s11494_s24 + $0xa0] sm:$0xff] }
  0x7c   : > { %440 = vst.msk [vmem:[#allocation2 + $0xd8] sm:$0xff] %vm412_vm0, %v13892_v0  ;;  %441 = vst.msk [vmem:[#allocation2 + $0xe0] sm:$0xff] %vm412_vm0, %v13892_v0  ;;  %v11899_v37 = vld [vmem:[%s11494_s24 + $0xa8] sm:$0xff]  ;;  %10361 = vmatprep.subr.bf16.mxu0 %v10360_v31  ;;  %v11919_v41 = vld [vmem:[%s11494_s24 + $0xb0] sm:$0xff] }
  0x7d   : > { %442 = vst.msk [vmem:[#allocation2 + $0xe8] sm:$0xff] %vm412_vm0, %v13892_v0  ;;  %443 = vst.msk [vmem:[#allocation2 + $0xf0] sm:$0xff] %vm412_vm0, %v13892_v0  ;;  %10363 = vmatpush3.bf16.msra.mxu0 %v10360_v31  ;;  %v11922_v42 = vld [vmem:[%s11494_s24 + $0xb8] sm:$0xff]  ;;  %v11931_v44 = vld [vmem:[%s11494_s24 + $0xc0] sm:$0xff] }
  0x7e   : > { %444 = vst.msk [vmem:[#allocation2 + $0xf8] sm:$0xff] %vm412_vm0, %v13892_v0  ;;  %445 = vst.msk [vmem:[#allocation2 + $0x100] sm:$0xff] %vm412_vm0, %v13892_v0  ;;  %v11938_v45 = vld [vmem:[%s11494_s24 + $0xc8] sm:$0xff]  ;;  %v11941_v46 = vld [vmem:[%s11494_s24 + $0xd0] sm:$0xff] }
  0x7f   : > { %446 = vst.msk [vmem:[#allocation2 + $0x108] sm:$0xff] %vm412_vm0, %v13892_v0  ;;  %447 = vst.msk [vmem:[#allocation2 + $0x110] sm:$0xff] %vm412_vm0, %v13892_v0  ;;  %v11944_v47 = vld [vmem:[%s11494_s24 + $0xd8] sm:$0xff]  ;;  %v11957_v49 = vld [vmem:[%s11494_s24 + $0xe0] sm:$0xff] }
  0x80   : > { %448 = vst.msk [vmem:[#allocation2 + $0x118] sm:$0xff] %vm412_vm0, %v13892_v0  ;;  %449 = vst.msk [vmem:[#allocation2 + $0x120] sm:$0xff] %vm412_vm0, %v13892_v0  ;;  %v11960_v50 = vld [vmem:[%s11494_s24 + $0xe8] sm:$0xff]  ;;  %v1266_v52 = vld [vmem:[#allocation7 + $0x40] sm:$0xff] }
  0x81   : > { %450 = vst.msk [vmem:[#allocation2 + $0x128] sm:$0xff] %vm412_vm0, %v13892_v0  ;;  %451 = vst.msk [vmem:[#allocation2 + $0x130] sm:$0xff] %vm412_vm0, %v13892_v0  ;;  %v1267_v53 = vld [vmem:[#allocation7 + $0x48] sm:$0xff] }
  0x82   : > { %452 = vst.msk [vmem:[#allocation2 + $0x138] sm:$0xff] %vm412_vm0, %v13892_v0  ;;  %453 = vst.msk [vmem:[#allocation2 + $0x140] sm:$0xff] %vm412_vm0, %v13892_v0  ;;  %v10364_v54 = vpack.c.bf16 %v1267_v53, %v1266_v52  ;;  %v518_v52 = vld [vmem:[#allocation2 + $0x7] sm:$0xff]  ;;  %v1268_v53 = vld [vmem:[#allocation7 + $0x50] sm:$0xff] }
  0x83   : > { %454 = vst.msk [vmem:[#allocation2 + $0x148] sm:$0xff] %vm412_vm0, %v13892_v0  ;;  %455 = vst.msk [vmem:[#allocation2 + $0x150] sm:$0xff] %vm412_vm0, %v13892_v0 }
  0x84   : > { %456 = vst.msk [vmem:[#allocation2 + $0x158] sm:$0xff] %vm412_vm0, %v13892_v0  ;;  %457 = vst.msk [vmem:[#allocation2 + $0x160] sm:$0xff] %vm412_vm0, %v13892_v0  ;;  %10365 = vmatprep.subr.bf16.mxu0 %v10364_v54 }
  0x85   : > { %458 = vst.msk [vmem:[#allocation2 + $0x168] sm:$0xff] %vm412_vm0, %v13892_v0  ;;  %459 = vst.msk [vmem:[#allocation2 + $0x170] sm:$0xff] %vm412_vm0, %v13892_v0 }
  0x86   : > { %460 = vst.msk [vmem:[#allocation2 + $0x178] sm:$0xff] %vm412_vm0, %v13892_v0  ;;  %461 = vst.msk [vmem:[#allocation2 + $0x180] sm:$0xff] %vm412_vm0, %v13892_v0 }
  0x87   : > { %462 = vst.msk [vmem:[#allocation2 + $0x188] sm:$0xff] %vm412_vm0, %v13892_v0  ;;  %463 = vst.msk [vmem:[#allocation2 + $0x190] sm:$0xff] %vm412_vm0, %v13892_v0 }
  0x88   : > { %464 = vst.msk [vmem:[#allocation2 + $0x198] sm:$0xff] %vm412_vm0, %v13892_v0  ;;  %465 = vst.msk [vmem:[#allocation2 + $0x1a0] sm:$0xff] %vm412_vm0, %v13892_v0 }
  0x89   : > { %466 = vst.msk [vmem:[#allocation2 + $0x1a8] sm:$0xff] %vm412_vm0, %v13892_v0  ;;  %467 = vst.msk [vmem:[#allocation2 + $0x1b0] sm:$0xff] %vm412_vm0, %v13892_v0 }
  0x8a   : > { %468 = vst.msk [vmem:[#allocation2 + $0x1b8] sm:$0xff] %vm412_vm0, %v13892_v0  ;;  %469 = vst.msk [vmem:[#allocation2 + $0x1c0] sm:$0xff] %vm412_vm0, %v13892_v0 }
  0x8b   : > { %470 = vst.msk [vmem:[#allocation2 + $0x1c8] sm:$0xff] %vm412_vm0, %v13892_v0  ;;  %471 = vst.msk [vmem:[#allocation2 + $0x1d0] sm:$0xff] %vm412_vm0, %v13892_v0 }
  0x8c   : > { %472 = vst.msk [vmem:[#allocation2 + $0x1d8] sm:$0xff] %vm412_vm0, %v13892_v0  ;;  %473 = vst.msk [vmem:[#allocation2 + $0x1e0] sm:$0xff] %vm412_vm0, %v13892_v0 }
  0x8d   : > { %474 = vst.msk [vmem:[#allocation2 + $0x1e8] sm:$0xff] %vm412_vm0, %v13892_v0  ;;  %475 = vst.msk [vmem:[#allocation2 + $0x1f0] sm:$0xff] %vm412_vm0, %v13892_v0 }
  0x8e   : > { %476 = vst.msk [vmem:[#allocation2 + $0x1f8] sm:$0xff] %vm412_vm0, %v13892_v0  ;;  %477 = vst.msk [vmem:[#allocation2 + $0x200] sm:$0xff] %vm412_vm0, %v13892_v0 }
  0x8f   : > { %478 = vst.msk [vmem:[#allocation2 + $0x208] sm:$0xff] %vm412_vm0, %v13892_v0  ;;  %479 = vst.msk [vmem:[#allocation2 + $0x210] sm:$0xff] %vm412_vm0, %v13892_v0 }
  0x90   : > { %480 = vst.msk [vmem:[#allocation2 + $0x218] sm:$0xff] %vm412_vm0, %v13892_v0  ;;  %481 = vst.msk [vmem:[#allocation2 + $0x220] sm:$0xff] %vm412_vm0, %v13892_v0 }
  0x91   : > { %482 = vst.msk [vmem:[#allocation2 + $0x228] sm:$0xff] %vm412_vm0, %v13892_v0  ;;  %483 = vst.msk [vmem:[#allocation2 + $0x230] sm:$0xff] %vm412_vm0, %v13892_v0 }
  0x92   : > { %484 = vst.msk [vmem:[#allocation2 + $0x238] sm:$0xff] %vm412_vm0, %v13892_v0  ;;  %4035 = vst.msk [vmem:[#allocation3] sm:$0xff] %vm412_vm0, %v13892_v0 }
  0x93   : > { %4036 = vst.msk [vmem:[#allocation3 + $0x8] sm:$0xff] %vm412_vm0, %v13892_v0  ;;  %4037 = vst.msk [vmem:[#allocation3 + $0x10] sm:$0xff] %vm412_vm0, %v13892_v0 }
  0x94   : > { %4038 = vst.msk [vmem:[#allocation3 + $0x18] sm:$0xff] %vm412_vm0, %v13892_v0  ;;  %4039 = vst.msk [vmem:[#allocation3 + $0x20] sm:$0xff] %vm412_vm0, %v13892_v0 }
  0x95   : > { %4040 = vst.msk [vmem:[#allocation3 + $0x28] sm:$0xff] %vm412_vm0, %v13892_v0  ;;  %4041 = vst.msk [vmem:[#allocation3 + $0x30] sm:$0xff] %vm412_vm0, %v13892_v0 }
  0x96   : > { %4042 = vst.msk [vmem:[#allocation3 + $0x38] sm:$0xff] %vm412_vm0, %v13892_v0  ;;  %4043 = vst.msk [vmem:[#allocation3 + $0x40] sm:$0xff] %vm412_vm0, %v13892_v0 }
  0x97   : > { %4044 = vst.msk [vmem:[#allocation3 + $0x48] sm:$0xff] %vm412_vm0, %v13892_v0  ;;  %4045 = vst.msk [vmem:[#allocation3 + $0x50] sm:$0xff] %vm412_vm0, %v13892_v0 }
  0x98   : > { %4046 = vst.msk [vmem:[#allocation3 + $0x58] sm:$0xff] %vm412_vm0, %v13892_v0  ;;  %4047 = vst.msk [vmem:[#allocation3 + $0x60] sm:$0xff] %vm412_vm0, %v13892_v0 }
  0x99   : > { %4048 = vst.msk [vmem:[#allocation3 + $0x68] sm:$0xff] %vm412_vm0, %v13892_v0  ;;  %4049 = vst.msk [vmem:[#allocation3 + $0x70] sm:$0xff] %vm412_vm0, %v13892_v0 }
  0x9a   : > { %4050 = vst.msk [vmem:[#allocation3 + $0x78] sm:$0xff] %vm412_vm0, %v13892_v0  ;;  %4051 = vst.msk [vmem:[#allocation3 + $0x80] sm:$0xff] %vm412_vm0, %v13892_v0 }
  0x9b   : > { %4052 = vst.msk [vmem:[#allocation3 + $0x88] sm:$0xff] %vm412_vm0, %v13892_v0  ;;  %4053 = vst.msk [vmem:[#allocation3 + $0x90] sm:$0xff] %vm412_vm0, %v13892_v0 }
  0x9c   : > { %4054 = vst.msk [vmem:[#allocation3 + $0x98] sm:$0xff] %vm412_vm0, %v13892_v0  ;;  %4055 = vst.msk [vmem:[#allocation3 + $0xa0] sm:$0xff] %vm412_vm0, %v13892_v0 }
  0x9d   : > { %4056 = vst.msk [vmem:[#allocation3 + $0xa8] sm:$0xff] %vm412_vm0, %v13892_v0  ;;  %4057 = vst.msk [vmem:[#allocation3 + $0xb0] sm:$0xff] %vm412_vm0, %v13892_v0 }
  0x9e   : > { %4058 = vst.msk [vmem:[#allocation3 + $0xb8] sm:$0xff] %vm412_vm0, %v13892_v0  ;;  %4059 = vst.msk [vmem:[#allocation3 + $0xc0] sm:$0xff] %vm412_vm0, %v13892_v0 }
  0x9f   : > { %4060 = vst.msk [vmem:[#allocation3 + $0xc8] sm:$0xff] %vm412_vm0, %v13892_v0  ;;  %4061 = vst.msk [vmem:[#allocation3 + $0xd0] sm:$0xff] %vm412_vm0, %v13892_v0 }
  0xa0   : > { %4062 = vst.msk [vmem:[#allocation3 + $0xd8] sm:$0xff] %vm412_vm0, %v13892_v0  ;;  %4063 = vst.msk [vmem:[#allocation3 + $0xe0] sm:$0xff] %vm412_vm0, %v13892_v0 }
  0xa1   : > { %4064 = vst.msk [vmem:[#allocation3 + $0xe8] sm:$0xff] %vm412_vm0, %v13892_v0  ;;  %4065 = vst.msk [vmem:[#allocation3 + $0xf0] sm:$0xff] %vm412_vm0, %v13892_v0 }
  0xa2   : > { %4066 = vst.msk [vmem:[#allocation3 + $0xf8] sm:$0xff] %vm412_vm0, %v13892_v0  ;;  %4067 = vst.msk [vmem:[#allocation3 + $0x100] sm:$0xff] %vm412_vm0, %v13892_v0 }
  0xa3   : > { %4068 = vst.msk [vmem:[#allocation3 + $0x108] sm:$0xff] %vm412_vm0, %v13892_v0  ;;  %4069 = vst.msk [vmem:[#allocation3 + $0x110] sm:$0xff] %vm412_vm0, %v13892_v0 }
  0xa4   : > { %4070 = vst.msk [vmem:[#allocation3 + $0x118] sm:$0xff] %vm412_vm0, %v13892_v0  ;;  %4071 = vst.msk [vmem:[#allocation3 + $0x120] sm:$0xff] %vm412_vm0, %v13892_v0 }
  0xa5   : > { %4072 = vst.msk [vmem:[#allocation3 + $0x128] sm:$0xff] %vm412_vm0, %v13892_v0  ;;  %4073 = vst.msk [vmem:[#allocation3 + $0x130] sm:$0xff] %vm412_vm0, %v13892_v0 }
  0xa6   : > { %4074 = vst.msk [vmem:[#allocation3 + $0x138] sm:$0xff] %vm412_vm0, %v13892_v0  ;;  %4075 = vst.msk [vmem:[#allocation3 + $0x140] sm:$0xff] %vm412_vm0, %v13892_v0 }
  0xa7   : > { %4076 = vst.msk [vmem:[#allocation3 + $0x148] sm:$0xff] %vm412_vm0, %v13892_v0  ;;  %4077 = vst.msk [vmem:[#allocation3 + $0x150] sm:$0xff] %vm412_vm0, %v13892_v0 }
  0xa8   : > { %4078 = vst.msk [vmem:[#allocation3 + $0x158] sm:$0xff] %vm412_vm0, %v13892_v0  ;;  %4079 = vst.msk [vmem:[#allocation3 + $0x160] sm:$0xff] %vm412_vm0, %v13892_v0 }
  0xa9   : > { %4080 = vst.msk [vmem:[#allocation3 + $0x168] sm:$0xff] %vm412_vm0, %v13892_v0  ;;  %4081 = vst.msk [vmem:[#allocation3 + $0x170] sm:$0xff] %vm412_vm0, %v13892_v0 }
  0xaa   : > { %4082 = vst.msk [vmem:[#allocation3 + $0x178] sm:$0xff] %vm412_vm0, %v13892_v0  ;;  %4083 = vst.msk [vmem:[#allocation3 + $0x180] sm:$0xff] %vm412_vm0, %v13892_v0 }
  0xab   : > { %4084 = vst.msk [vmem:[#allocation3 + $0x188] sm:$0xff] %vm412_vm0, %v13892_v0  ;;  %4085 = vst.msk [vmem:[#allocation3 + $0x190] sm:$0xff] %vm412_vm0, %v13892_v0 }
  0xac   : > { %4086 = vst.msk [vmem:[#allocation3 + $0x198] sm:$0xff] %vm412_vm0, %v13892_v0  ;;  %4087 = vst.msk [vmem:[#allocation3 + $0x1a0] sm:$0xff] %vm412_vm0, %v13892_v0 }
  0xad   : > { %4088 = vst.msk [vmem:[#allocation3 + $0x1a8] sm:$0xff] %vm412_vm0, %v13892_v0  ;;  %4089 = vst.msk [vmem:[#allocation3 + $0x1b0] sm:$0xff] %vm412_vm0, %v13892_v0 }
  0xae   : > { %4090 = vst.msk [vmem:[#allocation3 + $0x1b8] sm:$0xff] %vm412_vm0, %v13892_v0  ;;  %4091 = vst.msk [vmem:[#allocation3 + $0x1c0] sm:$0xff] %vm412_vm0, %v13892_v0 }
  0xaf   : > { %4092 = vst.msk [vmem:[#allocation3 + $0x1c8] sm:$0xff] %vm412_vm0, %v13892_v0  ;;  %4093 = vst.msk [vmem:[#allocation3 + $0x1d0] sm:$0xff] %vm412_vm0, %v13892_v0 }
  0xb0   : > { %4094 = vst.msk [vmem:[#allocation3 + $0x1d8] sm:$0xff] %vm412_vm0, %v13892_v0  ;;  %4095 = vst.msk [vmem:[#allocation3 + $0x1e0] sm:$0xff] %vm412_vm0, %v13892_v0 }
  0xb1   : > { %4096 = vst.msk [vmem:[#allocation3 + $0x1e8] sm:$0xff] %vm412_vm0, %v13892_v0  ;;  %4097 = vst.msk [vmem:[#allocation3 + $0x1f0] sm:$0xff] %vm412_vm0, %v13892_v0 }
  0xb2   : > { %4098 = vst.msk [vmem:[#allocation3 + $0x1f8] sm:$0xff] %vm412_vm0, %v13892_v0  ;;  %4099 = vst.msk [vmem:[#allocation3 + $0x200] sm:$0xff] %vm412_vm0, %v13892_v0 }
  0xb3   : > { %4100 = vst.msk [vmem:[#allocation3 + $0x208] sm:$0xff] %vm412_vm0, %v13892_v0  ;;  %4101 = vst.msk [vmem:[#allocation3 + $0x210] sm:$0xff] %vm412_vm0, %v13892_v0 }
  0xb4   : > { %4102 = vst.msk [vmem:[#allocation3 + $0x218] sm:$0xff] %vm412_vm0, %v13892_v0  ;;  %4103 = vst.msk [vmem:[#allocation3 + $0x220] sm:$0xff] %vm412_vm0, %v13892_v0 }
  0xb5   : > { %4104 = vst.msk [vmem:[#allocation3 + $0x228] sm:$0xff] %vm412_vm0, %v13892_v0  ;;  %4105 = vst.msk [vmem:[#allocation3 + $0x230] sm:$0xff] %vm412_vm0, %v13892_v0 }
  0xb6   : > { %4106 = vst.msk [vmem:[#allocation3 + $0x238] sm:$0xff] %vm412_vm0, %v13892_v0  ;;  %14066 = vst [vmem:[#allocation15_spill] sm:$0xff] %v11794_v10  ;;  %v1269_v0 = vld [vmem:[#allocation7 + $0x58] sm:$0xff] }
  0xb7   : > { %486 = vst.msk [vmem:[#allocation2 + $0x28] sm:$0xff] %vm412_vm0, %v11794_v10  ;;  %14067 = vst [vmem:[#allocation16_spill] sm:$0xff] %v11799_v11  ;;  %v1658_v10 = vld [vmem:[#allocation7 + $0x70] sm:$0xff] }
  0xb8   : > { %14068 = vst [vmem:[#allocation17_spill] sm:$0xff] %v11802_v12  ;;  %14069 = vst [vmem:[#allocation18_spill] sm:$0xff] %v11805_v13 }
  0xb9   : > { %487 = vst.msk [vmem:[#allocation2 + $0x30] sm:$0xff] %vm412_vm0, %v11799_v11  ;;  %488 = vst.msk [vmem:[#allocation2 + $0x48] sm:$0xff] %vm412_vm0, %v11802_v12  ;;  %v1233_v11 = vld [vmem:[#allocation2 + $0x9] sm:$0xff] }
  0xba   : > { %489 = vst.msk [vmem:[#allocation2 + $0x50] sm:$0xff] %vm412_vm0, %v11805_v13  ;;  %14070 = vst [vmem:[#allocation19_spill] sm:$0xff] %v11814_v14 }
  0xbb   : > { %14071 = vst [vmem:[#allocation20_spill] sm:$0xff] %v11817_v15  ;;  %14072 = vst [vmem:[#allocation21_spill] sm:$0xff] %v11820_v16 }
  0xbc   : > { %490 = vst.msk [vmem:[#allocation2 + $0x68] sm:$0xff] %vm412_vm0, %v11814_v14  ;;  %491 = vst.msk [vmem:[#allocation2 + $0x70] sm:$0xff] %vm412_vm0, %v11817_v15  ;;  %v12174_v15 = vld [vmem:[%s11494_s24 + $0xf0] sm:$0xff]  ;;  %v12179_v14 = vld [vmem:[%s11494_s24 + $0xf8] sm:$0xff]  ;;  %s13802_s24 = scalar_lea.hbm %s13885_s9, %s8668_s28 }
  0xbd   : > { %492 = vst.msk [vmem:[#allocation2 + $0x88] sm:$0xff] %vm412_vm0, %v11820_v16  ;;  %14073 = vst [vmem:[#allocation22_spill] sm:$0xff] %v11829_v18 }
  0xbe   : > { %14074 = vst [vmem:[#allocation23_spill] sm:$0xff] %v11832_v19  ;;  %14075 = vst [vmem:[#allocation24_spill] sm:$0xff] %v11835_v20  ;;  %v11887_v35 = vld [vmem:[#allocation2 + $0x28] sm:$0xff] }
  0xbf   : > { %493 = vst.msk [vmem:[#allocation2 + $0x90] sm:$0xff] %vm412_vm0, %v11829_v18  ;;  %494 = vst.msk [vmem:[#allocation2 + $0xa8] sm:$0xff] %vm412_vm0, %v11832_v19  ;;  %9335 = vmatprep.mubr.msk.f32.mxu0 %vm412_vm0, %v11887_v35 }
  0xc0   : > { %495 = vst.msk [vmem:[#allocation2 + $0xb0] sm:$0xff] %vm412_vm0, %v11835_v20  ;;  %14076 = vst [vmem:[#allocation25_spill] sm:$0xff] %v11844_v22  ;;  %v11908_v38 = vld [vmem:[#allocation2 + $0x30] sm:$0xff]  ;;  %v11910_v39 = vld [vmem:[#allocation2 + $0x48] sm:$0xff] }
  0xc1   : > { %14077 = vst [vmem:[#allocation26_spill] sm:$0xff] %v11847_v23  ;;  %14078 = vst [vmem:[#allocation27_spill] sm:$0xff] %v11850_v24  ;;  %9336 = vmatmul.mubr.msk.f32.gmra.mrb[2].mxu0 %vm412_vm0, %v11908_v38  ;;  %v11916_v40 = vld [vmem:[#allocation2 + $0x50] sm:$0xff] }
  0xc2   : > { %496 = vst.msk [vmem:[#allocation2 + $0xc8] sm:$0xff] %vm412_vm0, %v11844_v22  ;;  %497 = vst.msk [vmem:[#allocation2 + $0xd0] sm:$0xff] %vm412_vm0, %v11847_v23  ;;  %9338 = vmatprep.mubr.msk.f32.mxu0 %vm412_vm0, %v11910_v39 }
  0xc3   : > { %498 = vst.msk [vmem:[#allocation2 + $0xe8] sm:$0xff] %vm412_vm0, %v11850_v24  ;;  %14079 = vst [vmem:[#allocation28_spill] sm:$0xff] %v11859_v25  ;;  %v11924_v43 = vld [vmem:[#allocation2 + $0x68] sm:$0xff]  ;;  %v11948_v48 = vld [vmem:[#allocation2 + $0x70] sm:$0xff] }
  0xc4   : > { %14080 = vst [vmem:[#allocation29_spill] sm:$0xff] %v11862_v26  ;;  %14081 = vst [vmem:[#allocation30_spill] sm:$0xff] %v11865_v27  ;;  %v11962_v51 = vld [vmem:[#allocation2 + $0x88] sm:$0xff] }
  0xc5   : > { %499 = vst.msk [vmem:[#allocation2 + $0xf0] sm:$0xff] %vm412_vm0, %v11859_v25  ;;  %500 = vst.msk [vmem:[#allocation2 + $0x108] sm:$0xff] %vm412_vm0, %v11862_v26  ;;  %9339 = vmatmul.mubr.msk.f32.gmra.mrb[4].mxu0 %vm412_vm0, %v11916_v40 }
  0xc6   : > { %501 = vst.msk [vmem:[#allocation2 + $0x110] sm:$0xff] %vm412_vm0, %v11865_v27  ;;  %14082 = vst [vmem:[#allocation31_spill] sm:$0xff] %v11874_v30  ;;  %9341 = vmatprep.mubr.msk.f32.mxu0 %vm412_vm0, %v11924_v43  ;;  %v11972_v55 = vld [vmem:[#allocation2 + $0x90] sm:$0xff]  ;;  %v11974_v56 = vld [vmem:[#allocation2 + $0xa8] sm:$0xff] }
  0xc7   : > { %502 = vst.msk [vmem:[#allocation2 + $0x128] sm:$0xff] %vm412_vm0, %v11874_v30  ;;  %14083 = vst [vmem:[#allocation32_spill] sm:$0xff] %v11879_v32  ;;  %v11980_v57 = vld [vmem:[#allocation2 + $0xb0] sm:$0xff] }
  0xc8   : > { %14084 = vst [vmem:[#allocation33_spill] sm:$0xff] %v11882_v33  ;;  %14085 = vst [vmem:[#allocation34_spill] sm:$0xff] %v11885_v34 }
  0xc9   : > { %503 = vst.msk [vmem:[#allocation2 + $0x130] sm:$0xff] %vm412_vm0, %v11879_v32  ;;  %504 = vst.msk [vmem:[#allocation2 + $0x148] sm:$0xff] %vm412_vm0, %v11882_v33  ;;  %9342 = vmatmul.mubr.msk.f32.gmra.mrb[6].mxu0 %vm412_vm0, %v11948_v48  ;;  %v11982_v58 = vld [vmem:[#allocation2 + $0xc8] sm:$0xff]  ;;  %v11988_v59 = vld [vmem:[#allocation2 + $0xd0] sm:$0xff] }
  0xca   : > { %505 = vst.msk [vmem:[#allocation2 + $0x150] sm:$0xff] %vm412_vm0, %v11885_v34  ;;  %14086 = vst [vmem:[#allocation35_spill] sm:$0xff] %v11896_v36  ;;  %9344 = vmatprep.mubr.msk.f32.mxu0 %vm412_vm0, %v11962_v51  ;;  %v11990_v60 = vld [vmem:[#allocation2 + $0xe8] sm:$0xff] }
  0xcb   : > { %14087 = vst [vmem:[#allocation36_spill] sm:$0xff] %v11899_v37  ;;  %506 = vst.msk [vmem:[#allocation2 + $0x168] sm:$0xff] %vm412_vm0, %v11896_v36  ;;  %v12115_v36 = vld [vmem:[#allocation2 + $0xe7] sm:$0xff] }
  0xcc   : > { %507 = vst.msk [vmem:[#allocation2 + $0x170] sm:$0xff] %vm412_vm0, %v11899_v37  ;;  %14088 = vst [vmem:[#allocation37_spill] sm:$0xff] %v11919_v41  ;;  %v11996_v61 = vld [vmem:[#allocation2 + $0xf0] sm:$0xff]  ;;  %v11998_v62 = vld [vmem:[#allocation2 + $0x108] sm:$0xff] }
  0xcd   : > { %14089 = vst [vmem:[#allocation38_spill] sm:$0xff] %v11922_v42  ;;  %508 = vst.msk [vmem:[#allocation2 + $0x188] sm:$0xff] %vm412_vm0, %v11919_v41  ;;  %9345 = vmatmul.mubr.msk.f32.gmra.mrb[8].mxu0 %vm412_vm0, %v11972_v55  ;;  %v12004_v63 = vld [vmem:[#allocation2 + $0x110] sm:$0xff]  ;;  %v12123_v33 = vld [vmem:[#allocation2 + $0x107] sm:$0xff] }
  0xce   : > { %509 = vst.msk [vmem:[#allocation2 + $0x190] sm:$0xff] %vm412_vm0, %v11922_v42  ;;  %14090 = vst [vmem:[#allocation39_spill] sm:$0xff] %v11931_v44  ;;  %9347 = vmatprep.mubr.msk.f32.mxu0 %vm412_vm0, %v11974_v56  ;;  %v12006_v1 = vld [vmem:[#allocation2 + $0x128] sm:$0xff] }
  0xcf   : > { %510 = vst.msk [vmem:[#allocation2 + $0x1a8] sm:$0xff] %vm412_vm0, %v11931_v44  ;;  %14091 = vst [vmem:[#allocation40_spill] sm:$0xff] %v11938_v45  ;;  %v12070_v44 = vld [vmem:[#allocation2 + $0x2f] sm:$0xff]  ;;  %v12072_v42 = vld [vmem:[#allocation2 + $0x47] sm:$0xff] }
  0xd0   : > { %14092 = vst [vmem:[#allocation41_spill] sm:$0xff] %v11941_v46  ;;  %14093 = vst [vmem:[#allocation42_spill] sm:$0xff] %v11944_v47  ;;  %v12012_v2 = vld [vmem:[#allocation2 + $0x130] sm:$0xff]  ;;  %v12014_v3 = vld [vmem:[#allocation2 + $0x148] sm:$0xff] }
  0xd1   : > { %511 = vst.msk [vmem:[#allocation2 + $0x1b0] sm:$0xff] %vm412_vm0, %v11938_v45  ;;  %512 = vst.msk [vmem:[#allocation2 + $0x1c8] sm:$0xff] %vm412_vm0, %v11941_v46  ;;  %9348 = vmatmul.mubr.msk.f32.gmra.mrb[10].mxu0 %vm412_vm0, %v11980_v57  ;;  %v12020_v4 = vld [vmem:[#allocation2 + $0x150] sm:$0xff]  ;;  %v1656_v46 = vld [vmem:[#allocation7 + $0x60] sm:$0xff] }
  0xd2   : > { %513 = vst.msk [vmem:[#allocation2 + $0x1d0] sm:$0xff] %vm412_vm0, %v11944_v47  ;;  %14094 = vst [vmem:[#allocation43_spill] sm:$0xff] %v11957_v49  ;;  %9350 = vmatprep.mubr.msk.f32.mxu0 %vm412_vm0, %v11982_v58  ;;  %v12022_v5 = vld [vmem:[#allocation2 + $0x168] sm:$0xff]  ;;  %v10368_v47 = vpack.c.bf16 %v1269_v0, %v1268_v53 }
  0xd3   : > { %14095 = vst [vmem:[#allocation44_spill] sm:$0xff] %v11960_v50  ;;  %514 = vst.msk [vmem:[#allocation2 + $0x1e8] sm:$0xff] %vm412_vm0, %v11957_v49  ;;  %v12028_v6 = vld [vmem:[#allocation2 + $0x170] sm:$0xff]  ;;  %v12065_v49 = vld [vmem:[#allocation2 + $0x27] sm:$0xff] }
  0xd4   : > { %515 = vst.msk [vmem:[#allocation2 + $0x1f0] sm:$0xff] %vm412_vm0, %v11960_v50  ;;  %v12030_v7 = vld [vmem:[#allocation2 + $0x188] sm:$0xff]  ;;  %14104 = vst [vmem:[#allocation53_spill] sm:$0xff] %v12174_v15 }
  0xd5   : > { %9351 = vmatmul.mubr.msk.f32.gmra.mrb[12].mxu0 %vm412_vm0, %v11988_v59  ;;  %14096 = vst [vmem:[#allocation45_spill] sm:$0xff] %v12030_v7  ;;  %v12036_v8 = vld [vmem:[#allocation2 + $0x190] sm:$0xff]  ;;  %v1657_v45 = vld [vmem:[#allocation7 + $0x68] sm:$0xff]  ;;  %516 = vst.msk [vmem:[#allocation2 + $0x208] sm:$0xff] %vm412_vm0, %v12174_v15 }
  0xd6   : > { %9353 = vmatprep.mubr.msk.f32.mxu0 %vm412_vm0, %v11990_v60  ;;  %14097 = vst [vmem:[#allocation46_spill] sm:$0xff] %v12036_v8  ;;  %v12038_v9 = vld [vmem:[#allocation2 + $0x1a8] sm:$0xff]  ;;  %v12074_v41 = vpack.c.bf16 %v1657_v45, %v1656_v46  ;;  %14105 = vst [vmem:[#allocation54_spill] sm:$0xff] %v12179_v14 }
  0xd7   : > { %14098 = vst [vmem:[#allocation47_spill] sm:$0xff] %v12038_v9  ;;  %v519_v50 = vld [vmem:[#allocation2 + $0xf] sm:$0xff]  ;;  %v12091_v46 = vld [vmem:[#allocation2 + $0x87] sm:$0xff]  ;;  %517 = vst.msk [vmem:[#allocation2 + $0x210] sm:$0xff] %vm412_vm0, %v12179_v14 }
  0xd8   : > { %v12044_v17 = vld [vmem:[#allocation2 + $0x1b0] sm:$0xff]  ;;  %v12046_v21 = vld [vmem:[#allocation2 + $0x1c8] sm:$0xff] }
  0xd9   : > { %9354 = vmatmul.mubr.msk.f32.gmra.mrb[14].mxu0 %vm412_vm0, %v11996_v61  ;;  %14099 = vst [vmem:[#allocation48_spill] sm:$0xff] %v12044_v17  ;;  %14100 = vst [vmem:[#allocation49_spill] sm:$0xff] %v12046_v21  ;;  %v12052_v28 = vld [vmem:[#allocation2 + $0x1d0] sm:$0xff]  ;;  %v12107_v53 = vld [vmem:[#allocation2 + $0xc7] sm:$0xff] }
  0xda   : > { %9356 = vmatprep.mubr.msk.f32.mxu0 %vm412_vm0, %v11998_v62  ;;  %14101 = vst [vmem:[#allocation50_spill] sm:$0xff] %v12052_v28  ;;  %v12054_v29 = vld [vmem:[#allocation2 + $0x1e8] sm:$0xff]  ;;  %v1234_v14 = vld [vmem:[#allocation2 + $0x11] sm:$0xff] }
  0xdb   : > { %14102 = vst [vmem:[#allocation51_spill] sm:$0xff] %v12054_v29  ;;  %v12060_v31 = vld [vmem:[#allocation2 + $0x1f0] sm:$0xff]  ;;  %v12131_v30 = vld [vmem:[#allocation2 + $0x127] sm:$0xff] }
  0xdc   : > { %14103 = vst [vmem:[#allocation52_spill] sm:$0xff] %v12060_v31  ;;  %v12080_v0 = vld [vmem:[#allocation2 + $0x4f] sm:$0xff]  ;;  %v12139_v26 = vld [vmem:[#allocation2 + $0x147] sm:$0xff] }
  0xdd   : > { %9357 = vmatmul.mubr.msk.f32.gmra.mrb[16].mxu0 %vm412_vm0, %v12004_v63  ;;  %v12089_v45 = vld [vmem:[#allocation2 + $0x6f] sm:$0xff]  ;;  %v12147_v24 = vld [vmem:[#allocation2 + $0x167] sm:$0xff] }
  0xde   : > { %9359 = vmatprep.mubr.msk.f32.mxu0 %vm412_vm0, %v12006_v1  ;;  %v12113_v37 = vld [vmem:[#allocation2 + $0xcf] sm:$0xff]  ;;  %v12155_v22 = vld [vmem:[#allocation2 + $0x187] sm:$0xff] }
  0xdf   : > { %v12121_v34 = vld [vmem:[#allocation2 + $0xef] sm:$0xff]  ;;  %v12163_v19 = vld [vmem:[#allocation2 + $0x1a7] sm:$0xff] }
  0xe0   : > { %v12129_v32 = vld [vmem:[#allocation2 + $0x10f] sm:$0xff]  ;;  %v12171_v16 = vld [vmem:[#allocation2 + $0x1c7] sm:$0xff] }
  0xe1   : > { %9360 = vmatmul.mubr.msk.f32.gmra.mrb[18].mxu0 %vm412_vm0, %v12012_v2  ;;  %v12137_v27 = vld [vmem:[#allocation2 + $0x12f] sm:$0xff]  ;;  %v12189_v12 = vld [vmem:[#allocation2 + $0x1e7] sm:$0xff] }
  0xe2   : > { %9362 = vmatprep.mubr.msk.f32.mxu0 %vm412_vm0, %v12014_v3  ;;  %v12145_v25 = vld [vmem:[#allocation2 + $0x14f] sm:$0xff] }
  0xe3   : > { %v12153_v23 = vld [vmem:[#allocation2 + $0x16f] sm:$0xff] }
  0xe4   : > { %v12161_v20 = vld [vmem:[#allocation2 + $0x18f] sm:$0xff] }
  0xe5   : > { %9363 = vmatmul.mubr.msk.f32.gmra.mrb[20].mxu0 %vm412_vm0, %v12020_v4  ;;  %v12169_v18 = vld [vmem:[#allocation2 + $0x1af] sm:$0xff] }
  0xe6   : > { %9365 = vmatprep.mubr.msk.f32.mxu0 %vm412_vm0, %v12022_v5  ;;  %v12187_v13 = vld [vmem:[#allocation2 + $0x1cf] sm:$0xff] }
  0xe7   : > { %v12195_v15 = vld [vmem:[#allocation2 + $0x1ef] sm:$0xff] }
  0xe9   : > { %9366 = vmatmul.mubr.msk.f32.gmra.mrb[22].mxu0 %vm412_vm0, %v12028_v6 }
  0xea   : > { %9368 = vmatprep.mubr.msk.f32.mxu0 %vm412_vm0, %v12030_v7 }
  0xed   : > { %9369 = vmatmul.mubr.msk.f32.gmra.mrb[24].mxu0 %vm412_vm0, %v12036_v8  ;;  %v12208_v8 = vld [vmem:[#allocation2 + $0x49] sm:$0xff] }
  0xee   : > { %9371 = vmatprep.mubr.msk.f32.mxu0 %vm412_vm0, %v12038_v9  ;;  %v12206_v9 = vld [vmem:[#allocation2 + $0x31] sm:$0xff] }
  0xf1   : > { %9372 = vmatmul.mubr.msk.f32.gmra.mrb[26].mxu0 %vm412_vm0, %v12044_v17  ;;  %v2047_v17 = vld [vmem:[#allocation7 + $0x88] sm:$0xff] }
  0xf2   : > { %9374 = vmatprep.mubr.msk.f32.mxu0 %vm412_vm0, %v12046_v21  ;;  %v2046_v21 = vld [vmem:[#allocation7 + $0x80] sm:$0xff] }
  0xf3   : > { %v12210_v7 = vpack.c.bf16 %v2047_v17, %v2046_v21  ;;  %v12233_v17 = vld [vmem:[#allocation2 + $0x91] sm:$0xff]  ;;  %v12235_v21 = vld [vmem:[#allocation2 + $0xa9] sm:$0xff] }
  0xf4   : > { %14110 = vst [vmem:[#allocation59_spill] sm:$0xff] %v12233_v17  ;;  %14111 = vst [vmem:[#allocation60_spill] sm:$0xff] %v12235_v21 }
  0xf5   : > { %9375 = vmatmul.mubr.msk.f32.gmra.mrb[28].mxu0 %vm412_vm0, %v12052_v28 }
  0xf6   : > { %9377 = vmatprep.mubr.msk.f32.mxu0 %vm412_vm0, %v12054_v29  ;;  %v12200_v29 = vld [vmem:[#allocation2 + $0x29] sm:$0xff] }
  0xf9   : > { %9378 = vmatmul.mubr.msk.f32.gmra.mrb[30].mxu0 %vm412_vm0, %v12060_v31  ;;  %v1659_v31 = vld [vmem:[#allocation7 + $0x78] sm:$0xff] }
  0xfa   : > { %9388 = vmatprep.mubr.msk.f32.mxu0 %vm412_vm0, %v518_v52  ;;  %v12105_v52 = vld [vmem:[#allocation2 + $0xaf] sm:$0xff]  ;;  %v10376_v28 = vpack.c.bf16 %v1659_v31, %v1658_v10 }
  0xfb   : > { %v12216_v10 = vld [vmem:[#allocation2 + $0x51] sm:$0xff]  ;;  %v12243_v31 = vld [vmem:[#allocation2 + $0xc9] sm:$0xff] }
  0xfc   : > { %14106 = vst [vmem:[#allocation55_spill] sm:$0xff] %v12216_v10  ;;  %14113 = vst [vmem:[#allocation62_spill] sm:$0xff] %v12243_v31 }
  0xfd   : > { %9389 = vmatmul.mubr.msk.f32.vlgmr.msra.gmra.mrb[0].mxu0 %vm412_vm0, %v519_v50  ;;  %v12082_v50 = vld [vmem:[#allocation2 + $0x67] sm:$0xff] }
  0xfe   : > { %10367 = vmatpush3.bf16.msra.mxu0 %v10364_v54  ;;  %9391 = vmatprep.mubr.msk.f32.mxu0 %vm412_vm0, %v12065_v49  ;;  %v12099_v54 = vld [vmem:[#allocation2 + $0xa7] sm:$0xff] }
  0xff   : > { %10369 = vmatprep.subr.bf16.mxu0 %v10368_v47 }
 0x101   : > { %9392 = vmatmul.mubr.msk.f32.gmra.mrb[2].mxu0 %vm412_vm0, %v12070_v44 }
 0x102   : > { %9394 = vmatprep.mubr.msk.f32.mxu0 %vm412_vm0, %v12072_v42  ;;  %10371 = vmatpush3.bf16.msra.mxu0 %v10368_v47  ;;  %v12097_v47 = vld [vmem:[#allocation2 + $0x8f] sm:$0xff] }
 0x103   : > { %10373 = vmatprep.subr.bf16.mxu0 %v12074_v41 }
 0x105   : > { %9395 = vmatmul.mubr.msk.f32.gmra.mrb[4].mxu0 %vm412_vm0, %v12080_v0 }
 0x106   : > { %9397 = vmatprep.mubr.msk.f32.mxu0 %vm412_vm0, %v12082_v50 }
 0x109   : > { %9398 = vmatmul.mubr.msk.f32.gmra.mrb[6].mxu0 %vm412_vm0, %v12089_v45 }
 0x10a   : > { %9400 = vmatprep.mubr.msk.f32.mxu0 %vm412_vm0, %v12091_v46 }
 0x10d   : > { %9401 = vmatmul.mubr.msk.f32.gmra.mrb[8].mxu0 %vm412_vm0, %v12097_v47 }
 0x10e   : > { %9403 = vmatprep.mubr.msk.f32.mxu0 %vm412_vm0, %v12099_v54 }
 0x111   : > { %9404 = vmatmul.mubr.msk.f32.gmra.mrb[10].mxu0 %vm412_vm0, %v12105_v52 }
 0x112   : > { %9406 = vmatprep.mubr.msk.f32.mxu0 %vm412_vm0, %v12107_v53 }
 0x115   : > { %9407 = vmatmul.mubr.msk.f32.gmra.mrb[12].mxu0 %vm412_vm0, %v12113_v37 }
 0x116   : > { %9409 = vmatprep.mubr.msk.f32.mxu0 %vm412_vm0, %v12115_v36 }
 0x119   : > { %9410 = vmatmul.mubr.msk.f32.gmra.mrb[14].mxu0 %vm412_vm0, %v12121_v34 }
 0x11a   : > { %9412 = vmatprep.mubr.msk.f32.mxu0 %vm412_vm0, %v12123_v33 }
 0x11d   : > { %9413 = vmatmul.mubr.msk.f32.gmra.mrb[16].mxu0 %vm412_vm0, %v12129_v32 }
 0x11e   : > { %9415 = vmatprep.mubr.msk.f32.mxu0 %vm412_vm0, %v12131_v30 }
 0x121   : > { %9416 = vmatmul.mubr.msk.f32.gmra.mrb[18].mxu0 %vm412_vm0, %v12137_v27 }
 0x122   : > { %9418 = vmatprep.mubr.msk.f32.mxu0 %vm412_vm0, %v12139_v26 }
 0x125   : > { %9419 = vmatmul.mubr.msk.f32.gmra.mrb[20].mxu0 %vm412_vm0, %v12145_v25 }
 0x126   : > { %9421 = vmatprep.mubr.msk.f32.mxu0 %vm412_vm0, %v12147_v24 }
 0x129   : > { %9422 = vmatmul.mubr.msk.f32.gmra.mrb[22].mxu0 %vm412_vm0, %v12153_v23 }
 0x12a   : > { %9424 = vmatprep.mubr.msk.f32.mxu0 %vm412_vm0, %v12155_v22 }
 0x12d   : > { %9425 = vmatmul.mubr.msk.f32.gmra.mrb[24].mxu0 %vm412_vm0, %v12161_v20 }
 0x12e   : > { %9427 = vmatprep.mubr.msk.f32.mxu0 %vm412_vm0, %v12163_v19 }
 0x131   : > { %9428 = vmatmul.mubr.msk.f32.gmra.mrb[26].mxu0 %vm412_vm0, %v12169_v18 }
 0x132   : > { %9430 = vmatprep.mubr.msk.f32.mxu0 %vm412_vm0, %v12171_v16 }
 0x135   : > { %9431 = vmatmul.mubr.msk.f32.gmra.mrb[28].mxu0 %vm412_vm0, %v12187_v13 }
 0x136   : > { %9433 = vmatprep.mubr.msk.f32.mxu0 %vm412_vm0, %v12189_v12 }
 0x139   : > { %9434 = vmatmul.mubr.msk.f32.gmra.mrb[30].mxu0 %vm412_vm0, %v12195_v15 }
 0x13a   : > { %9444 = vmatprep.mubr.msk.f32.mxu0 %vm412_vm0, %v1233_v11  ;;  %v12218_v11 = vld [vmem:[#allocation2 + $0x69] sm:$0xff] }
 0x13b   : > { %14107 = vst [vmem:[#allocation56_spill] sm:$0xff] %v12218_v11 }
 0x13d   : > { %9445 = vmatmul.mubr.msk.f32.vlgmr.msra.gmra.mrb[0].mxu0 %vm412_vm0, %v1234_v14  ;;  %v12225_v14 = vld [vmem:[#allocation2 + $0x71] sm:$0xff] }
 0x13e   : > { %10375 = vmatpush3.bf16.msra.mxu0 %v12074_v41  ;;  %9447 = vmatprep.mubr.msk.f32.mxu0 %vm412_vm0, %v12200_v29  ;;  %14108 = vst [vmem:[#allocation57_spill] sm:$0xff] %v12225_v14  ;;  %v12227_v41 = vld [vmem:[#allocation2 + $0x89] sm:$0xff] }
 0x13f   : > { %10377 = vmatprep.subr.bf16.mxu0 %v10376_v28  ;;  %14109 = vst [vmem:[#allocation58_spill] sm:$0xff] %v12227_v41 }
 0x141   : > { %9448 = vmatmul.mubr.msk.f32.gmra.mrb[2].mxu0 %vm412_vm0, %v12206_v9 }
 0x142   : > { %9450 = vmatprep.mubr.msk.f32.mxu0 %vm412_vm0, %v12208_v8  ;;  %10379 = vmatpush3.bf16.msra.mxu0 %v10376_v28  ;;  %v12241_v28 = vld [vmem:[#allocation2 + $0xb1] sm:$0xff] }
 0x143   : > { %10381 = vmatprep.subr.bf16.mxu0 %v12210_v7  ;;  %14112 = vst [vmem:[#allocation61_spill] sm:$0xff] %v12241_v28 }
 0x145   : > { %9451 = vmatmul.mubr.msk.f32.gmra.mrb[4].mxu0 %vm412_vm0, %v12216_v10  ;;  %v2437_v10 = vld [vmem:[#allocation7 + $0xa8] sm:$0xff] }
 0x146   : > { %9453 = vmatprep.mubr.msk.f32.mxu0 %vm412_vm0, %v12218_v11  ;;  %v2049_v11 = vld [vmem:[#allocation7 + $0x98] sm:$0xff] }
 0x149   : > { %9454 = vmatmul.mubr.msk.f32.gmra.mrb[6].mxu0 %vm412_vm0, %v12225_v14  ;;  %v12251_v14 = vld [vmem:[#allocation2 + $0xe9] sm:$0xff] }
 0x14a   : > { %9456 = vmatprep.mubr.msk.f32.mxu0 %vm412_vm0, %v12227_v41  ;;  %v12249_v41 = vld [vmem:[#allocation2 + $0xd1] sm:$0xff]  ;;  %14115 = vst [vmem:[#allocation64_spill] sm:$0xff] %v12251_v14 }
 0x14b   : > { %14114 = vst [vmem:[#allocation63_spill] sm:$0xff] %v12249_v41 }
 0x14d   : > { %9457 = vmatmul.mubr.msk.f32.gmra.mrb[8].mxu0 %vm412_vm0, %v12233_v17  ;;  %v12259_v17 = vld [vmem:[#allocation2 + $0x109] sm:$0xff] }
 0x14e   : > { %9459 = vmatprep.mubr.msk.f32.mxu0 %vm412_vm0, %v12235_v21  ;;  %v12257_v21 = vld [vmem:[#allocation2 + $0xf1] sm:$0xff]  ;;  %14117 = vst [vmem:[#allocation66_spill] sm:$0xff] %v12259_v17 }
 0x14f   : > { %14116 = vst [vmem:[#allocation65_spill] sm:$0xff] %v12257_v21 }
 0x151   : > { %9460 = vmatmul.mubr.msk.f32.gmra.mrb[10].mxu0 %vm412_vm0, %v12241_v28  ;;  %v12267_v28 = vld [vmem:[#allocation2 + $0x129] sm:$0xff] }
 0x152   : > { %9462 = vmatprep.mubr.msk.f32.mxu0 %vm412_vm0, %v12243_v31  ;;  %v12265_v31 = vld [vmem:[#allocation2 + $0x111] sm:$0xff]  ;;  %14119 = vst [vmem:[#allocation68_spill] sm:$0xff] %v12267_v28 }
 0x153   : > { %14118 = vst [vmem:[#allocation67_spill] sm:$0xff] %v12265_v31 }
 0x155   : > { %9463 = vmatmul.mubr.msk.f32.gmra.mrb[12].mxu0 %vm412_vm0, %v12249_v41  ;;  %v12275_v41 = vld [vmem:[#allocation2 + $0x149] sm:$0xff] }
 0x156   : > { %9465 = vmatprep.mubr.msk.f32.mxu0 %vm412_vm0, %v12251_v14  ;;  %v12273_v14 = vld [vmem:[#allocation2 + $0x131] sm:$0xff]  ;;  %14121 = vst [vmem:[#allocation70_spill] sm:$0xff] %v12275_v41 }
 0x157   : > { %14120 = vst [vmem:[#allocation69_spill] sm:$0xff] %v12273_v14 }
 0x159   : > { %9466 = vmatmul.mubr.msk.f32.gmra.mrb[14].mxu0 %vm412_vm0, %v12257_v21  ;;  %v12283_v21 = vld [vmem:[#allocation2 + $0x169] sm:$0xff] }
 0x15a   : > { %9468 = vmatprep.mubr.msk.f32.mxu0 %vm412_vm0, %v12259_v17  ;;  %v12281_v17 = vld [vmem:[#allocation2 + $0x151] sm:$0xff]  ;;  %14123 = vst [vmem:[#allocation72_spill] sm:$0xff] %v12283_v21 }
 0x15b   : > { %14122 = vst [vmem:[#allocation71_spill] sm:$0xff] %v12281_v17 }
 0x15d   : > { %9469 = vmatmul.mubr.msk.f32.gmra.mrb[16].mxu0 %vm412_vm0, %v12265_v31  ;;  %v12291_v31 = vld [vmem:[#allocation2 + $0x189] sm:$0xff] }
 0x15e   : > { %9471 = vmatprep.mubr.msk.f32.mxu0 %vm412_vm0, %v12267_v28  ;;  %v12289_v28 = vld [vmem:[#allocation2 + $0x171] sm:$0xff]  ;;  %14125 = vst [vmem:[#allocation74_spill] sm:$0xff] %v12291_v31 }
 0x15f   : > { %14124 = vst [vmem:[#allocation73_spill] sm:$0xff] %v12289_v28 }
 0x161   : > { %9472 = vmatmul.mubr.msk.f32.gmra.mrb[18].mxu0 %vm412_vm0, %v12273_v14  ;;  %v12299_v14 = vld [vmem:[#allocation2 + $0x1a9] sm:$0xff] }
 0x162   : > { %9474 = vmatprep.mubr.msk.f32.mxu0 %vm412_vm0, %v12275_v41  ;;  %v12297_v41 = vld [vmem:[#allocation2 + $0x191] sm:$0xff]  ;;  %14127 = vst [vmem:[#allocation76_spill] sm:$0xff] %v12299_v14 }
 0x163   : > { %14126 = vst [vmem:[#allocation75_spill] sm:$0xff] %v12297_v41 }
 0x165   : > { %9475 = vmatmul.mubr.msk.f32.gmra.mrb[20].mxu0 %vm412_vm0, %v12281_v17  ;;  %v12307_v17 = vld [vmem:[#allocation2 + $0x1c9] sm:$0xff] }
 0x166   : > { %9477 = vmatprep.mubr.msk.f32.mxu0 %vm412_vm0, %v12283_v21  ;;  %v12305_v21 = vld [vmem:[#allocation2 + $0x1b1] sm:$0xff]  ;;  %14129 = vst [vmem:[#allocation78_spill] sm:$0xff] %v12307_v17 }
 0x167   : > { %14128 = vst [vmem:[#allocation77_spill] sm:$0xff] %v12305_v21 }
 0x169   : > { %9478 = vmatmul.mubr.msk.f32.gmra.mrb[22].mxu0 %vm412_vm0, %v12289_v28  ;;  %v12315_v28 = vld [vmem:[#allocation2 + $0x1e9] sm:$0xff] }
 0x16a   : > { %9480 = vmatprep.mubr.msk.f32.mxu0 %vm412_vm0, %v12291_v31  ;;  %v12313_v31 = vld [vmem:[#allocation2 + $0x1d1] sm:$0xff]  ;;  %14131 = vst [vmem:[#allocation80_spill] sm:$0xff] %v12315_v28 }
 0x16b   : > { %14130 = vst [vmem:[#allocation79_spill] sm:$0xff] %v12313_v31 }
 0x16d   : > { %9481 = vmatmul.mubr.msk.f32.gmra.mrb[24].mxu0 %vm412_vm0, %v12297_v41  ;;  %v2048_v41 = vld [vmem:[#allocation7 + $0x90] sm:$0xff] }
 0x16e   : > { %9483 = vmatprep.mubr.msk.f32.mxu0 %vm412_vm0, %v12299_v14  ;;  %v12321_v14 = vld [vmem:[#allocation2 + $0x1f1] sm:$0xff] }
 0x171   : > { %9484 = vmatmul.mubr.msk.f32.gmra.mrb[26].mxu0 %vm412_vm0, %v12305_v21  ;;  %v2436_v21 = vld [vmem:[#allocation7 + $0xa0] sm:$0xff] }
 0x172   : > { %9486 = vmatprep.mubr.msk.f32.mxu0 %vm412_vm0, %v12307_v17  ;;  %v10384_v17 = vpack.c.bf16 %v2049_v11, %v2048_v41  ;;  %v2827_v41 = vld [vmem:[#allocation7 + $0xc0] sm:$0xff] }
 0x175   : > { %9487 = vmatmul.mubr.msk.f32.gmra.mrb[28].mxu0 %vm412_vm0, %v12313_v31 }
 0x176   : > { %9489 = vmatprep.mubr.msk.f32.mxu0 %vm412_vm0, %v12315_v28  ;;  %v10388_v28 = vpack.c.bf16 %v2437_v10, %v2436_v21  ;;  %v2439_v10 = vld [vmem:[#allocation7 + $0xb8] sm:$0xff] }
 0x179   : > { %9490 = vmatmul.mubr.msk.f32.gmra.mrb[30].mxu0 %vm412_vm0, %v12321_v14 }
 0x17a   : > { %9500 = vmatprep.mubr.msk.f32.mxu0 %vm412_vm0, %v12065_v49  ;;  %v12390_v49 = vld [vmem:[#allocation2 + $0x20f] sm:$0xff] }
 0x17d   : > { %9501 = vmatmul.mubr.msk.f32.vlgmr.msra.gmra.mrb[0].mxu0 %vm412_vm0, %v12070_v44  ;;  %v12384_v44 = vld [vmem:[#allocation2 + $0x207] sm:$0xff] }
 0x17e   : > { %10383 = vmatpush3.bf16.msra.mxu0 %v12210_v7  ;;  %9503 = vmatprep.mubr.msk.f32.mxu0 %vm412_vm0, %v12072_v42  ;;  %v2438_v7 = vld [vmem:[#allocation7 + $0xb0] sm:$0xff] }
 0x17f   : > { %10385 = vmatprep.subr.bf16.mxu0 %v10384_v17  ;;  %v10392_v11 = vpack.c.bf16 %v2439_v10, %v2438_v7  ;;  %v14149_v7 = vld [vmem:[#allocation64_spill] sm:$0xff]  ;;  %v14150_v10 = vld [vmem:[#allocation65_spill] sm:$0xff] }
 0x181   : > { %9504 = vmatmul.mubr.msk.f32.gmra.mrb[2].mxu0 %vm412_vm0, %v12080_v0 }
 0x182   : > { %9506 = vmatprep.mubr.msk.f32.mxu0 %vm412_vm0, %v12082_v50  ;;  %10387 = vmatpush3.bf16.msra.mxu0 %v10384_v17  ;;  %v2828_v17 = vld [vmem:[#allocation7 + $0xc8] sm:$0xff] }
 0x183   : > { %10389 = vmatprep.subr.bf16.mxu0 %v10388_v28  ;;  %v10396_v21 = vpack.c.bf16 %v2828_v17, %v2827_v41  ;;  %v14152_v41 = vld [vmem:[#allocation67_spill] sm:$0xff]  ;;  %v14153_v17 = vld [vmem:[#allocation68_spill] sm:$0xff] }
 0x185   : > { %9507 = vmatmul.mubr.msk.f32.gmra.mrb[4].mxu0 %vm412_vm0, %v12089_v45 }
 0x186   : > { %9509 = vmatprep.mubr.msk.f32.mxu0 %vm412_vm0, %v12091_v46 }
 0x189   : > { %9510 = vmatmul.mubr.msk.f32.gmra.mrb[6].mxu0 %vm412_vm0, %v12097_v47 }
 0x18a   : > { %9512 = vmatprep.mubr.msk.f32.mxu0 %vm412_vm0, %v12099_v54 }
 0x18d   : > { %9513 = vmatmul.mubr.msk.f32.gmra.mrb[8].mxu0 %vm412_vm0, %v12105_v52 }
 0x18e   : > { %9515 = vmatprep.mubr.msk.f32.mxu0 %vm412_vm0, %v12107_v53 }
 0x191   : > { %9516 = vmatmul.mubr.msk.f32.gmra.mrb[10].mxu0 %vm412_vm0, %v12113_v37 }
 0x192   : > { %9518 = vmatprep.mubr.msk.f32.mxu0 %vm412_vm0, %v12115_v36 }
 0x195   : > { %9519 = vmatmul.mubr.msk.f32.gmra.mrb[12].mxu0 %vm412_vm0, %v12121_v34 }
 0x196   : > { %9521 = vmatprep.mubr.msk.f32.mxu0 %vm412_vm0, %v12123_v33 }
 0x199   : > { %9522 = vmatmul.mubr.msk.f32.gmra.mrb[14].mxu0 %vm412_vm0, %v12129_v32 }
 0x19a   : > { %9524 = vmatprep.mubr.msk.f32.mxu0 %vm412_vm0, %v12131_v30 }
 0x19d   : > { %9525 = vmatmul.mubr.msk.f32.gmra.mrb[16].mxu0 %vm412_vm0, %v12137_v27 }
 0x19e   : > { %9527 = vmatprep.mubr.msk.f32.mxu0 %vm412_vm0, %v12139_v26 }
 0x1a1   : > { %9528 = vmatmul.mubr.msk.f32.gmra.mrb[18].mxu0 %vm412_vm0, %v12145_v25 }
 0x1a2   : > { %9530 = vmatprep.mubr.msk.f32.mxu0 %vm412_vm0, %v12147_v24 }
 0x1a5   : > { %9531 = vmatmul.mubr.msk.f32.gmra.mrb[20].mxu0 %vm412_vm0, %v12153_v23 }
 0x1a6   : > { %9533 = vmatprep.mubr.msk.f32.mxu0 %vm412_vm0, %v12155_v22 }
 0x1a9   : > { %9534 = vmatmul.mubr.msk.f32.gmra.mrb[22].mxu0 %vm412_vm0, %v12161_v20 }
 0x1aa   : > { %9536 = vmatprep.mubr.msk.f32.mxu0 %vm412_vm0, %v12163_v19 }
 0x1ad   : > { %9537 = vmatmul.mubr.msk.f32.gmra.mrb[24].mxu0 %vm412_vm0, %v12169_v18 }
 0x1ae   : > { %9539 = vmatprep.mubr.msk.f32.mxu0 %vm412_vm0, %v12171_v16 }
 0x1b1   : > { %9540 = vmatmul.mubr.msk.f32.gmra.mrb[26].mxu0 %vm412_vm0, %v12187_v13 }
 0x1b2   : > { %9542 = vmatprep.mubr.msk.f32.mxu0 %vm412_vm0, %v12189_v12 }
 0x1b5   : > { %9543 = vmatmul.mubr.msk.f32.gmra.mrb[28].mxu0 %vm412_vm0, %v12195_v15 }
 0x1b6   : > { %9545 = vmatprep.mubr.msk.f32.mxu0 %vm412_vm0, %v12384_v44 }
 0x1b9   : > { %9546 = vmatmul.mubr.msk.f32.gmra.mrb[30].mxu0 %vm412_vm0, %v12390_v49 }
 0x1ba   : > { %9556 = vmatprep.mubr.msk.f32.mxu0 %vm412_vm0, %v11887_v35  ;;  %v14132_v35 = vld [vmem:[#allocation45_spill] sm:$0xff] }
 0x1bd   : > { %9557 = vmatmul.mubr.msk.f32.vlgmr.msra.gmra.mrb[0].mxu0 %vm412_vm0, %v11908_v38  ;;  %v14133_v38 = vld [vmem:[#allocation46_spill] sm:$0xff] }
 0x1be   : > { %10391 = vmatpush3.bf16.msra.mxu0 %v10388_v28  ;;  %9559 = vmatprep.mubr.msk.f32.mxu0 %vm412_vm0, %v11910_v39  ;;  %v14134_v39 = vld [vmem:[#allocation47_spill] sm:$0xff] }
 0x1bf   : > { %10393 = vmatprep.subr.bf16.mxu0 %v10392_v11  ;;  %v14148_v28 = vld [vmem:[#allocation63_spill] sm:$0xff] }
 0x1c1   : > { %9560 = vmatmul.mubr.msk.f32.gmra.mrb[2].mxu0 %vm412_vm0, %v11916_v40  ;;  %v14135_v40 = vld [vmem:[#allocation48_spill] sm:$0xff] }
 0x1c2   : > { %9562 = vmatprep.mubr.msk.f32.mxu0 %vm412_vm0, %v11924_v43  ;;  %10395 = vmatpush3.bf16.msra.mxu0 %v10392_v11  ;;  %v14136_v43 = vld [vmem:[#allocation49_spill] sm:$0xff]  ;;  %v14151_v11 = vld [vmem:[#allocation66_spill] sm:$0xff] }
 0x1c3   : > { %10397 = vmatprep.subr.bf16.mxu0 %v10396_v21 }
 0x1c5   : > { %9563 = vmatmul.mubr.msk.f32.gmra.mrb[4].mxu0 %vm412_vm0, %v11948_v48  ;;  %v14137_v48 = vld [vmem:[#allocation50_spill] sm:$0xff] }
 0x1c6   : > { %9565 = vmatprep.mubr.msk.f32.mxu0 %vm412_vm0, %v11962_v51  ;;  %v14138_v51 = vld [vmem:[#allocation51_spill] sm:$0xff] }
 0x1c9   : > { %9566 = vmatmul.mubr.msk.f32.gmra.mrb[6].mxu0 %vm412_vm0, %v11972_v55  ;;  %v12452_v55 = vld [vmem:[#allocation2 + $0x208] sm:$0xff] }
 0x1ca   : > { %9568 = vmatprep.mubr.msk.f32.mxu0 %vm412_vm0, %v11974_v56  ;;  %v14139_v56 = vld [vmem:[#allocation52_spill] sm:$0xff] }
 0x1cd   : > { %9569 = vmatmul.mubr.msk.f32.gmra.mrb[8].mxu0 %vm412_vm0, %v11980_v57  ;;  %v12458_v57 = vld [vmem:[#allocation2 + $0x210] sm:$0xff] }
 0x1ce   : > { %9571 = vmatprep.mubr.msk.f32.mxu0 %vm412_vm0, %v11982_v58  ;;  %v2829_v58 = vld [vmem:[#allocation7 + $0xd0] sm:$0xff] }
 0x1d1   : > { %9572 = vmatmul.mubr.msk.f32.gmra.mrb[10].mxu0 %vm412_vm0, %v11988_v59  ;;  %v2830_v59 = vld [vmem:[#allocation7 + $0xd8] sm:$0xff] }
 0x1d2   : > { %9574 = vmatprep.mubr.msk.f32.mxu0 %vm412_vm0, %v11990_v60  ;;  %v10400_v60 = vpack.c.bf16 %v2830_v59, %v2829_v58  ;;  %v14163_v58 = vld [vmem:[#allocation78_spill] sm:$0xff]  ;;  %v14164_v59 = vld [vmem:[#allocation80_spill] sm:$0xff] }
 0x1d5   : > { %9575 = vmatmul.mubr.msk.f32.gmra.mrb[12].mxu0 %vm412_vm0, %v11996_v61  ;;  %v3217_v61 = vld [vmem:[#allocation7 + $0xe0] sm:$0xff] }
 0x1d6   : > { %9577 = vmatprep.mubr.msk.f32.mxu0 %vm412_vm0, %v11998_v62  ;;  %v3218_v62 = vld [vmem:[#allocation7 + $0xe8] sm:$0xff] }
 0x1d9   : > { %9578 = vmatmul.mubr.msk.f32.gmra.mrb[14].mxu0 %vm412_vm0, %v12004_v63  ;;  %v10404_v63 = vpack.c.bf16 %v3218_v62, %v3217_v61  ;;  %v12526_v61 = vld [vmem:[#allocation2 + $0x211] sm:$0xff] }
 0x1da   : > { %9580 = vmatprep.mubr.msk.f32.mxu0 %vm412_vm0, %v12006_v1  ;;  %v14140_v1 = vld [vmem:[#allocation55_spill] sm:$0xff]  ;;  %v3219_v62 = vld [vmem:[#allocation7 + $0xf0] sm:$0xff] }
 0x1dd   : > { %9581 = vmatmul.mubr.msk.f32.gmra.mrb[16].mxu0 %vm412_vm0, %v12012_v2  ;;  %v14141_v2 = vld [vmem:[#allocation56_spill] sm:$0xff] }
 0x1de   : > { %9583 = vmatprep.mubr.msk.f32.mxu0 %vm412_vm0, %v12014_v3  ;;  %v14142_v3 = vld [vmem:[#allocation57_spill] sm:$0xff] }
 0x1e1   : > { %9584 = vmatmul.mubr.msk.f32.gmra.mrb[18].mxu0 %vm412_vm0, %v12020_v4  ;;  %v14143_v4 = vld [vmem:[#allocation58_spill] sm:$0xff] }
 0x1e2   : > { %9586 = vmatprep.mubr.msk.f32.mxu0 %vm412_vm0, %v12022_v5  ;;  %v14144_v5 = vld [vmem:[#allocation59_spill] sm:$0xff] }
 0x1e5   : > { %9587 = vmatmul.mubr.msk.f32.gmra.mrb[20].mxu0 %vm412_vm0, %v12028_v6  ;;  %v14145_v6 = vld [vmem:[#allocation60_spill] sm:$0xff] }
 0x1e6   : > { %9589 = vmatprep.mubr.msk.f32.mxu0 %vm412_vm0, %v14132_v35  ;;  %v14155_v35 = vld [vmem:[#allocation70_spill] sm:$0xff] }
 0x1e9   : > { %9590 = vmatmul.mubr.msk.f32.gmra.mrb[22].mxu0 %vm412_vm0, %v14133_v38  ;;  %v14156_v38 = vld [vmem:[#allocation71_spill] sm:$0xff] }
 0x1ea   : > { %9592 = vmatprep.mubr.msk.f32.mxu0 %vm412_vm0, %v14134_v39  ;;  %v14157_v39 = vld [vmem:[#allocation72_spill] sm:$0xff] }
 0x1ed   : > { %9593 = vmatmul.mubr.msk.f32.gmra.mrb[24].mxu0 %vm412_vm0, %v14135_v40  ;;  %v14158_v40 = vld [vmem:[#allocation73_spill] sm:$0xff] }
 0x1ee   : > { %9595 = vmatprep.mubr.msk.f32.mxu0 %vm412_vm0, %v14136_v43  ;;  %v14159_v43 = vld [vmem:[#allocation74_spill] sm:$0xff] }
 0x1f1   : > { %9596 = vmatmul.mubr.msk.f32.gmra.mrb[26].mxu0 %vm412_vm0, %v14137_v48  ;;  %v14160_v48 = vld [vmem:[#allocation75_spill] sm:$0xff] }
 0x1f2   : > { %9598 = vmatprep.mubr.msk.f32.mxu0 %vm412_vm0, %v14138_v51  ;;  %v14161_v51 = vld [vmem:[#allocation76_spill] sm:$0xff] }
 0x1f5   : > { %9599 = vmatmul.mubr.msk.f32.gmra.mrb[28].mxu0 %vm412_vm0, %v14139_v56  ;;  %v14162_v56 = vld [vmem:[#allocation77_spill] sm:$0xff] }
 0x1f6   : > { %9601 = vmatprep.mubr.msk.f32.mxu0 %vm412_vm0, %v12452_v55 }
 0x1f9   : > { %9602 = vmatmul.mubr.msk.f32.gmra.mrb[30].mxu0 %vm412_vm0, %v12458_v57 }
 0x1fa   : > { %9612 = vmatprep.mubr.msk.f32.mxu0 %vm412_vm0, %v12200_v29  ;;  %v14147_v29 = vld [vmem:[#allocation62_spill] sm:$0xff] }
 0x1fd   : > { %9613 = vmatmul.mubr.msk.f32.vlgmr.msra.gmra.mrb[0].mxu0 %vm412_vm0, %v12206_v9  ;;  %v14146_v9 = vld [vmem:[#allocation61_spill] sm:$0xff] }
 0x1fe   : > { %10399 = vmatpush3.bf16.msra.mxu0 %v10396_v21  ;;  %9615 = vmatprep.mubr.msk.f32.mxu0 %vm412_vm0, %v12208_v8  ;;  %v14154_v21 = vld [vmem:[#allocation69_spill] sm:$0xff] }
 0x1ff   : > { %10401 = vmatprep.subr.bf16.mxu0 %v10400_v60 }
 0x201   : > { %9616 = vmatmul.mubr.msk.f32.gmra.mrb[2].mxu0 %vm412_vm0, %v14140_v1 }
 0x202   : > { %9618 = vmatprep.mubr.msk.f32.mxu0 %vm412_vm0, %v14141_v2  ;;  %10403 = vmatpush3.bf16.msra.mxu0 %v10400_v60  ;;  %v12520_v60 = vld [vmem:[#allocation2 + $0x209] sm:$0xff] }
 0x203   : > { %10405 = vmatprep.subr.bf16.mxu0 %v10404_v63  ;;  %14165 = vst [vmem:[#allocation45_spill] sm:$0xff] %v12520_v60 }
 0x205   : > { %9619 = vmatmul.mubr.msk.f32.gmra.mrb[4].mxu0 %vm412_vm0, %v14142_v3 }
 0x206   : > { %9621 = vmatprep.mubr.msk.f32.mxu0 %vm412_vm0, %v14143_v4 }
 0x209   : > { %9622 = vmatmul.mubr.msk.f32.gmra.mrb[6].mxu0 %vm412_vm0, %v14144_v5 }
 0x20a   : > { %9624 = vmatprep.mubr.msk.f32.mxu0 %vm412_vm0, %v14145_v6 }
 0x20d   : > { %9625 = vmatmul.mubr.msk.f32.gmra.mrb[8].mxu0 %vm412_vm0, %v14146_v9 }
 0x20e   : > { %9627 = vmatprep.mubr.msk.f32.mxu0 %vm412_vm0, %v14147_v29 }
 0x211   : > { %9628 = vmatmul.mubr.msk.f32.gmra.mrb[10].mxu0 %vm412_vm0, %v14148_v28 }
 0x212   : > { %9630 = vmatprep.mubr.msk.f32.mxu0 %vm412_vm0, %v14149_v7 }
 0x215   : > { %9631 = vmatmul.mubr.msk.f32.gmra.mrb[12].mxu0 %vm412_vm0, %v14150_v10 }
 0x216   : > { %9633 = vmatprep.mubr.msk.f32.mxu0 %vm412_vm0, %v14151_v11 }
 0x219   : > { %9634 = vmatmul.mubr.msk.f32.gmra.mrb[14].mxu0 %vm412_vm0, %v14152_v41 }
 0x21a   : > { %9636 = vmatprep.mubr.msk.f32.mxu0 %vm412_vm0, %v14153_v17 }
 0x21d   : > { %9637 = vmatmul.mubr.msk.f32.gmra.mrb[16].mxu0 %vm412_vm0, %v14154_v21 }
 0x21e   : > { %9639 = vmatprep.mubr.msk.f32.mxu0 %vm412_vm0, %v14155_v35 }
 0x221   : > { %9640 = vmatmul.mubr.msk.f32.gmra.mrb[18].mxu0 %vm412_vm0, %v14156_v38 }
 0x222   : > { %9642 = vmatprep.mubr.msk.f32.mxu0 %vm412_vm0, %v14157_v39 }
 0x225   : > { %9643 = vmatmul.mubr.msk.f32.gmra.mrb[20].mxu0 %vm412_vm0, %v14158_v40 }
 0x226   : > { %9645 = vmatprep.mubr.msk.f32.mxu0 %vm412_vm0, %v14159_v43 }
 0x229   : > { %9646 = vmatmul.mubr.msk.f32.gmra.mrb[22].mxu0 %vm412_vm0, %v14160_v48 }
 0x22a   : > { %9648 = vmatprep.mubr.msk.f32.mxu0 %vm412_vm0, %v14161_v51 }
 0x22d   : > { %9649 = vmatmul.mubr.msk.f32.gmra.mrb[24].mxu0 %vm412_vm0, %v14162_v56  ;;  %v3220_v56 = vld [vmem:[#allocation7 + $0xf8] sm:$0xff] }
 0x22e   : > { %9651 = vmatprep.mubr.msk.f32.mxu0 %vm412_vm0, %v14163_v58  ;;  %v3608_v58 = vld [vmem:[#allocation7 + $0x108] sm:$0xff] }
 0x231   : > { %9652 = vmatmul.mubr.msk.f32.gmra.mrb[26].mxu0 %vm412_vm0, %v12313_v31  ;;  %v10408_v31 = vpack.c.bf16 %v3220_v56, %v3219_v62  ;;  %v3211_v56 = vld [vmem:[#allocation2 + $0x1f0] sm:$0xff] }
 0x232   : > { %9654 = vmatprep.mubr.msk.f32.mxu0 %vm412_vm0, %v14164_v59  ;;  %v3607_v59 = vld [vmem:[#allocation7 + $0x100] sm:$0xff] }
 0x235   : > { %9655 = vmatmul.mubr.msk.f32.gmra.mrb[28].mxu0 %vm412_vm0, %v12321_v14 }
 0x236   : > { %9657 = vmatprep.mubr.msk.f32.mxu0 %vm412_vm0, %v12520_v60  ;;  %v10412_v60 = vpack.c.bf16 %v3608_v58, %v3607_v59  ;;  %v3214_v58 = vld [vmem:[#allocation2 + $0x228] sm:$0xff]  ;;  %v3215_v59 = vld [vmem:[#allocation2 + $0x230] sm:$0xff] }
 0x239   : > { %9658 = vmatmul.mubr.msk.f32.gmra.mrb[30].mxu0 %vm412_vm0, %v12526_v61 }
 0x23a   : > { %9668 = vmatprep.mubr.msk.f32.mxu0 %vm412_vm0, %v12072_v42  ;;  %v3198_v42 = vld [vmem:[#allocation2 + $0x128] sm:$0xff] }
 0x23d   : > { %9669 = vmatmul.mubr.msk.f32.vlgmr.msra.gmra.mrb[0].mxu0 %vm412_vm0, %v12080_v0  ;;  %v3199_v0 = vld [vmem:[#allocation2 + $0x130] sm:$0xff] }
 0x23e   : > { %10407 = vmatpush3.bf16.msra.mxu0 %v10404_v63  ;;  %9671 = vmatprep.mubr.msk.f32.mxu0 %vm412_vm0, %v12082_v50  ;;  %v3200_v50 = vld [vmem:[#allocation2 + $0x148] sm:$0xff] }
 0x23f   : > { %10409 = vmatprep.subr.bf16.mxu0 %v10408_v31  ;;  %v3210_v63 = vld [vmem:[#allocation2 + $0x1e8] sm:$0xff] }
 0x241   : > { %9672 = vmatmul.mubr.msk.f32.gmra.mrb[2].mxu0 %vm412_vm0, %v12089_v45  ;;  %v3201_v45 = vld [vmem:[#allocation2 + $0x150] sm:$0xff] }
 0x242   : > { %9674 = vmatprep.mubr.msk.f32.mxu0 %vm412_vm0, %v12091_v46  ;;  %10411 = vmatpush3.bf16.msra.mxu0 %v10408_v31  ;;  %v3202_v46 = vld [vmem:[#allocation2 + $0x168] sm:$0xff]  ;;  %v3207_v31 = vld [vmem:[#allocation2 + $0x1b0] sm:$0xff] }
 0x243   : > { %10413 = vmatprep.subr.bf16.mxu0 %v10412_v60 }
 0x245   : > { %9675 = vmatmul.mubr.msk.f32.gmra.mrb[4].mxu0 %vm412_vm0, %v12097_v47  ;;  %v3203_v47 = vld [vmem:[#allocation2 + $0x170] sm:$0xff] }
 0x246   : > { %9677 = vmatprep.mubr.msk.f32.mxu0 %vm412_vm0, %v12099_v54  ;;  %v3204_v54 = vld [vmem:[#allocation2 + $0x188] sm:$0xff] }
 0x249   : > { %9678 = vmatmul.mubr.msk.f32.gmra.mrb[6].mxu0 %vm412_vm0, %v12105_v52  ;;  %v3205_v52 = vld [vmem:[#allocation2 + $0x190] sm:$0xff] }
 0x24a   : > { %9680 = vmatprep.mubr.msk.f32.mxu0 %vm412_vm0, %v12107_v53  ;;  %v3206_v53 = vld [vmem:[#allocation2 + $0x1a8] sm:$0xff] }
 0x24d   : > { %9681 = vmatmul.mubr.msk.f32.gmra.mrb[8].mxu0 %vm412_vm0, %v12113_v37  ;;  %v3197_v37 = vld [vmem:[#allocation2 + $0x110] sm:$0xff] }
 0x24e   : > { %9683 = vmatprep.mubr.msk.f32.mxu0 %vm412_vm0, %v12115_v36  ;;  %v3196_v36 = vld [vmem:[#allocation2 + $0x108] sm:$0xff] }
 0x251   : > { %9684 = vmatmul.mubr.msk.f32.gmra.mrb[10].mxu0 %vm412_vm0, %v12121_v34  ;;  %v3195_v34 = vld [vmem:[#allocation2 + $0xf0] sm:$0xff] }
 0x252   : > { %9686 = vmatprep.mubr.msk.f32.mxu0 %vm412_vm0, %v12123_v33  ;;  %v3194_v33 = vld [vmem:[#allocation2 + $0xe8] sm:$0xff] }
 0x255   : > { %9687 = vmatmul.mubr.msk.f32.gmra.mrb[12].mxu0 %vm412_vm0, %v12129_v32  ;;  %v3193_v32 = vld [vmem:[#allocation2 + $0xd0] sm:$0xff] }
 0x256   : > { %9689 = vmatprep.mubr.msk.f32.mxu0 %vm412_vm0, %v12131_v30  ;;  %v3192_v30 = vld [vmem:[#allocation2 + $0xc8] sm:$0xff] }
 0x259   : > { %9690 = vmatmul.mubr.msk.f32.gmra.mrb[14].mxu0 %vm412_vm0, %v12137_v27  ;;  %v3191_v27 = vld [vmem:[#allocation2 + $0xb0] sm:$0xff] }
 0x25a   : > { %9692 = vmatprep.mubr.msk.f32.mxu0 %vm412_vm0, %v12139_v26  ;;  %v3190_v26 = vld [vmem:[#allocation2 + $0xa8] sm:$0xff] }
 0x25d   : > { %9693 = vmatmul.mubr.msk.f32.gmra.mrb[16].mxu0 %vm412_vm0, %v12145_v25  ;;  %v3189_v25 = vld [vmem:[#allocation2 + $0x90] sm:$0xff] }
 0x25e   : > { %9695 = vmatprep.mubr.msk.f32.mxu0 %vm412_vm0, %v12147_v24  ;;  %v3188_v24 = vld [vmem:[#allocation2 + $0x88] sm:$0xff] }
 0x261   : > { %9696 = vmatmul.mubr.msk.f32.gmra.mrb[18].mxu0 %vm412_vm0, %v12153_v23  ;;  %v3187_v23 = vld [vmem:[#allocation2 + $0x70] sm:$0xff] }
 0x262   : > { %9698 = vmatprep.mubr.msk.f32.mxu0 %vm412_vm0, %v12155_v22  ;;  %v3610_v22 = vld [vmem:[#allocation7 + $0x118] sm:$0xff] }
 0x265   : > { %9699 = vmatmul.mubr.msk.f32.gmra.mrb[20].mxu0 %vm412_vm0, %v12161_v20  ;;  %v2824_v20 = vld [vmem:[#allocation2 + $0x227] sm:$0xff] }
 0x266   : > { %9701 = vmatprep.mubr.msk.f32.mxu0 %vm412_vm0, %v12163_v19  ;;  %v3609_v19 = vld [vmem:[#allocation7 + $0x110] sm:$0xff] }
 0x269   : > { %9702 = vmatmul.mubr.msk.f32.gmra.mrb[22].mxu0 %vm412_vm0, %v12169_v18  ;;  %v2825_v18 = vld [vmem:[#allocation2 + $0x22f] sm:$0xff] }
 0x26a   : > { %9704 = vmatprep.mubr.msk.f32.mxu0 %vm412_vm0, %v12171_v16  ;;  %v3184_v16 = vld [vmem:[#allocation2 + $0x48] sm:$0xff] }
 0x26d   : > { %9705 = vmatmul.mubr.msk.f32.gmra.mrb[24].mxu0 %vm412_vm0, %v12187_v13  ;;  %v3186_v13 = vld [vmem:[#allocation2 + $0x68] sm:$0xff] }
 0x26e   : > { %9707 = vmatprep.mubr.msk.f32.mxu0 %vm412_vm0, %v12189_v12  ;;  %v3185_v12 = vld [vmem:[#allocation2 + $0x50] sm:$0xff] }
 0x271   : > { %9708 = vmatmul.mubr.msk.f32.gmra.mrb[26].mxu0 %vm412_vm0, %v12195_v15  ;;  %v10416_v15 = vpack.c.bf16 %v3610_v22, %v3609_v19 }
 0x272   : > { %9710 = vmatprep.mubr.msk.f32.mxu0 %vm412_vm0, %v12384_v44  ;;  %v3208_v44 = vld [vmem:[#allocation2 + $0x1c8] sm:$0xff] }
 0x275   : > { %9711 = vmatmul.mubr.msk.f32.gmra.mrb[28].mxu0 %vm412_vm0, %v12390_v49  ;;  %v3209_v49 = vld [vmem:[#allocation2 + $0x1d0] sm:$0xff] }
 0x276   : > { %9713 = vmatprep.mubr.msk.f32.mxu0 %vm412_vm0, %v2824_v20 }
 0x279   : > { %9714 = vmatmul.mubr.msk.f32.gmra.mrb[30].mxu0 %vm412_vm0, %v2825_v18 }
 0x27a   : > { %9724 = vmatprep.mubr.msk.f32.mxu0 %vm412_vm0, %v3184_v16 }
 0x27d   : > { %9725 = vmatmul.mubr.msk.f32.vlgmr.msra.gmra.mrb[0].mxu0 %vm412_vm0, %v3185_v12 }
 0x27e   : > { %10415 = vmatpush3.bf16.msra.mxu0 %v10412_v60  ;;  %9727 = vmatprep.mubr.msk.f32.mxu0 %vm412_vm0, %v3186_v13 }
 0x27f   : > { %10417 = vmatprep.subr.bf16.mxu0 %v10416_v15 }
 0x281   : > { %9728 = vmatmul.mubr.msk.f32.gmra.mrb[2].mxu0 %vm412_vm0, %v3187_v23 }
 0x282   : > { %9730 = vmatprep.mubr.msk.f32.mxu0 %vm412_vm0, %v3188_v24  ;;  %10419 = vmatpush3.bf16.msra.mxu0 %v10416_v15 }
 0x285   : > { %9731 = vmatmul.mubr.msk.f32.gmra.mrb[4].mxu0 %vm412_vm0, %v3189_v25 }
 0x286   : > { %9733 = vmatprep.mubr.msk.f32.mxu0 %vm412_vm0, %v3190_v26 }
 0x289   : > { %9734 = vmatmul.mubr.msk.f32.gmra.mrb[6].mxu0 %vm412_vm0, %v3191_v27 }
 0x28a   : > { %9736 = vmatprep.mubr.msk.f32.mxu0 %vm412_vm0, %v3192_v30 }
 0x28d   : > { %9737 = vmatmul.mubr.msk.f32.gmra.mrb[8].mxu0 %vm412_vm0, %v3193_v32 }
 0x28e   : > { %9739 = vmatprep.mubr.msk.f32.mxu0 %vm412_vm0, %v3194_v33 }
 0x291   : > { %9740 = vmatmul.mubr.msk.f32.gmra.mrb[10].mxu0 %vm412_vm0, %v3195_v34 }
 0x292   : > { %9742 = vmatprep.mubr.msk.f32.mxu0 %vm412_vm0, %v3196_v36 }
 0x295   : > { %9743 = vmatmul.mubr.msk.f32.gmra.mrb[12].mxu0 %vm412_vm0, %v3197_v37 }
 0x296   : > { %9745 = vmatprep.mubr.msk.f32.mxu0 %vm412_vm0, %v3198_v42 }
 0x299   : > { %9746 = vmatmul.mubr.msk.f32.gmra.mrb[14].mxu0 %vm412_vm0, %v3199_v0 }
 0x29a   : > { %9748 = vmatprep.mubr.msk.f32.mxu0 %vm412_vm0, %v3200_v50 }
 0x29d   : > { %9749 = vmatmul.mubr.msk.f32.gmra.mrb[16].mxu0 %vm412_vm0, %v3201_v45 }
 0x29e   : > { %9751 = vmatprep.mubr.msk.f32.mxu0 %vm412_vm0, %v3202_v46 }
 0x2a1   : > { %9752 = vmatmul.mubr.msk.f32.gmra.mrb[18].mxu0 %vm412_vm0, %v3203_v47 }
 0x2a2   : > { %9754 = vmatprep.mubr.msk.f32.mxu0 %vm412_vm0, %v3204_v54 }
 0x2a5   : > { %9755 = vmatmul.mubr.msk.f32.gmra.mrb[20].mxu0 %vm412_vm0, %v3205_v52 }
 0x2a6   : > { %9757 = vmatprep.mubr.msk.f32.mxu0 %vm412_vm0, %v3206_v53 }
 0x2a9   : > { %9758 = vmatmul.mubr.msk.f32.gmra.mrb[22].mxu0 %vm412_vm0, %v3207_v31 }
 0x2aa   : > { %9760 = vmatprep.mubr.msk.f32.mxu0 %vm412_vm0, %v3208_v44 }
 0x2ad   : > { %9761 = vmatmul.mubr.msk.f32.gmra.mrb[24].mxu0 %vm412_vm0, %v3209_v49 }
 0x2ae   : > { %9763 = vmatprep.mubr.msk.f32.mxu0 %vm412_vm0, %v3210_v63 }
 0x2b1   : > { %9764 = vmatmul.mubr.msk.f32.gmra.mrb[26].mxu0 %vm412_vm0, %v3211_v56 }
 0x2b2   : > { %9766 = vmatprep.mubr.msk.f32.mxu0 %vm412_vm0, %v12452_v55  ;;  %v14167_v55 = vld [vmem:[#allocation78_spill] sm:$0xff] }
 0x2b5   : > { %9767 = vmatmul.mubr.msk.f32.gmra.mrb[28].mxu0 %vm412_vm0, %v12458_v57  ;;  %v14168_v57 = vld [vmem:[#allocation79_spill] sm:$0xff] }
 0x2b6   : > { %9769 = vmatprep.mubr.msk.f32.mxu0 %vm412_vm0, %v3214_v58 }
 0x2b9   : > { %9770 = vmatmul.mubr.msk.f32.gmra.mrb[30].mxu0 %vm412_vm0, %v3215_v59 }
 0x2ba   : > { %9780 = vmatprep.mubr.msk.f32.mxu0 %vm412_vm0, %v12208_v8  ;;  %v14166_v8 = vld [vmem:[#allocation77_spill] sm:$0xff] }
 0x2bd   : > { %9781 = vmatmul.mubr.msk.f32.vlgmr.msra.gmra.mrb[0].mxu0 %vm412_vm0, %v14140_v1  ;;  %v14169_v1 = vld [vmem:[#allocation80_spill] sm:$0xff] }
 0x2be   : > { %9783 = vmatprep.mubr.msk.f32.mxu0 %vm412_vm0, %v14141_v2  ;;  %v14170_v2 = vld [vmem:[#allocation45_spill] sm:$0xff] }
 0x2c1   : > { %9784 = vmatmul.mubr.msk.f32.gmra.mrb[2].mxu0 %vm412_vm0, %v14142_v3  ;;  %v3604_v3 = vld [vmem:[#allocation2 + $0x229] sm:$0xff] }
 0x2c2   : > { %9786 = vmatprep.mubr.msk.f32.mxu0 %vm412_vm0, %v14143_v4  ;;  %v3605_v4 = vld [vmem:[#allocation2 + $0x231] sm:$0xff] }
 0x2c5   : > { %9787 = vmatmul.mubr.msk.f32.gmra.mrb[4].mxu0 %vm412_vm0, %v14144_v5  ;;  %v4209_v5 = vld [vmem:[#allocation9 + $0x20] sm:$0xff] }
 0x2c6   : > { %9789 = vmatprep.mubr.msk.f32.mxu0 %vm412_vm0, %v14145_v6  ;;  %v4210_v6 = vld [vmem:[#allocation9 + $0x28] sm:$0xff] }
 0x2c9   : > { %9790 = vmatmul.mubr.msk.f32.gmra.mrb[6].mxu0 %vm412_vm0, %v14146_v9  ;;  %v10420_v9 = vpack.c.bf16 %v4210_v6, %v4209_v5 }
 0x2ca   : > { %9792 = vmatprep.mubr.msk.f32.mxu0 %vm412_vm0, %v14147_v29  ;;  %v4211_v29 = vld [vmem:[#allocation9 + $0x30] sm:$0xff] }
 0x2cb   : > { %10421 = vmatprep.subr.bf16.mxu1 %v10420_v9 }
 0x2cc   : > { %10423 = vmatpush3.bf16.msra.mxu1 %v10420_v9 }
 0x2cd   : > { %9793 = vmatmul.mubr.msk.f32.gmra.mrb[8].mxu0 %vm412_vm0, %v14148_v28  ;;  %v4212_v28 = vld [vmem:[#allocation9 + $0x38] sm:$0xff] }
 0x2ce   : > { %9795 = vmatprep.mubr.msk.f32.mxu0 %vm412_vm0, %v14149_v7  ;;  %v4176_v7 = vld [vmem:[#allocation3 + $0x8] sm:$0xff] }
 0x2cf   : > { %9836 = vmatprep.mubr.msk.f32.mxu1 %vm412_vm0, %v4176_v7 }
 0x2d1   : > { %9796 = vmatmul.mubr.msk.f32.gmra.mrb[10].mxu0 %vm412_vm0, %v14150_v10  ;;  %v4177_v10 = vld [vmem:[#allocation3 + $0x10] sm:$0xff] }
 0x2d2   : > { %9798 = vmatprep.mubr.msk.f32.mxu0 %vm412_vm0, %v14151_v11  ;;  %v4172_v11 = vld [vmem:[#allocation9] sm:$0xff] }
 0x2d5   : > { %9799 = vmatmul.mubr.msk.f32.gmra.mrb[12].mxu0 %vm412_vm0, %v14152_v41  ;;  %v4173_v41 = vld [vmem:[#allocation9 + $0x8] sm:$0xff] }
 0x2d6   : > { %9801 = vmatprep.mubr.msk.f32.mxu0 %vm412_vm0, %v14153_v17  ;;  %v10428_v17 = vpack.c.bf16 %v4173_v41, %v4172_v11 }
 0x2d9   : > { %9802 = vmatmul.mubr.msk.f32.gmra.mrb[14].mxu0 %vm412_vm0, %v14154_v21  ;;  %v4174_v21 = vld [vmem:[#allocation9 + $0x10] sm:$0xff] }
 0x2da   : > { %9804 = vmatprep.mubr.msk.f32.mxu0 %vm412_vm0, %v14155_v35  ;;  %v4175_v35 = vld [vmem:[#allocation9 + $0x18] sm:$0xff] }
 0x2dd   : > { %9805 = vmatmul.mubr.msk.f32.gmra.mrb[16].mxu0 %vm412_vm0, %v14156_v38  ;;  %v10432_v38 = vpack.c.bf16 %v4175_v35, %v4174_v21 }
 0x2de   : > { %9807 = vmatprep.mubr.msk.f32.mxu0 %vm412_vm0, %v14157_v39  ;;  %v4888_v39 = vld [vmem:[#allocation9 + $0x40] sm:$0xff] }
 0x2e1   : > { %9808 = vmatmul.mubr.msk.f32.gmra.mrb[18].mxu0 %vm412_vm0, %v14158_v40  ;;  %v4889_v40 = vld [vmem:[#allocation9 + $0x48] sm:$0xff] }
 0x2e2   : > { %9810 = vmatprep.mubr.msk.f32.mxu0 %vm412_vm0, %v14159_v43  ;;  %v12690_v43 = vpack.c.bf16 %v4889_v40, %v4888_v39 }
 0x2e5   : > { %9811 = vmatmul.mubr.msk.f32.gmra.mrb[20].mxu0 %vm412_vm0, %v14160_v48  ;;  %v12696_v48 = vld [vmem:[%s13878_s2] ss:$0 sm:$0xff] }
 0x2e6   : > { %9813 = vmatprep.mubr.msk.f32.mxu0 %vm412_vm0, %v14161_v51 }
 0x2e9   : > { %9814 = vmatmul.mubr.msk.f32.gmra.mrb[22].mxu0 %vm412_vm0, %v14166_v8 }
 0x2ea   : > { %9816 = vmatprep.mubr.msk.f32.mxu0 %vm412_vm0, %v14167_v55 }
 0x2ed   : > { %9817 = vmatmul.mubr.msk.f32.gmra.mrb[24].mxu0 %vm412_vm0, %v14168_v57 }
 0x2ee   : > { %9819 = vmatprep.mubr.msk.f32.mxu0 %vm412_vm0, %v14169_v1 }
 0x2f1   : > { %9820 = vmatmul.mubr.msk.f32.gmra.mrb[26].mxu0 %vm412_vm0, %v12321_v14  ;;  %v10424_v14 = vpack.c.bf16 %v4212_v28, %v4211_v29 }
 0x2f2   : > { %9822 = vmatprep.mubr.msk.f32.mxu0 %vm412_vm0, %v14170_v2 }
 0x2f3   : > { %10425 = vmatprep.subr.bf16.mxu1 %v10424_v14 }
 0x2f4   : > { %10427 = vmatpush3.bf16.msra.mxu1 %v10424_v14 }
 0x2f5   : > { %9823 = vmatmul.mubr.msk.f32.gmra.mrb[28].mxu0 %vm412_vm0, %v12526_v61  ;;  %10429 = vmatprep.subr.bf16.mxu1 %v10428_v17 }
 0x2f6   : > { %9825 = vmatprep.mubr.msk.f32.mxu0 %vm412_vm0, %v3604_v3 }
 0x2f7   : > { %9837 = vmatmul.mubr.msk.f32.vlgmr.msra.gmra.mrb[0].mxu1 %vm412_vm0, %v4177_v10 }
 0x2f8   : > { %10431 = vmatpush3.bf16.msra.mxu1 %v10428_v17 }
 0x2f9   : > { %9826 = vmatmul.mubr.msk.f32.gmra.mrb[30].mxu0 %vm412_vm0, %v3605_v4  ;;  %10433 = vmatprep.subr.bf16.mxu1 %v10432_v38 }
 0x2fc   : > { %10435 = vmatpush3.bf16.msra.mxu1 %v10432_v38 }
 0x2fd   : > { %10437 = vmatprep.subr.bf16.mxu1 %v12690_v43 }
 0x390   : > { %v9782_v51 = vpop.f32.mrb[0].mxu0 }
 0x391   : > { %v3972_v60 = vadd.f32 %v9782_v51, %v12696_v48  ;;  %v3773_v61 = vpop.f32.mrb[1].mxu0 }
 0x392   : > { %v3971_v62 = vadd.f32 %v12696_v48, %v3773_v61 }
 0x393   : > { %v4004_v20 = vmax.f32 %v3972_v60, 0.0 }
 0x394   : > { %v4003_v18 = vmax.f32 %v3971_v62, 0.0  ;;  %v9785_v16 = vpop.f32.mrb[2].mxu0 }
 0x395   : > { %4109 = vst.msk [vmem:[#allocation3 + $0x30] sm:$0xff] %vm412_vm0, %v4004_v20  ;;  %v3974_v19 = vadd.f32 %v9785_v16, %v12696_v48  ;;  %v3783_v22 = vpop.f32.mrb[3].mxu0 }
 0x396   : > { %4108 = vst.msk [vmem:[#allocation3 + $0x28] sm:$0xff] %vm412_vm0, %v4003_v18  ;;  %v3973_v12 = vadd.f32 %v12696_v48, %v3783_v22 }
 0x397   : > { %v4006_v13 = vmax.f32 %v3974_v19, 0.0 }
 0x398   : > { %v4005_v15 = vmax.f32 %v3973_v12, 0.0  ;;  %v9788_v23 = vpop.f32.mrb[4].mxu0 }
 0x399   : > { %4111 = vst.msk [vmem:[#allocation3 + $0x50] sm:$0xff] %vm412_vm0, %v4006_v13  ;;  %v3976_v24 = vadd.f32 %v9788_v23, %v12696_v48  ;;  %v3793_v25 = vpop.f32.mrb[5].mxu0 }
 0x39a   : > { %4110 = vst.msk [vmem:[#allocation3 + $0x48] sm:$0xff] %vm412_vm0, %v4005_v15  ;;  %v3975_v26 = vadd.f32 %v12696_v48, %v3793_v25 }
 0x39b   : > { %v4008_v27 = vmax.f32 %v3976_v24, 0.0 }
 0x39c   : > { %v4007_v30 = vmax.f32 %v3975_v26, 0.0  ;;  %v9791_v32 = vpop.f32.mrb[6].mxu0  ;;  %v12716_v42 = vld [vmem:[#allocation3 + $0x30] sm:$0xff] }
 0x39d   : > { %4113 = vst.msk [vmem:[#allocation3 + $0x70] sm:$0xff] %vm412_vm0, %v4008_v27  ;;  %v3978_v33 = vadd.f32 %v9791_v32, %v12696_v48  ;;  %v3803_v34 = vpop.f32.mrb[7].mxu0  ;;  %v12710_v36 = vld [vmem:[#allocation3 + $0x28] sm:$0xff] }
 0x39e   : > { %4112 = vst.msk [vmem:[#allocation3 + $0x68] sm:$0xff] %vm412_vm0, %v4007_v30  ;;  %v3977_v37 = vadd.f32 %v12696_v48, %v3803_v34  ;;  %9839 = vmatprep.mubr.msk.f32.mxu1 %vm412_vm0, %v12710_v36 }
 0x39f   : > { %v4010_v0 = vmax.f32 %v3978_v33, 0.0  ;;  %9840 = vmatmul.mubr.msk.f32.gmra.mrb[2].mxu1 %vm412_vm0, %v12716_v42 }
 0x3a0   : > { %v4009_v50 = vmax.f32 %v3977_v37, 0.0  ;;  %v9794_v45 = vpop.f32.mrb[8].mxu0  ;;  %v12728_v53 = vld [vmem:[#allocation3 + $0x50] sm:$0xff] }
 0x3a1   : > { %4115 = vst.msk [vmem:[#allocation3 + $0x90] sm:$0xff] %vm412_vm0, %v4010_v0  ;;  %v3980_v46 = vadd.f32 %v9794_v45, %v12696_v48  ;;  %v3813_v47 = vpop.f32.mrb[9].mxu0  ;;  %v12722_v54 = vld [vmem:[#allocation3 + $0x48] sm:$0xff] }
 0x3a2   : > { %4114 = vst.msk [vmem:[#allocation3 + $0x88] sm:$0xff] %vm412_vm0, %v4009_v50  ;;  %v3979_v52 = vadd.f32 %v12696_v48, %v3813_v47  ;;  %9842 = vmatprep.mubr.msk.f32.mxu1 %vm412_vm0, %v12722_v54 }
 0x3a3   : > { %v4012_v31 = vmax.f32 %v3980_v46, 0.0  ;;  %9843 = vmatmul.mubr.msk.f32.gmra.mrb[4].mxu1 %vm412_vm0, %v12728_v53 }
 0x3a4   : > { %v4011_v44 = vmax.f32 %v3979_v52, 0.0  ;;  %v9797_v49 = vpop.f32.mrb[10].mxu0  ;;  %v12740_v8 = vld [vmem:[#allocation3 + $0x70] sm:$0xff] }
 0x3a5   : > { %4117 = vst.msk [vmem:[#allocation3 + $0xb0] sm:$0xff] %vm412_vm0, %v4012_v31  ;;  %v3982_v63 = vadd.f32 %v9797_v49, %v12696_v48  ;;  %v3823_v56 = vpop.f32.mrb[11].mxu0  ;;  %v12734_v58 = vld [vmem:[#allocation3 + $0x68] sm:$0xff] }
 0x3a6   : > { %4116 = vst.msk [vmem:[#allocation3 + $0xa8] sm:$0xff] %vm412_vm0, %v4011_v44  ;;  %v3981_v59 = vadd.f32 %v12696_v48, %v3823_v56  ;;  %9845 = vmatprep.mubr.msk.f32.mxu1 %vm412_vm0, %v12734_v58 }
 0x3a7   : > { %v4014_v55 = vmax.f32 %v3982_v63, 0.0  ;;  %9846 = vmatmul.mubr.msk.f32.gmra.mrb[6].mxu1 %vm412_vm0, %v12740_v8 }
 0x3a8   : > { %v4013_v57 = vmax.f32 %v3981_v59, 0.0  ;;  %v9800_v1 = vpop.f32.mrb[12].mxu0  ;;  %v12752_v6 = vld [vmem:[#allocation3 + $0x90] sm:$0xff] }
 0x3a9   : > { %4119 = vst.msk [vmem:[#allocation3 + $0xd0] sm:$0xff] %vm412_vm0, %v4014_v55  ;;  %v3984_v2 = vadd.f32 %v9800_v1, %v12696_v48  ;;  %v3833_v3 = vpop.f32.mrb[13].mxu0  ;;  %v12746_v4 = vld [vmem:[#allocation3 + $0x88] sm:$0xff] }
 0x3aa   : > { %4118 = vst.msk [vmem:[#allocation3 + $0xc8] sm:$0xff] %vm412_vm0, %v4013_v57  ;;  %v3983_v5 = vadd.f32 %v12696_v48, %v3833_v3  ;;  %9848 = vmatprep.mubr.msk.f32.mxu1 %vm412_vm0, %v12746_v4 }
 0x3ab   : > { %v4016_v9 = vmax.f32 %v3984_v2, 0.0  ;;  %9849 = vmatmul.mubr.msk.f32.gmra.mrb[8].mxu1 %vm412_vm0, %v12752_v6 }
 0x3ac   : > { %v4015_v29 = vmax.f32 %v3983_v5, 0.0  ;;  %v9803_v28 = vpop.f32.mrb[14].mxu0  ;;  %v12764_v41 = vld [vmem:[#allocation3 + $0xb0] sm:$0xff] }
 0x3ad   : > { %4121 = vst.msk [vmem:[#allocation3 + $0xf0] sm:$0xff] %vm412_vm0, %v4016_v9  ;;  %v3986_v14 = vadd.f32 %v9803_v28, %v12696_v48  ;;  %v3843_v7 = vpop.f32.mrb[15].mxu0  ;;  %v12758_v10 = vld [vmem:[#allocation3 + $0xa8] sm:$0xff] }
 0x3ae   : > { %4120 = vst.msk [vmem:[#allocation3 + $0xe8] sm:$0xff] %vm412_vm0, %v4015_v29  ;;  %v3985_v11 = vadd.f32 %v12696_v48, %v3843_v7  ;;  %9851 = vmatprep.mubr.msk.f32.mxu1 %vm412_vm0, %v12758_v10 }
 0x3af   : > { %v4018_v17 = vmax.f32 %v3986_v14, 0.0  ;;  %9852 = vmatmul.mubr.msk.f32.gmra.mrb[10].mxu1 %vm412_vm0, %v12764_v41 }
 0x3b0   : > { %v4017_v21 = vmax.f32 %v3985_v11, 0.0  ;;  %v9806_v35 = vpop.f32.mrb[16].mxu0  ;;  %v12776_v60 = vld [vmem:[#allocation3 + $0xd0] sm:$0xff] }
 0x3b1   : > { %4123 = vst.msk [vmem:[#allocation3 + $0x110] sm:$0xff] %vm412_vm0, %v4018_v17  ;;  %v3988_v38 = vadd.f32 %v9806_v35, %v12696_v48  ;;  %v3853_v39 = vpop.f32.mrb[17].mxu0  ;;  %v12770_v40 = vld [vmem:[#allocation3 + $0xc8] sm:$0xff] }
 0x3b2   : > { %4122 = vst.msk [vmem:[#allocation3 + $0x108] sm:$0xff] %vm412_vm0, %v4017_v21  ;;  %v3987_v51 = vadd.f32 %v12696_v48, %v3853_v39  ;;  %9854 = vmatprep.mubr.msk.f32.mxu1 %vm412_vm0, %v12770_v40 }
 0x3b3   : > { %v4020_v61 = vmax.f32 %v3988_v38, 0.0  ;;  %9855 = vmatmul.mubr.msk.f32.gmra.mrb[12].mxu1 %vm412_vm0, %v12776_v60 }
 0x3b4   : > { %v4019_v62 = vmax.f32 %v3987_v51, 0.0  ;;  %v9809_v20 = vpop.f32.mrb[18].mxu0  ;;  %v12788_v12 = vld [vmem:[#allocation3 + $0xf0] sm:$0xff] }
 0x3b5   : > { %4125 = vst.msk [vmem:[#allocation3 + $0x130] sm:$0xff] %vm412_vm0, %v4020_v61  ;;  %v3990_v18 = vadd.f32 %v9809_v20, %v12696_v48  ;;  %v3863_v16 = vpop.f32.mrb[19].mxu0  ;;  %v12782_v19 = vld [vmem:[#allocation3 + $0xe8] sm:$0xff] }
 0x3b6   : > { %4124 = vst.msk [vmem:[#allocation3 + $0x128] sm:$0xff] %vm412_vm0, %v4019_v62  ;;  %v3989_v22 = vadd.f32 %v12696_v48, %v3863_v16  ;;  %9857 = vmatprep.mubr.msk.f32.mxu1 %vm412_vm0, %v12782_v19 }
 0x3b7   : > { %v4022_v13 = vmax.f32 %v3990_v18, 0.0  ;;  %9858 = vmatmul.mubr.msk.f32.gmra.mrb[14].mxu1 %vm412_vm0, %v12788_v12 }
 0x3b8   : > { %v4021_v15 = vmax.f32 %v3989_v22, 0.0  ;;  %v9812_v23 = vpop.f32.mrb[20].mxu0  ;;  %v12800_v30 = vld [vmem:[#allocation3 + $0x110] sm:$0xff] }
 0x3b9   : > { %4127 = vst.msk [vmem:[#allocation3 + $0x150] sm:$0xff] %vm412_vm0, %v4022_v13  ;;  %v3992_v24 = vadd.f32 %v9812_v23, %v12696_v48  ;;  %v3873_v25 = vpop.f32.mrb[21].mxu0  ;;  %v12794_v26 = vld [vmem:[#allocation3 + $0x108] sm:$0xff] }
 0x3ba   : > { %4126 = vst.msk [vmem:[#allocation3 + $0x148] sm:$0xff] %vm412_vm0, %v4021_v15  ;;  %v3991_v27 = vadd.f32 %v12696_v48, %v3873_v25  ;;  %9860 = vmatprep.mubr.msk.f32.mxu1 %vm412_vm0, %v12794_v26  ;;  %v4140_v25 = vld [vmem:[#allocation3 + $0x7] sm:$0xff] }
 0x3bb   : > { %v4024_v32 = vmax.f32 %v3992_v24, 0.0  ;;  %9861 = vmatmul.mubr.msk.f32.gmra.mrb[16].mxu1 %vm412_vm0, %v12800_v30 }
 0x3bc   : > { %v4023_v33 = vmax.f32 %v3991_v27, 0.0  ;;  %v9815_v34 = vpop.f32.mrb[22].mxu0  ;;  %v12812_v46 = vld [vmem:[#allocation3 + $0x130] sm:$0xff] }
 0x3bd   : > { %4129 = vst.msk [vmem:[#allocation3 + $0x170] sm:$0xff] %vm412_vm0, %v4024_v32  ;;  %v3994_v37 = vadd.f32 %v9815_v34, %v12696_v48  ;;  %v3883_v0 = vpop.f32.mrb[23].mxu0  ;;  %v12806_v50 = vld [vmem:[#allocation3 + $0x128] sm:$0xff]  ;;  %v4890_v32 = vld [vmem:[#allocation9 + $0x50] sm:$0xff] }
 0x3be   : > { %4128 = vst.msk [vmem:[#allocation3 + $0x168] sm:$0xff] %vm412_vm0, %v4023_v33  ;;  %v3993_v45 = vadd.f32 %v12696_v48, %v3883_v0  ;;  %9863 = vmatprep.mubr.msk.f32.mxu1 %vm412_vm0, %v12806_v50  ;;  %v4891_v33 = vld [vmem:[#allocation9 + $0x58] sm:$0xff]  ;;  %v4141_v34 = vld [vmem:[#allocation3 + $0xf] sm:$0xff]  ;;  %v5278_v0 = vld [vmem:[#allocation9 + $0x60] sm:$0xff] }
 0x3bf   : > { %v4026_v47 = vmax.f32 %v3994_v37, 0.0  ;;  %9864 = vmatmul.mubr.msk.f32.gmra.mrb[18].mxu1 %vm412_vm0, %v12812_v46  ;;  %v10440_v37 = vpack.c.bf16 %v4891_v33, %v4890_v32 }
 0x3c0   : > { %v4025_v52 = vmax.f32 %v3993_v45, 0.0  ;;  %v9818_v31 = vpop.f32.mrb[24].mxu0  ;;  %v12824_v59 = vld [vmem:[#allocation3 + $0x150] sm:$0xff]  ;;  %v5279_v45 = vld [vmem:[#allocation9 + $0x68] sm:$0xff] }
 0x3c1   : > { %4131 = vst.msk [vmem:[#allocation3 + $0x190] sm:$0xff] %vm412_vm0, %v4026_v47  ;;  %v3996_v44 = vadd.f32 %v9818_v31, %v12696_v48  ;;  %v3893_v49 = vpop.f32.mrb[25].mxu0  ;;  %v12818_v63 = vld [vmem:[#allocation3 + $0x148] sm:$0xff] }
 0x3c2   : > { %4130 = vst.msk [vmem:[#allocation3 + $0x188] sm:$0xff] %vm412_vm0, %v4025_v52  ;;  %v3995_v56 = vadd.f32 %v12696_v48, %v3893_v49  ;;  %9866 = vmatprep.mubr.msk.f32.mxu1 %vm412_vm0, %v12818_v63  ;;  %v12884_v47 = vld [vmem:[#allocation3 + $0x27] sm:$0xff]  ;;  %v12889_v52 = vpack.c.bf16 %v5279_v45, %v5278_v0  ;;  %v12891_v31 = vld [vmem:[#allocation3 + $0x2f] sm:$0xff]  ;;  %v5281_v45 = vld [vmem:[#allocation9 + $0x78] sm:$0xff] }
 0x3c3   : > { %v4028_v55 = vmax.f32 %v3996_v44, 0.0  ;;  %9867 = vmatmul.mubr.msk.f32.gmra.mrb[20].mxu1 %vm412_vm0, %v12824_v59  ;;  %v12895_v44 = vld [vmem:[#allocation3 + $0x47] sm:$0xff]  ;;  %v12900_v49 = vld [vmem:[#allocation3 + $0x4f] sm:$0xff] }
 0x3c4   : > { %v4027_v57 = vmax.f32 %v3995_v56, 0.0  ;;  %v9821_v1 = vpop.f32.mrb[26].mxu0  ;;  %v12836_v29 = vld [vmem:[#allocation3 + $0x170] sm:$0xff] }
 0x3c5   : > { %4133 = vst.msk [vmem:[#allocation3 + $0x1b0] sm:$0xff] %vm412_vm0, %v4028_v55  ;;  %v3998_v2 = vadd.f32 %v9821_v1, %v12696_v48  ;;  %v3903_v3 = vpop.f32.mrb[27].mxu0  ;;  %v12830_v5 = vld [vmem:[#allocation3 + $0x168] sm:$0xff]  ;;  %v5280_v0 = vld [vmem:[#allocation9 + $0x70] sm:$0xff] }
 0x3c6   : > { %4132 = vst.msk [vmem:[#allocation3 + $0x1a8] sm:$0xff] %vm412_vm0, %v4027_v57  ;;  %v3997_v9 = vadd.f32 %v12696_v48, %v3903_v3  ;;  %9869 = vmatprep.mubr.msk.f32.mxu1 %vm412_vm0, %v12830_v5  ;;  %v12908_v56 = vld [vmem:[#allocation3 + $0x6f] sm:$0xff]  ;;  %v12912_v55 = vld [vmem:[#allocation3 + $0x87] sm:$0xff] }
 0x3c7   : > { %v4030_v28 = vmax.f32 %v3998_v2, 0.0  ;;  %9870 = vmatmul.mubr.msk.f32.gmra.mrb[22].mxu1 %vm412_vm0, %v12836_v29  ;;  %v12916_v57 = vld [vmem:[#allocation3 + $0x8f] sm:$0xff]  ;;  %v12920_v1 = vld [vmem:[#allocation3 + $0xa7] sm:$0xff] }
 0x3c8   : > { %v4029_v14 = vmax.f32 %v3997_v9, 0.0  ;;  %v9824_v7 = vpop.f32.mrb[28].mxu0  ;;  %v12848_v38 = vld [vmem:[#allocation3 + $0x190] sm:$0xff]  ;;  %v12928_v3 = vld [vmem:[#allocation3 + $0xc7] sm:$0xff] }
 0x3c9   : > { %4135 = vst.msk [vmem:[#allocation3 + $0x1d0] sm:$0xff] %vm412_vm0, %v4030_v28  ;;  %v4000_v11 = vadd.f32 %v9824_v7, %v12696_v48  ;;  %v3913_v17 = vpop.f32.mrb[29].mxu0  ;;  %v12842_v21 = vld [vmem:[#allocation3 + $0x188] sm:$0xff]  ;;  %14171 = vst [vmem:[#allocation46_spill] sm:$0xff] %v12848_v38 }
 0x3ca   : > { %4134 = vst.msk [vmem:[#allocation3 + $0x1c8] sm:$0xff] %vm412_vm0, %v4029_v14  ;;  %v3999_v35 = vadd.f32 %v12696_v48, %v3913_v17  ;;  %9872 = vmatprep.mubr.msk.f32.mxu1 %vm412_vm0, %v12842_v21  ;;  %v12924_v2 = vld [vmem:[#allocation3 + $0xaf] sm:$0xff]  ;;  %v12936_v28 = vld [vmem:[#allocation3 + $0xe7] sm:$0xff] }
 0x3cb   : > { %v4032_v39 = vmax.f32 %v4000_v11, 0.0  ;;  %9873 = vmatmul.mubr.msk.f32.gmra.mrb[24].mxu1 %vm412_vm0, %v12848_v38  ;;  %v12932_v9 = vld [vmem:[#allocation3 + $0xcf] sm:$0xff]  ;;  %v12944_v7 = vld [vmem:[#allocation3 + $0x107] sm:$0xff] }
 0x3cc   : > { %v4031_v51 = vmax.f32 %v3999_v35, 0.0  ;;  %v9827_v61 = vpop.f32.mrb[30].mxu0  ;;  %v12860_v22 = vld [vmem:[#allocation3 + $0x1b0] sm:$0xff]  ;;  %v12952_v17 = vld [vmem:[#allocation3 + $0x127] sm:$0xff] }
 0x3cd   : > { %4137 = vst.msk [vmem:[#allocation3 + $0x1f0] sm:$0xff] %vm412_vm0, %v4032_v39  ;;  %v4002_v62 = vadd.f32 %v9827_v61, %v12696_v48  ;;  %v3923_v20 = vpop.f32.mrb[31].mxu0  ;;  %v12854_v18 = vld [vmem:[#allocation3 + $0x1a8] sm:$0xff]  ;;  %14173 = vst [vmem:[#allocation48_spill] sm:$0xff] %v12860_v22  ;;  %v13017_v38 = vld [vmem:[#allocation3 + $0x31] sm:$0xff] }
 0x3ce   : > { %14172 = vst [vmem:[#allocation47_spill] sm:$0xff] %v12854_v18  ;;  %4136 = vst.msk [vmem:[#allocation3 + $0x1e8] sm:$0xff] %vm412_vm0, %v4031_v51  ;;  %v4001_v16 = vadd.f32 %v12696_v48, %v3923_v20  ;;  %9875 = vmatprep.mubr.msk.f32.mxu1 %vm412_vm0, %v12854_v18  ;;  %v12940_v14 = vld [vmem:[#allocation3 + $0xef] sm:$0xff]  ;;  %v12960_v39 = vld [vmem:[#allocation3 + $0x147] sm:$0xff] }
 0x3cf   : > { %v4034_v13 = vmax.f32 %v4002_v62, 0.0  ;;  %9876 = vmatmul.mubr.msk.f32.gmra.mrb[26].mxu1 %vm412_vm0, %v12860_v22  ;;  %v12948_v11 = vld [vmem:[#allocation3 + $0x10f] sm:$0xff]  ;;  %v12968_v61 = vld [vmem:[#allocation3 + $0x167] sm:$0xff] }
 0x3d0   : > { %v4033_v15 = vmax.f32 %v4001_v16, 0.0  ;;  %v12870_v48 = vld [vmem:[#allocation3 + $0x1d0] sm:$0xff]  ;;  %v12976_v20 = vld [vmem:[#allocation3 + $0x187] sm:$0xff] }
 0x3d1   : > { %4139 = vst.msk [vmem:[#allocation3 + $0x210] sm:$0xff] %vm412_vm0, %v4034_v13  ;;  %v12865_v23 = vld [vmem:[#allocation3 + $0x1c8] sm:$0xff]  ;;  %14175 = vst [vmem:[#allocation50_spill] sm:$0xff] %v12870_v48 }
 0x3d2   : > { %14174 = vst [vmem:[#allocation49_spill] sm:$0xff] %v12865_v23  ;;  %4138 = vst.msk [vmem:[#allocation3 + $0x208] sm:$0xff] %vm412_vm0, %v4033_v15  ;;  %9878 = vmatprep.mubr.msk.f32.mxu1 %vm412_vm0, %v12865_v23  ;;  %v12956_v35 = vld [vmem:[#allocation3 + $0x12f] sm:$0xff]  ;;  %v12984_v13 = vld [vmem:[#allocation3 + $0x1a7] sm:$0xff] }
 0x3d3   : > { %9879 = vmatmul.mubr.msk.f32.gmra.mrb[28].mxu1 %vm412_vm0, %v12870_v48  ;;  %v12964_v51 = vld [vmem:[#allocation3 + $0x14f] sm:$0xff]  ;;  %v5668_v48 = vld [vmem:[#allocation9 + $0x80] sm:$0xff] }
 0x3d4   : > { %v12878_v27 = vld [vmem:[#allocation3 + $0x1f0] sm:$0xff]  ;;  %v5669_v23 = vld [vmem:[#allocation9 + $0x88] sm:$0xff] }
 0x3d5   : > { %v12874_v24 = vld [vmem:[#allocation3 + $0x1e8] sm:$0xff]  ;;  %14177 = vst [vmem:[#allocation52_spill] sm:$0xff] %v12878_v27  ;;  %v13015_v18 = vpack.c.bf16 %v5669_v23, %v5668_v48  ;;  %v13034_v48 = vld [vmem:[#allocation3 + $0x71] sm:$0xff] }
 0x3d6   : > { %14176 = vst [vmem:[#allocation51_spill] sm:$0xff] %v12874_v24  ;;  %9881 = vmatprep.mubr.msk.f32.mxu1 %vm412_vm0, %v12874_v24  ;;  %v12972_v62 = vld [vmem:[#allocation3 + $0x16f] sm:$0xff]  ;;  %v13000_v33 = vld [vmem:[#allocation3 + $0x1e7] sm:$0xff]  ;;  %v10448_v24 = vpack.c.bf16 %v5281_v45, %v5280_v0  ;;  %14181 = vst [vmem:[#allocation58_spill] sm:$0xff] %v13034_v48 }
 0x3d7   : > { %9882 = vmatmul.mubr.msk.f32.gmra.mrb[30].mxu1 %vm412_vm0, %v12878_v27  ;;  %v12980_v16 = vld [vmem:[#allocation3 + $0x18f] sm:$0xff] }
 0x3d8   : > { %9892 = vmatprep.mubr.msk.f32.mxu1 %vm412_vm0, %v4140_v25  ;;  %v12988_v15 = vld [vmem:[#allocation3 + $0x1af] sm:$0xff]  ;;  %v12992_v25 = vld [vmem:[#allocation3 + $0x1c7] sm:$0xff] }
 0x3d9   : > { %v12996_v32 = vld [vmem:[#allocation3 + $0x1cf] sm:$0xff] }
 0x3da   : > { %v4856_v27 = vld [vmem:[#allocation3 + $0x11] sm:$0xff]  ;;  %v13010_v22 = vld [vmem:[#allocation3 + $0x29] sm:$0xff] }
 0x3db   : > { %9893 = vmatmul.mubr.msk.f32.vlgmr.msra.gmra.mrb[0].mxu1 %vm412_vm0, %v4141_v34  ;;  %v4855_v34 = vld [vmem:[#allocation3 + $0x9] sm:$0xff]  ;;  %v13050_v45 = vld [vmem:[#allocation3 + $0xb1] sm:$0xff] }
 0x3dc   : > { %9895 = vmatprep.mubr.msk.f32.mxu1 %vm412_vm0, %v12884_v47  ;;  %10439 = vmatpush3.bf16.msra.mxu1 %v12690_v43  ;;  %v12904_v43 = vld [vmem:[#allocation3 + $0x67] sm:$0xff]  ;;  %14185 = vst [vmem:[#allocation62_spill] sm:$0xff] %v13050_v45 }
 0x3dd   : > { %10441 = vmatprep.subr.bf16.mxu1 %v10440_v37  ;;  %v13030_v23 = vld [vmem:[#allocation3 + $0x69] sm:$0xff] }
 0x3de   : > { %14180 = vst [vmem:[#allocation57_spill] sm:$0xff] %v13030_v23  ;;  %v13046_v0 = vld [vmem:[#allocation3 + $0xa9] sm:$0xff] }
 0x3df   : > { %9896 = vmatmul.mubr.msk.f32.gmra.mrb[2].mxu1 %vm412_vm0, %v12891_v31  ;;  %14184 = vst [vmem:[#allocation61_spill] sm:$0xff] %v13046_v0 }
 0x3e0   : > { %9898 = vmatprep.mubr.msk.f32.mxu1 %vm412_vm0, %v12895_v44  ;;  %10443 = vmatpush3.bf16.msra.mxu1 %v10440_v37  ;;  %v13004_v37 = vld [vmem:[#allocation3 + $0x1ef] sm:$0xff] }
 0x3e1   : > { %10445 = vmatprep.subr.bf16.mxu1 %v12889_v52 }
 0x3e3   : > { %9899 = vmatmul.mubr.msk.f32.gmra.mrb[4].mxu1 %vm412_vm0, %v12900_v49 }
 0x3e4   : > { %9901 = vmatprep.mubr.msk.f32.mxu1 %vm412_vm0, %v12904_v43 }
 0x3e7   : > { %9902 = vmatmul.mubr.msk.f32.gmra.mrb[6].mxu1 %vm412_vm0, %v12908_v56 }
 0x3e8   : > { %9904 = vmatprep.mubr.msk.f32.mxu1 %vm412_vm0, %v12912_v55 }
 0x3eb   : > { %9905 = vmatmul.mubr.msk.f32.gmra.mrb[8].mxu1 %vm412_vm0, %v12916_v57 }
 0x3ec   : > { %9907 = vmatprep.mubr.msk.f32.mxu1 %vm412_vm0, %v12920_v1 }
 0x3ef   : > { %9908 = vmatmul.mubr.msk.f32.gmra.mrb[10].mxu1 %vm412_vm0, %v12924_v2 }
 0x3f0   : > { %9910 = vmatprep.mubr.msk.f32.mxu1 %vm412_vm0, %v12928_v3 }
 0x3f3   : > { %9911 = vmatmul.mubr.msk.f32.gmra.mrb[12].mxu1 %vm412_vm0, %v12932_v9 }
 0x3f4   : > { %9913 = vmatprep.mubr.msk.f32.mxu1 %vm412_vm0, %v12936_v28 }
 0x3f7   : > { %9914 = vmatmul.mubr.msk.f32.gmra.mrb[14].mxu1 %vm412_vm0, %v12940_v14 }
 0x3f8   : > { %9916 = vmatprep.mubr.msk.f32.mxu1 %vm412_vm0, %v12944_v7 }
 0x3fb   : > { %9917 = vmatmul.mubr.msk.f32.gmra.mrb[16].mxu1 %vm412_vm0, %v12948_v11 }
 0x3fc   : > { %9919 = vmatprep.mubr.msk.f32.mxu1 %vm412_vm0, %v12952_v17 }
 0x3ff   : > { %9920 = vmatmul.mubr.msk.f32.gmra.mrb[18].mxu1 %vm412_vm0, %v12956_v35 }
 0x400   : > { %9922 = vmatprep.mubr.msk.f32.mxu1 %vm412_vm0, %v12960_v39 }
 0x403   : > { %9923 = vmatmul.mubr.msk.f32.gmra.mrb[20].mxu1 %vm412_vm0, %v12964_v51 }
 0x404   : > { %9925 = vmatprep.mubr.msk.f32.mxu1 %vm412_vm0, %v12968_v61 }
 0x407   : > { %9926 = vmatmul.mubr.msk.f32.gmra.mrb[22].mxu1 %vm412_vm0, %v12972_v62 }
 0x408   : > { %9928 = vmatprep.mubr.msk.f32.mxu1 %vm412_vm0, %v12976_v20 }
 0x40b   : > { %9929 = vmatmul.mubr.msk.f32.gmra.mrb[24].mxu1 %vm412_vm0, %v12980_v16 }
 0x40c   : > { %9931 = vmatprep.mubr.msk.f32.mxu1 %vm412_vm0, %v12984_v13 }
 0x40f   : > { %9932 = vmatmul.mubr.msk.f32.gmra.mrb[26].mxu1 %vm412_vm0, %v12988_v15 }
 0x410   : > { %9934 = vmatprep.mubr.msk.f32.mxu1 %vm412_vm0, %v12992_v25 }
 0x413   : > { %9935 = vmatmul.mubr.msk.f32.gmra.mrb[28].mxu1 %vm412_vm0, %v12996_v32 }
 0x414   : > { %9937 = vmatprep.mubr.msk.f32.mxu1 %vm412_vm0, %v13000_v33 }
 0x417   : > { %9938 = vmatmul.mubr.msk.f32.gmra.mrb[30].mxu1 %vm412_vm0, %v13004_v37 }
 0x418   : > { %9948 = vmatprep.mubr.msk.f32.mxu1 %vm412_vm0, %v4855_v34  ;;  %v13021_v34 = vld [vmem:[#allocation3 + $0x49] sm:$0xff] }
 0x419   : > { %14178 = vst [vmem:[#allocation55_spill] sm:$0xff] %v13021_v34 }
 0x41b   : > { %9949 = vmatmul.mubr.msk.f32.vlgmr.msra.gmra.mrb[0].mxu1 %vm412_vm0, %v4856_v27  ;;  %v13026_v27 = vld [vmem:[#allocation3 + $0x51] sm:$0xff] }
 0x41c   : > { %9951 = vmatprep.mubr.msk.f32.mxu1 %vm412_vm0, %v13010_v22  ;;  %10447 = vmatpush3.bf16.msra.mxu1 %v12889_v52  ;;  %14179 = vst [vmem:[#allocation56_spill] sm:$0xff] %v13026_v27  ;;  %v13038_v52 = vld [vmem:[#allocation3 + $0x89] sm:$0xff] }
 0x41d   : > { %10449 = vmatprep.subr.bf16.mxu1 %v10448_v24  ;;  %14182 = vst [vmem:[#allocation59_spill] sm:$0xff] %v13038_v52 }
 0x41f   : > { %9952 = vmatmul.mubr.msk.f32.gmra.mrb[2].mxu1 %vm412_vm0, %v13017_v38 }
 0x420   : > { %9954 = vmatprep.mubr.msk.f32.mxu1 %vm412_vm0, %v13021_v34  ;;  %10451 = vmatpush3.bf16.msra.mxu1 %v10448_v24  ;;  %v13042_v24 = vld [vmem:[#allocation3 + $0x91] sm:$0xff]  ;;  %v6059_v34 = vld [vmem:[#allocation9 + $0xa8] sm:$0xff] }
 0x421   : > { %10453 = vmatprep.subr.bf16.mxu1 %v13015_v18  ;;  %14183 = vst [vmem:[#allocation60_spill] sm:$0xff] %v13042_v24 }
 0x423   : > { %9955 = vmatmul.mubr.msk.f32.gmra.mrb[4].mxu1 %vm412_vm0, %v13026_v27  ;;  %v5671_v27 = vld [vmem:[#allocation9 + $0x98] sm:$0xff] }
 0x424   : > { %9957 = vmatprep.mubr.msk.f32.mxu1 %vm412_vm0, %v13030_v23  ;;  %v5670_v23 = vld [vmem:[#allocation9 + $0x90] sm:$0xff] }
 0x427   : > { %9958 = vmatmul.mubr.msk.f32.gmra.mrb[6].mxu1 %vm412_vm0, %v13034_v48  ;;  %v13054_v48 = vld [vmem:[#allocation3 + $0xc9] sm:$0xff] }
 0x428   : > { %9960 = vmatprep.mubr.msk.f32.mxu1 %vm412_vm0, %v13038_v52  ;;  %14186 = vst [vmem:[#allocation63_spill] sm:$0xff] %v13054_v48  ;;  %v13058_v52 = vld [vmem:[#allocation3 + $0xd1] sm:$0xff] }
 0x429   : > { %14187 = vst [vmem:[#allocation64_spill] sm:$0xff] %v13058_v52 }
 0x42b   : > { %9961 = vmatmul.mubr.msk.f32.gmra.mrb[8].mxu1 %vm412_vm0, %v13042_v24  ;;  %v13062_v24 = vld [vmem:[#allocation3 + $0xe9] sm:$0xff] }
 0x42c   : > { %9963 = vmatprep.mubr.msk.f32.mxu1 %vm412_vm0, %v13046_v0  ;;  %14188 = vst [vmem:[#allocation65_spill] sm:$0xff] %v13062_v24  ;;  %v13066_v0 = vld [vmem:[#allocation3 + $0xf1] sm:$0xff] }
 0x42d   : > { %14189 = vst [vmem:[#allocation66_spill] sm:$0xff] %v13066_v0 }
 0x42f   : > { %9964 = vmatmul.mubr.msk.f32.gmra.mrb[10].mxu1 %vm412_vm0, %v13050_v45  ;;  %v13070_v45 = vld [vmem:[#allocation3 + $0x109] sm:$0xff] }
 0x430   : > { %9966 = vmatprep.mubr.msk.f32.mxu1 %vm412_vm0, %v13054_v48  ;;  %14190 = vst [vmem:[#allocation67_spill] sm:$0xff] %v13070_v45  ;;  %v13074_v48 = vld [vmem:[#allocation3 + $0x111] sm:$0xff] }
 0x431   : > { %14191 = vst [vmem:[#allocation68_spill] sm:$0xff] %v13074_v48 }
 0x433   : > { %9967 = vmatmul.mubr.msk.f32.gmra.mrb[12].mxu1 %vm412_vm0, %v13058_v52  ;;  %v13078_v52 = vld [vmem:[#allocation3 + $0x129] sm:$0xff] }
 0x434   : > { %9969 = vmatprep.mubr.msk.f32.mxu1 %vm412_vm0, %v13062_v24  ;;  %14192 = vst [vmem:[#allocation69_spill] sm:$0xff] %v13078_v52  ;;  %v13082_v24 = vld [vmem:[#allocation3 + $0x131] sm:$0xff] }
 0x435   : > { %14193 = vst [vmem:[#allocation70_spill] sm:$0xff] %v13082_v24 }
 0x437   : > { %9970 = vmatmul.mubr.msk.f32.gmra.mrb[14].mxu1 %vm412_vm0, %v13066_v0  ;;  %v13086_v0 = vld [vmem:[#allocation3 + $0x149] sm:$0xff] }
 0x438   : > { %9972 = vmatprep.mubr.msk.f32.mxu1 %vm412_vm0, %v13070_v45  ;;  %14194 = vst [vmem:[#allocation71_spill] sm:$0xff] %v13086_v0  ;;  %v13090_v45 = vld [vmem:[#allocation3 + $0x151] sm:$0xff] }
 0x439   : > { %14195 = vst [vmem:[#allocation72_spill] sm:$0xff] %v13090_v45 }
 0x43b   : > { %9973 = vmatmul.mubr.msk.f32.gmra.mrb[16].mxu1 %vm412_vm0, %v13074_v48  ;;  %v13094_v48 = vld [vmem:[#allocation3 + $0x169] sm:$0xff] }
 0x43c   : > { %9975 = vmatprep.mubr.msk.f32.mxu1 %vm412_vm0, %v13078_v52  ;;  %14196 = vst [vmem:[#allocation73_spill] sm:$0xff] %v13094_v48  ;;  %v13098_v52 = vld [vmem:[#allocation3 + $0x171] sm:$0xff] }
 0x43d   : > { %14197 = vst [vmem:[#allocation74_spill] sm:$0xff] %v13098_v52 }
 0x43f   : > { %9976 = vmatmul.mubr.msk.f32.gmra.mrb[18].mxu1 %vm412_vm0, %v13082_v24  ;;  %v13102_v24 = vld [vmem:[#allocation3 + $0x189] sm:$0xff] }
 0x440   : > { %9978 = vmatprep.mubr.msk.f32.mxu1 %vm412_vm0, %v13086_v0  ;;  %14198 = vst [vmem:[#allocation75_spill] sm:$0xff] %v13102_v24  ;;  %v13106_v0 = vld [vmem:[#allocation3 + $0x191] sm:$0xff] }
 0x441   : > { %14199 = vst [vmem:[#allocation76_spill] sm:$0xff] %v13106_v0 }
 0x443   : > { %9979 = vmatmul.mubr.msk.f32.gmra.mrb[20].mxu1 %vm412_vm0, %v13090_v45  ;;  %v13110_v45 = vld [vmem:[#allocation3 + $0x1a9] sm:$0xff] }
 0x444   : > { %9981 = vmatprep.mubr.msk.f32.mxu1 %vm412_vm0, %v13094_v48  ;;  %14200 = vst [vmem:[#allocation77_spill] sm:$0xff] %v13110_v45  ;;  %v13114_v48 = vld [vmem:[#allocation3 + $0x1b1] sm:$0xff] }
 0x445   : > { %14201 = vst [vmem:[#allocation78_spill] sm:$0xff] %v13114_v48 }
 0x447   : > { %9982 = vmatmul.mubr.msk.f32.gmra.mrb[22].mxu1 %vm412_vm0, %v13098_v52  ;;  %v13118_v52 = vld [vmem:[#allocation3 + $0x1c9] sm:$0xff] }
 0x448   : > { %9984 = vmatprep.mubr.msk.f32.mxu1 %vm412_vm0, %v13102_v24  ;;  %14202 = vst [vmem:[#allocation79_spill] sm:$0xff] %v13118_v52  ;;  %v13122_v24 = vld [vmem:[#allocation3 + $0x1d1] sm:$0xff] }
 0x449   : > { %14203 = vst [vmem:[#allocation80_spill] sm:$0xff] %v13122_v24 }
 0x44b   : > { %9985 = vmatmul.mubr.msk.f32.gmra.mrb[24].mxu1 %vm412_vm0, %v13106_v0  ;;  %v13126_v0 = vld [vmem:[#allocation3 + $0x1e9] sm:$0xff] }
 0x44c   : > { %9987 = vmatprep.mubr.msk.f32.mxu1 %vm412_vm0, %v13110_v45  ;;  %14204 = vst [vmem:[#allocation45_spill] sm:$0xff] %v13126_v0  ;;  %v13130_v45 = vld [vmem:[#allocation3 + $0x1f1] sm:$0xff] }
 0x44f   : > { %9988 = vmatmul.mubr.msk.f32.gmra.mrb[26].mxu1 %vm412_vm0, %v13114_v48  ;;  %v6058_v48 = vld [vmem:[#allocation9 + $0xa0] sm:$0xff] }
 0x450   : > { %9990 = vmatprep.mubr.msk.f32.mxu1 %vm412_vm0, %v13118_v52  ;;  %v10456_v52 = vpack.c.bf16 %v5671_v27, %v5670_v23  ;;  %v6449_v23 = vld [vmem:[#allocation9 + $0xc0] sm:$0xff] }
 0x453   : > { %9991 = vmatmul.mubr.msk.f32.gmra.mrb[28].mxu1 %vm412_vm0, %v13122_v24 }
 0x454   : > { %9993 = vmatprep.mubr.msk.f32.mxu1 %vm412_vm0, %v13126_v0  ;;  %v10460_v0 = vpack.c.bf16 %v6059_v34, %v6058_v48  ;;  %v6061_v34 = vld [vmem:[#allocation9 + $0xb8] sm:$0xff]  ;;  %v6450_v48 = vld [vmem:[#allocation9 + $0xc8] sm:$0xff] }
 0x457   : > { %9994 = vmatmul.mubr.msk.f32.gmra.mrb[30].mxu1 %vm412_vm0, %v13130_v45 }
 0x458   : > { %10004 = vmatprep.mubr.msk.f32.mxu1 %vm412_vm0, %v12884_v47  ;;  %v13199_v47 = vld [vmem:[#allocation3 + $0x20f] sm:$0xff] }
 0x45b   : > { %10005 = vmatmul.mubr.msk.f32.vlgmr.msra.gmra.mrb[0].mxu1 %vm412_vm0, %v12891_v31  ;;  %v6060_v31 = vld [vmem:[#allocation9 + $0xb0] sm:$0xff] }
 0x45c   : > { %10007 = vmatprep.mubr.msk.f32.mxu1 %vm412_vm0, %v12895_v44  ;;  %10455 = vmatpush3.bf16.msra.mxu1 %v13015_v18  ;;  %v13195_v18 = vld [vmem:[#allocation3 + $0x207] sm:$0xff]  ;;  %v10464_v27 = vpack.c.bf16 %v6061_v34, %v6060_v31  ;;  %v14223_v31 = vld [vmem:[#allocation66_spill] sm:$0xff] }
 0x45d   : > { %10457 = vmatprep.subr.bf16.mxu1 %v10456_v52  ;;  %v14224_v34 = vld [vmem:[#allocation67_spill] sm:$0xff] }
 0x45f   : > { %10008 = vmatmul.mubr.msk.f32.gmra.mrb[2].mxu1 %vm412_vm0, %v12900_v49 }
 0x460   : > { %10010 = vmatprep.mubr.msk.f32.mxu1 %vm412_vm0, %v12904_v43  ;;  %10459 = vmatpush3.bf16.msra.mxu1 %v10456_v52  ;;  %v10468_v52 = vpack.c.bf16 %v6450_v48, %v6449_v23  ;;  %v14226_v23 = vld [vmem:[#allocation69_spill] sm:$0xff]  ;;  %v14227_v48 = vld [vmem:[#allocation70_spill] sm:$0xff] }
 0x461   : > { %10461 = vmatprep.subr.bf16.mxu1 %v10460_v0 }
 0x463   : > { %10011 = vmatmul.mubr.msk.f32.gmra.mrb[4].mxu1 %vm412_vm0, %v12908_v56 }
 0x464   : > { %10013 = vmatprep.mubr.msk.f32.mxu1 %vm412_vm0, %v12912_v55 }
 0x467   : > { %10014 = vmatmul.mubr.msk.f32.gmra.mrb[6].mxu1 %vm412_vm0, %v12916_v57 }
 0x468   : > { %10016 = vmatprep.mubr.msk.f32.mxu1 %vm412_vm0, %v12920_v1 }
 0x46b   : > { %10017 = vmatmul.mubr.msk.f32.gmra.mrb[8].mxu1 %vm412_vm0, %v12924_v2 }
 0x46c   : > { %10019 = vmatprep.mubr.msk.f32.mxu1 %vm412_vm0, %v12928_v3 }
 0x46f   : > { %10020 = vmatmul.mubr.msk.f32.gmra.mrb[10].mxu1 %vm412_vm0, %v12932_v9 }
 0x470   : > { %10022 = vmatprep.mubr.msk.f32.mxu1 %vm412_vm0, %v12936_v28 }
 0x473   : > { %10023 = vmatmul.mubr.msk.f32.gmra.mrb[12].mxu1 %vm412_vm0, %v12940_v14 }
 0x474   : > { %10025 = vmatprep.mubr.msk.f32.mxu1 %vm412_vm0, %v12944_v7 }
 0x477   : > { %10026 = vmatmul.mubr.msk.f32.gmra.mrb[14].mxu1 %vm412_vm0, %v12948_v11 }
 0x478   : > { %10028 = vmatprep.mubr.msk.f32.mxu1 %vm412_vm0, %v12952_v17 }
 0x47b   : > { %10029 = vmatmul.mubr.msk.f32.gmra.mrb[16].mxu1 %vm412_vm0, %v12956_v35 }
 0x47c   : > { %10031 = vmatprep.mubr.msk.f32.mxu1 %vm412_vm0, %v12960_v39 }
 0x47f   : > { %10032 = vmatmul.mubr.msk.f32.gmra.mrb[18].mxu1 %vm412_vm0, %v12964_v51 }
 0x480   : > { %10034 = vmatprep.mubr.msk.f32.mxu1 %vm412_vm0, %v12968_v61 }
 0x483   : > { %10035 = vmatmul.mubr.msk.f32.gmra.mrb[20].mxu1 %vm412_vm0, %v12972_v62 }
 0x484   : > { %10037 = vmatprep.mubr.msk.f32.mxu1 %vm412_vm0, %v12976_v20 }
 0x487   : > { %10038 = vmatmul.mubr.msk.f32.gmra.mrb[22].mxu1 %vm412_vm0, %v12980_v16 }
 0x488   : > { %10040 = vmatprep.mubr.msk.f32.mxu1 %vm412_vm0, %v12984_v13 }
 0x48b   : > { %10041 = vmatmul.mubr.msk.f32.gmra.mrb[24].mxu1 %vm412_vm0, %v12988_v15 }
 0x48c   : > { %10043 = vmatprep.mubr.msk.f32.mxu1 %vm412_vm0, %v12992_v25 }
 0x48f   : > { %10044 = vmatmul.mubr.msk.f32.gmra.mrb[26].mxu1 %vm412_vm0, %v12996_v32 }
 0x490   : > { %10046 = vmatprep.mubr.msk.f32.mxu1 %vm412_vm0, %v13000_v33 }
 0x493   : > { %10047 = vmatmul.mubr.msk.f32.gmra.mrb[28].mxu1 %vm412_vm0, %v13004_v37 }
 0x494   : > { %10049 = vmatprep.mubr.msk.f32.mxu1 %vm412_vm0, %v13195_v18 }
 0x497   : > { %10050 = vmatmul.mubr.msk.f32.gmra.mrb[30].mxu1 %vm412_vm0, %v13199_v47 }
 0x498   : > { %10060 = vmatprep.mubr.msk.f32.mxu1 %vm412_vm0, %v12710_v36  ;;  %v14205_v36 = vld [vmem:[#allocation46_spill] sm:$0xff] }
 0x49b   : > { %10061 = vmatmul.mubr.msk.f32.vlgmr.msra.gmra.mrb[0].mxu1 %vm412_vm0, %v12716_v42  ;;  %v14206_v42 = vld [vmem:[#allocation47_spill] sm:$0xff] }
 0x49c   : > { %10063 = vmatprep.mubr.msk.f32.mxu1 %vm412_vm0, %v12722_v54  ;;  %10463 = vmatpush3.bf16.msra.mxu1 %v10460_v0  ;;  %v14207_v54 = vld [vmem:[#allocation48_spill] sm:$0xff]  ;;  %v14222_v0 = vld [vmem:[#allocation65_spill] sm:$0xff] }
 0x49d   : > { %10465 = vmatprep.subr.bf16.mxu1 %v10464_v27 }
 0x49f   : > { %10064 = vmatmul.mubr.msk.f32.gmra.mrb[2].mxu1 %vm412_vm0, %v12728_v53  ;;  %v14208_v53 = vld [vmem:[#allocation49_spill] sm:$0xff] }
 0x4a0   : > { %10066 = vmatprep.mubr.msk.f32.mxu1 %vm412_vm0, %v12734_v58  ;;  %10467 = vmatpush3.bf16.msra.mxu1 %v10464_v27  ;;  %v14209_v58 = vld [vmem:[#allocation50_spill] sm:$0xff]  ;;  %v14225_v27 = vld [vmem:[#allocation68_spill] sm:$0xff] }
 0x4a1   : > { %10469 = vmatprep.subr.bf16.mxu1 %v10468_v52 }
 0x4a3   : > { %10067 = vmatmul.mubr.msk.f32.gmra.mrb[4].mxu1 %vm412_vm0, %v12740_v8  ;;  %v14210_v8 = vld [vmem:[#allocation51_spill] sm:$0xff] }
 0x4a4   : > { %10069 = vmatprep.mubr.msk.f32.mxu1 %vm412_vm0, %v12746_v4  ;;  %v14211_v4 = vld [vmem:[#allocation52_spill] sm:$0xff] }
 0x4a7   : > { %10070 = vmatmul.mubr.msk.f32.gmra.mrb[6].mxu1 %vm412_vm0, %v12752_v6  ;;  %v13263_v6 = vld [vmem:[#allocation3 + $0x208] sm:$0xff] }
 0x4a8   : > { %10072 = vmatprep.mubr.msk.f32.mxu1 %vm412_vm0, %v12758_v10  ;;  %v13267_v10 = vld [vmem:[#allocation3 + $0x210] sm:$0xff] }
 0x4ab   : > { %10073 = vmatmul.mubr.msk.f32.gmra.mrb[8].mxu1 %vm412_vm0, %v12764_v41  ;;  %v6451_v41 = vld [vmem:[#allocation9 + $0xd0] sm:$0xff] }
 0x4ac   : > { %10075 = vmatprep.mubr.msk.f32.mxu1 %vm412_vm0, %v12770_v40  ;;  %v6452_v40 = vld [vmem:[#allocation9 + $0xd8] sm:$0xff] }
 0x4af   : > { %10076 = vmatmul.mubr.msk.f32.gmra.mrb[10].mxu1 %vm412_vm0, %v12776_v60  ;;  %v10472_v60 = vpack.c.bf16 %v6452_v40, %v6451_v41  ;;  %v14230_v41 = vld [vmem:[#allocation73_spill] sm:$0xff]  ;;  %v14231_v40 = vld [vmem:[#allocation74_spill] sm:$0xff] }
 0x4b0   : > { %10078 = vmatprep.mubr.msk.f32.mxu1 %vm412_vm0, %v12782_v19  ;;  %v6839_v19 = vld [vmem:[#allocation9 + $0xe0] sm:$0xff] }
 0x4b3   : > { %10079 = vmatmul.mubr.msk.f32.gmra.mrb[12].mxu1 %vm412_vm0, %v12788_v12  ;;  %v6840_v12 = vld [vmem:[#allocation9 + $0xe8] sm:$0xff] }
 0x4b4   : > { %10081 = vmatprep.mubr.msk.f32.mxu1 %vm412_vm0, %v12794_v26  ;;  %v14212_v26 = vld [vmem:[#allocation55_spill] sm:$0xff] }
 0x4b7   : > { %10082 = vmatmul.mubr.msk.f32.gmra.mrb[14].mxu1 %vm412_vm0, %v12800_v30  ;;  %v10476_v30 = vpack.c.bf16 %v6840_v12, %v6839_v19  ;;  %v14233_v19 = vld [vmem:[#allocation76_spill] sm:$0xff]  ;;  %v14234_v12 = vld [vmem:[#allocation77_spill] sm:$0xff] }
 0x4b8   : > { %10084 = vmatprep.mubr.msk.f32.mxu1 %vm412_vm0, %v12806_v50  ;;  %v14213_v50 = vld [vmem:[#allocation56_spill] sm:$0xff] }
 0x4bb   : > { %10085 = vmatmul.mubr.msk.f32.gmra.mrb[16].mxu1 %vm412_vm0, %v12812_v46  ;;  %v14214_v46 = vld [vmem:[#allocation57_spill] sm:$0xff] }
 0x4bc   : > { %10087 = vmatprep.mubr.msk.f32.mxu1 %vm412_vm0, %v12818_v63  ;;  %v14215_v63 = vld [vmem:[#allocation58_spill] sm:$0xff] }
 0x4bf   : > { %10088 = vmatmul.mubr.msk.f32.gmra.mrb[18].mxu1 %vm412_vm0, %v12824_v59  ;;  %v14216_v59 = vld [vmem:[#allocation59_spill] sm:$0xff] }
 0x4c0   : > { %10090 = vmatprep.mubr.msk.f32.mxu1 %vm412_vm0, %v12830_v5  ;;  %v14217_v5 = vld [vmem:[#allocation60_spill] sm:$0xff] }
 0x4c3   : > { %10091 = vmatmul.mubr.msk.f32.gmra.mrb[20].mxu1 %vm412_vm0, %v12836_v29  ;;  %v14218_v29 = vld [vmem:[#allocation61_spill] sm:$0xff] }
 0x4c4   : > { %10093 = vmatprep.mubr.msk.f32.mxu1 %vm412_vm0, %v12842_v21  ;;  %v14219_v21 = vld [vmem:[#allocation62_spill] sm:$0xff] }
 0x4c7   : > { %10094 = vmatmul.mubr.msk.f32.gmra.mrb[22].mxu1 %vm412_vm0, %v14205_v36  ;;  %v14229_v36 = vld [vmem:[#allocation72_spill] sm:$0xff] }
 0x4c8   : > { %10096 = vmatprep.mubr.msk.f32.mxu1 %vm412_vm0, %v14206_v42 }
 0x4cb   : > { %10097 = vmatmul.mubr.msk.f32.gmra.mrb[24].mxu1 %vm412_vm0, %v14207_v54 }
 0x4cc   : > { %10099 = vmatprep.mubr.msk.f32.mxu1 %vm412_vm0, %v14208_v53 }
 0x4cf   : > { %10100 = vmatmul.mubr.msk.f32.gmra.mrb[26].mxu1 %vm412_vm0, %v14209_v58 }
 0x4d0   : > { %10102 = vmatprep.mubr.msk.f32.mxu1 %vm412_vm0, %v14210_v8 }
 0x4d3   : > { %10103 = vmatmul.mubr.msk.f32.gmra.mrb[28].mxu1 %vm412_vm0, %v14211_v4 }
 0x4d4   : > { %10105 = vmatprep.mubr.msk.f32.mxu1 %vm412_vm0, %v13263_v6 }
 0x4d7   : > { %10106 = vmatmul.mubr.msk.f32.gmra.mrb[30].mxu1 %vm412_vm0, %v13267_v10 }
 0x4d8   : > { %10116 = vmatprep.mubr.msk.f32.mxu1 %vm412_vm0, %v13010_v22  ;;  %v14221_v22 = vld [vmem:[#allocation64_spill] sm:$0xff] }
 0x4db   : > { %10117 = vmatmul.mubr.msk.f32.vlgmr.msra.gmra.mrb[0].mxu1 %vm412_vm0, %v13017_v38  ;;  %v14220_v38 = vld [vmem:[#allocation63_spill] sm:$0xff] }
 0x4dc   : > { %10119 = vmatprep.mubr.msk.f32.mxu1 %vm412_vm0, %v14212_v26  ;;  %10471 = vmatpush3.bf16.msra.mxu1 %v10468_v52  ;;  %v14228_v52 = vld [vmem:[#allocation71_spill] sm:$0xff] }
 0x4dd   : > { %10473 = vmatprep.subr.bf16.mxu1 %v10472_v60 }
 0x4df   : > { %10120 = vmatmul.mubr.msk.f32.gmra.mrb[2].mxu1 %vm412_vm0, %v14213_v50 }
 0x4e0   : > { %10122 = vmatprep.mubr.msk.f32.mxu1 %vm412_vm0, %v14214_v46  ;;  %10475 = vmatpush3.bf16.msra.mxu1 %v10472_v60  ;;  %v14232_v60 = vld [vmem:[#allocation75_spill] sm:$0xff] }
 0x4e1   : > { %10477 = vmatprep.subr.bf16.mxu1 %v10476_v30 }
 0x4e3   : > { %10123 = vmatmul.mubr.msk.f32.gmra.mrb[4].mxu1 %vm412_vm0, %v14215_v63 }
 0x4e4   : > { %10125 = vmatprep.mubr.msk.f32.mxu1 %vm412_vm0, %v14216_v59 }
 0x4e7   : > { %10126 = vmatmul.mubr.msk.f32.gmra.mrb[6].mxu1 %vm412_vm0, %v14217_v5 }
 0x4e8   : > { %10128 = vmatprep.mubr.msk.f32.mxu1 %vm412_vm0, %v14218_v29 }
 0x4eb   : > { %10129 = vmatmul.mubr.msk.f32.gmra.mrb[8].mxu1 %vm412_vm0, %v14219_v21 }
 0x4ec   : > { %10131 = vmatprep.mubr.msk.f32.mxu1 %vm412_vm0, %v14220_v38 }
 0x4ef   : > { %10132 = vmatmul.mubr.msk.f32.gmra.mrb[10].mxu1 %vm412_vm0, %v14221_v22 }
 0x4f0   : > { %10134 = vmatprep.mubr.msk.f32.mxu1 %vm412_vm0, %v14222_v0 }
 0x4f3   : > { %10135 = vmatmul.mubr.msk.f32.gmra.mrb[12].mxu1 %vm412_vm0, %v14223_v31 }
 0x4f4   : > { %10137 = vmatprep.mubr.msk.f32.mxu1 %vm412_vm0, %v14224_v34 }
 0x4f7   : > { %10138 = vmatmul.mubr.msk.f32.gmra.mrb[14].mxu1 %vm412_vm0, %v14225_v27 }
 0x4f8   : > { %10140 = vmatprep.mubr.msk.f32.mxu1 %vm412_vm0, %v14226_v23 }
 0x4fb   : > { %10141 = vmatmul.mubr.msk.f32.gmra.mrb[16].mxu1 %vm412_vm0, %v14227_v48  ;;  %v14235_v48 = vld [vmem:[#allocation78_spill] sm:$0xff] }
 0x4fc   : > { %10143 = vmatprep.mubr.msk.f32.mxu1 %vm412_vm0, %v14228_v52  ;;  %v14236_v52 = vld [vmem:[#allocation79_spill] sm:$0xff] }
 0x4ff   : > { %10144 = vmatmul.mubr.msk.f32.gmra.mrb[18].mxu1 %vm412_vm0, %v14229_v36 }
 0x500   : > { %10146 = vmatprep.mubr.msk.f32.mxu1 %vm412_vm0, %v14230_v41  ;;  %v14237_v41 = vld [vmem:[#allocation45_spill] sm:$0xff] }
 0x503   : > { %10147 = vmatmul.mubr.msk.f32.gmra.mrb[20].mxu1 %vm412_vm0, %v14231_v40 }
 0x504   : > { %10149 = vmatprep.mubr.msk.f32.mxu1 %vm412_vm0, %v14232_v60  ;;  %v13331_v60 = vld [vmem:[#allocation3 + $0x209] sm:$0xff] }
 0x505   : > { %14238 = vst [vmem:[#allocation46_spill] sm:$0xff] %v13331_v60 }
 0x507   : > { %10150 = vmatmul.mubr.msk.f32.gmra.mrb[22].mxu1 %vm412_vm0, %v14233_v19  ;;  %v6842_v19 = vld [vmem:[#allocation9 + $0xf8] sm:$0xff] }
 0x508   : > { %10152 = vmatprep.mubr.msk.f32.mxu1 %vm412_vm0, %v14234_v12  ;;  %v13335_v12 = vld [vmem:[#allocation3 + $0x211] sm:$0xff] }
 0x50b   : > { %10153 = vmatmul.mubr.msk.f32.gmra.mrb[24].mxu1 %vm412_vm0, %v14235_v48  ;;  %v6841_v48 = vld [vmem:[#allocation9 + $0xf0] sm:$0xff] }
 0x50c   : > { %10155 = vmatprep.mubr.msk.f32.mxu1 %vm412_vm0, %v14236_v52  ;;  %v7230_v52 = vld [vmem:[#allocation9 + $0x108] sm:$0xff] }
 0x50f   : > { %10156 = vmatmul.mubr.msk.f32.gmra.mrb[26].mxu1 %vm412_vm0, %v13122_v24  ;;  %v10480_v24 = vpack.c.bf16 %v6842_v19, %v6841_v48 }
 0x510   : > { %10158 = vmatprep.mubr.msk.f32.mxu1 %vm412_vm0, %v14237_v41  ;;  %v7229_v41 = vld [vmem:[#allocation9 + $0x100] sm:$0xff] }
 0x513   : > { %10159 = vmatmul.mubr.msk.f32.gmra.mrb[28].mxu1 %vm412_vm0, %v13130_v45 }
 0x514   : > { %10161 = vmatprep.mubr.msk.f32.mxu1 %vm412_vm0, %v13331_v60  ;;  %v10484_v60 = vpack.c.bf16 %v7230_v52, %v7229_v41 }
 0x517   : > { %10162 = vmatmul.mubr.msk.f32.gmra.mrb[30].mxu1 %vm412_vm0, %v13335_v12 }
 0x518   : > { %10172 = vmatprep.mubr.msk.f32.mxu1 %vm412_vm0, %v12895_v44  ;;  %v6446_v44 = vld [vmem:[#allocation3 + $0x227] sm:$0xff] }
 0x51b   : > { %10173 = vmatmul.mubr.msk.f32.vlgmr.msra.gmra.mrb[0].mxu1 %vm412_vm0, %v12900_v49  ;;  %v6447_v49 = vld [vmem:[#allocation3 + $0x22f] sm:$0xff] }
 0x51c   : > { %10175 = vmatprep.mubr.msk.f32.mxu1 %vm412_vm0, %v12904_v43  ;;  %10479 = vmatpush3.bf16.msra.mxu1 %v10476_v30  ;;  %v7231_v43 = vld [vmem:[#allocation9 + $0x110] sm:$0xff]  ;;  %v14250_v30 = vld [vmem:[#allocation46_spill] sm:$0xff] }
 0x51d   : > { %10481 = vmatprep.subr.bf16.mxu1 %v10480_v24 }
 0x51f   : > { %10176 = vmatmul.mubr.msk.f32.gmra.mrb[2].mxu1 %vm412_vm0, %v12908_v56  ;;  %v7232_v56 = vld [vmem:[#allocation9 + $0x118] sm:$0xff] }
 0x520   : > { %10178 = vmatprep.mubr.msk.f32.mxu1 %vm412_vm0, %v12912_v55  ;;  %10483 = vmatpush3.bf16.msra.mxu1 %v10480_v24  ;;  %v6806_v55 = vld [vmem:[#allocation3 + $0x48] sm:$0xff] }
 0x521   : > { %10485 = vmatprep.subr.bf16.mxu1 %v10484_v60  ;;  %v6836_v24 = vld [vmem:[#allocation3 + $0x228] sm:$0xff] }
 0x523   : > { %10179 = vmatmul.mubr.msk.f32.gmra.mrb[4].mxu1 %vm412_vm0, %v12916_v57  ;;  %v10488_v57 = vpack.c.bf16 %v7232_v56, %v7231_v43 }
 0x524   : > { %10181 = vmatprep.mubr.msk.f32.mxu1 %vm412_vm0, %v12920_v1  ;;  %v6807_v1 = vld [vmem:[#allocation3 + $0x50] sm:$0xff] }
 0x527   : > { %10182 = vmatmul.mubr.msk.f32.gmra.mrb[6].mxu1 %vm412_vm0, %v12924_v2  ;;  %v6808_v2 = vld [vmem:[#allocation3 + $0x68] sm:$0xff] }
 0x528   : > { %10184 = vmatprep.mubr.msk.f32.mxu1 %vm412_vm0, %v12928_v3  ;;  %v6809_v3 = vld [vmem:[#allocation3 + $0x70] sm:$0xff] }
 0x52b   : > { %10185 = vmatmul.mubr.msk.f32.gmra.mrb[8].mxu1 %vm412_vm0, %v12932_v9  ;;  %v6810_v9 = vld [vmem:[#allocation3 + $0x88] sm:$0xff] }
 0x52c   : > { %10187 = vmatprep.mubr.msk.f32.mxu1 %vm412_vm0, %v12936_v28  ;;  %v14239_v28 = vmov 0.0  }
 0x52d   : > { %10340 = vmatprep.mubr.msk.f32.mxu0 %vm11253_vm1, %v14239_v28 }
 0x52f   : > { %10188 = vmatmul.mubr.msk.f32.gmra.mrb[10].mxu1 %vm412_vm0, %v12940_v14  ;;  %v6811_v14 = vld [vmem:[#allocation3 + $0x90] sm:$0xff] }
 0x530   : > { %10190 = vmatprep.mubr.msk.f32.mxu1 %vm412_vm0, %v12944_v7  ;;  %v6812_v7 = vld [vmem:[#allocation3 + $0xa8] sm:$0xff] }
 0x533   : > { %10191 = vmatmul.mubr.msk.f32.gmra.mrb[12].mxu1 %vm412_vm0, %v12948_v11  ;;  %v6813_v11 = vld [vmem:[#allocation3 + $0xb0] sm:$0xff] }
 0x534   : > { %10193 = vmatprep.mubr.msk.f32.mxu1 %vm412_vm0, %v12952_v17  ;;  %v6814_v17 = vld [vmem:[#allocation3 + $0xc8] sm:$0xff] }
 0x537   : > { %10194 = vmatmul.mubr.msk.f32.gmra.mrb[14].mxu1 %vm412_vm0, %v12956_v35  ;;  %v6815_v35 = vld [vmem:[#allocation3 + $0xd0] sm:$0xff] }
 0x538   : > { %10196 = vmatprep.mubr.msk.f32.mxu1 %vm412_vm0, %v12960_v39  ;;  %v6816_v39 = vld [vmem:[#allocation3 + $0xe8] sm:$0xff] }
 0x53b   : > { %10197 = vmatmul.mubr.msk.f32.gmra.mrb[16].mxu1 %vm412_vm0, %v12964_v51  ;;  %v6817_v51 = vld [vmem:[#allocation3 + $0xf0] sm:$0xff] }
 0x53c   : > { %10199 = vmatprep.mubr.msk.f32.mxu1 %vm412_vm0, %v12968_v61  ;;  %v6818_v61 = vld [vmem:[#allocation3 + $0x108] sm:$0xff] }
 0x53f   : > { %10200 = vmatmul.mubr.msk.f32.gmra.mrb[18].mxu1 %vm412_vm0, %v12972_v62  ;;  %v6819_v62 = vld [vmem:[#allocation3 + $0x110] sm:$0xff] }
 0x540   : > { %10202 = vmatprep.mubr.msk.f32.mxu1 %vm412_vm0, %v12976_v20  ;;  %v6820_v20 = vld [vmem:[#allocation3 + $0x128] sm:$0xff] }
 0x543   : > { %10203 = vmatmul.mubr.msk.f32.gmra.mrb[20].mxu1 %vm412_vm0, %v12980_v16  ;;  %v6821_v16 = vld [vmem:[#allocation3 + $0x130] sm:$0xff] }
 0x544   : > { %10205 = vmatprep.mubr.msk.f32.mxu1 %vm412_vm0, %v12984_v13  ;;  %v6822_v13 = vld [vmem:[#allocation3 + $0x148] sm:$0xff] }
 0x547   : > { %10206 = vmatmul.mubr.msk.f32.gmra.mrb[22].mxu1 %vm412_vm0, %v12988_v15  ;;  %v6823_v15 = vld [vmem:[#allocation3 + $0x150] sm:$0xff] }
 0x548   : > { %10208 = vmatprep.mubr.msk.f32.mxu1 %vm412_vm0, %v12992_v25  ;;  %v6824_v25 = vld [vmem:[#allocation3 + $0x168] sm:$0xff] }
 0x54b   : > { %10209 = vmatmul.mubr.msk.f32.gmra.mrb[24].mxu1 %vm412_vm0, %v12996_v32  ;;  %v6825_v32 = vld [vmem:[#allocation3 + $0x170] sm:$0xff] }
 0x54c   : > { %10211 = vmatprep.mubr.msk.f32.mxu1 %vm412_vm0, %v13000_v33  ;;  %v6826_v33 = vld [vmem:[#allocation3 + $0x188] sm:$0xff] }
 0x54f   : > { %10212 = vmatmul.mubr.msk.f32.gmra.mrb[26].mxu1 %vm412_vm0, %v13004_v37  ;;  %v6827_v37 = vld [vmem:[#allocation3 + $0x190] sm:$0xff] }
 0x550   : > { %10214 = vmatprep.mubr.msk.f32.mxu1 %vm412_vm0, %v13195_v18  ;;  %v6837_v18 = vld [vmem:[#allocation3 + $0x230] sm:$0xff] }
 0x553   : > { %10215 = vmatmul.mubr.msk.f32.gmra.mrb[28].mxu1 %vm412_vm0, %v13199_v47  ;;  %v14240_v47 = vld [vmem:[#allocation70_spill] sm:$0xff] }
 0x554   : > { %10217 = vmatprep.mubr.msk.f32.mxu1 %vm412_vm0, %v6446_v44 }
 0x557   : > { %10218 = vmatmul.mubr.msk.f32.gmra.mrb[30].mxu1 %vm412_vm0, %v6447_v49 }
 0x558   : > { %10228 = vmatprep.mubr.msk.f32.mxu1 %vm412_vm0, %v6806_v55 }
 0x55b   : > { %10229 = vmatmul.mubr.msk.f32.vlgmr.msra.gmra.mrb[0].mxu1 %vm412_vm0, %v6807_v1 }
 0x55c   : > { %10231 = vmatprep.mubr.msk.f32.mxu1 %vm412_vm0, %v6808_v2  ;;  %10487 = vmatpush3.bf16.msra.mxu1 %v10484_v60 }
 0x55d   : > { %10489 = vmatprep.subr.bf16.mxu1 %v10488_v57 }
 0x55f   : > { %10232 = vmatmul.mubr.msk.f32.gmra.mrb[2].mxu1 %vm412_vm0, %v6809_v3 }
 0x560   : > { %10234 = vmatprep.mubr.msk.f32.mxu1 %vm412_vm0, %v6810_v9  ;;  %10491 = vmatpush3.bf16.msra.mxu1 %v10488_v57 }
 0x561   : > { %10343 = vmatprep.subr.mxu1 %v14239_v28 }
 0x563   : > { %10235 = vmatmul.mubr.msk.f32.gmra.mrb[4].mxu1 %vm412_vm0, %v6811_v14 }
 0x564   : > { %10237 = vmatprep.mubr.msk.f32.mxu1 %vm412_vm0, %v6812_v7 }
 0x567   : > { %10238 = vmatmul.mubr.msk.f32.gmra.mrb[6].mxu1 %vm412_vm0, %v6813_v11 }
 0x568   : > { %10240 = vmatprep.mubr.msk.f32.mxu1 %vm412_vm0, %v6814_v17 }
 0x56b   : > { %10241 = vmatmul.mubr.msk.f32.gmra.mrb[8].mxu1 %vm412_vm0, %v6815_v35 }
 0x56c   : > { %10243 = vmatprep.mubr.msk.f32.mxu1 %vm412_vm0, %v6816_v39 }
 0x56f   : > { %10244 = vmatmul.mubr.msk.f32.gmra.mrb[10].mxu1 %vm412_vm0, %v6817_v51 }
 0x570   : > { %10246 = vmatprep.mubr.msk.f32.mxu1 %vm412_vm0, %v6818_v61 }
 0x573   : > { %10247 = vmatmul.mubr.msk.f32.gmra.mrb[12].mxu1 %vm412_vm0, %v6819_v62 }
 0x574   : > { %10249 = vmatprep.mubr.msk.f32.mxu1 %vm412_vm0, %v6820_v20 }
 0x577   : > { %10250 = vmatmul.mubr.msk.f32.gmra.mrb[14].mxu1 %vm412_vm0, %v6821_v16 }
 0x578   : > { %10252 = vmatprep.mubr.msk.f32.mxu1 %vm412_vm0, %v6822_v13 }
 0x57b   : > { %10253 = vmatmul.mubr.msk.f32.gmra.mrb[16].mxu1 %vm412_vm0, %v6823_v15 }
 0x57c   : > { %10255 = vmatprep.mubr.msk.f32.mxu1 %vm412_vm0, %v6824_v25 }
 0x57f   : > { %10256 = vmatmul.mubr.msk.f32.gmra.mrb[18].mxu1 %vm412_vm0, %v6825_v32 }
 0x580   : > { %10258 = vmatprep.mubr.msk.f32.mxu1 %vm412_vm0, %v6826_v33 }
 0x583   : > { %10259 = vmatmul.mubr.msk.f32.gmra.mrb[20].mxu1 %vm412_vm0, %v6827_v37 }
 0x584   : > { %10261 = vmatprep.mubr.msk.f32.mxu1 %vm412_vm0, %v14206_v42  ;;  %v14241_v42 = vld [vmem:[#allocation71_spill] sm:$0xff] }
 0x587   : > { %10262 = vmatmul.mubr.msk.f32.gmra.mrb[22].mxu1 %vm412_vm0, %v14207_v54  ;;  %v14242_v54 = vld [vmem:[#allocation73_spill] sm:$0xff] }
 0x588   : > { %10264 = vmatprep.mubr.msk.f32.mxu1 %vm412_vm0, %v14208_v53  ;;  %v14243_v53 = vld [vmem:[#allocation75_spill] sm:$0xff] }
 0x58b   : > { %10265 = vmatmul.mubr.msk.f32.gmra.mrb[24].mxu1 %vm412_vm0, %v14209_v58  ;;  %v14244_v58 = vld [vmem:[#allocation76_spill] sm:$0xff] }
 0x58c   : > { %10267 = vmatprep.mubr.msk.f32.mxu1 %vm412_vm0, %v14210_v8  ;;  %v14245_v8 = vld [vmem:[#allocation77_spill] sm:$0xff] }
 0x58f   : > { %10268 = vmatmul.mubr.msk.f32.gmra.mrb[26].mxu1 %vm412_vm0, %v14211_v4  ;;  %v14246_v4 = vld [vmem:[#allocation78_spill] sm:$0xff] }
 0x590   : > { %10270 = vmatprep.mubr.msk.f32.mxu1 %vm412_vm0, %v13263_v6  ;;  %v14247_v6 = vld [vmem:[#allocation79_spill] sm:$0xff] }
 0x593   : > { %10271 = vmatmul.mubr.msk.f32.gmra.mrb[28].mxu1 %vm412_vm0, %v13267_v10  ;;  %v14248_v10 = vld [vmem:[#allocation80_spill] sm:$0xff] }
 0x594   : > { %10273 = vmatprep.mubr.msk.f32.mxu1 %vm412_vm0, %v6836_v24 }
 0x597   : > { %10274 = vmatmul.mubr.msk.f32.gmra.mrb[30].mxu1 %vm412_vm0, %v6837_v18 }
 0x598   : > { %10284 = vmatprep.mubr.msk.f32.mxu1 %vm412_vm0, %v14212_v26  ;;  %v14249_v26 = vld [vmem:[#allocation45_spill] sm:$0xff] }
 0x59b   : > { %10285 = vmatmul.mubr.msk.f32.vlgmr.msra.gmra.mrb[0].mxu1 %vm412_vm0, %v14213_v50  ;;  %v7226_v50 = vld [vmem:[#allocation3 + $0x229] sm:$0xff] }
 0x59c   : > { %10287 = vmatprep.mubr.msk.f32.mxu1 %vm412_vm0, %v14214_v46  ;;  %v7227_v46 = vld [vmem:[#allocation3 + $0x231] sm:$0xff] }
 0x59f   : > { %10288 = vmatmul.mubr.msk.f32.gmra.mrb[2].mxu1 %vm412_vm0, %v14215_v63  ;;  %v11252_v63 = vmov 0.0|0.0  }
 0x5a0   : > { %10290 = vmatprep.mubr.msk.f32.mxu1 %vm412_vm0, %v14216_v59  ;;  %10492 = vmatprep.subr.bf16.mxu0 %v11252_v63  ;;  %v7696_v59 = vld [vmem:[%s13881_s5] sm:$0xff] }
 0x5a3   : > { %10291 = vmatmul.mubr.msk.f32.gmra.mrb[4].mxu1 %vm412_vm0, %v14217_v5 }
 0x5a4   : > { %10293 = vmatprep.mubr.msk.f32.mxu1 %vm412_vm0, %v14218_v29  ;;  %v7698_v29 = vld [vmem:[%s13881_s5 + $0x10] sm:$0xff] }
 0x5a7   : > { %10294 = vmatmul.mubr.msk.f32.gmra.mrb[6].mxu1 %vm412_vm0, %v14219_v21  ;;  %v7699_v21 = vld [vmem:[%s13881_s5 + $0x18] sm:$0xff] }
 0x5a8   : > { %10296 = vmatprep.mubr.msk.f32.mxu1 %vm412_vm0, %v14220_v38  ;;  %v10496_v38 = vpack.c.bf16 %v7699_v21, %v7698_v29 }
 0x5ab   : > { %10297 = vmatmul.mubr.msk.f32.gmra.mrb[8].mxu1 %vm412_vm0, %v14221_v22  ;;  %v7775_v22 = vld [vmem:[%s13883_s7] sm:$0x3] }
 0x5ac   : > { %10299 = vmatprep.mubr.msk.f32.mxu1 %vm412_vm0, %v14222_v0  ;;  %10344 = vmatpush3.msk.msra.mxu1 %vm7781_vm2, %v7775_v22  ;;  %v13524_v0 = vld [vmem:[%s13880_s4] ss:$0 sm:$0xff] }
 0x5af   : > { %10300 = vmatmul.mubr.msk.f32.gmra.mrb[10].mxu1 %vm412_vm0, %v14223_v31 }
 0x5b0   : > { %10302 = vmatprep.mubr.msk.f32.mxu1 %vm412_vm0, %v14224_v34 }
 0x5b3   : > { %10303 = vmatmul.mubr.msk.f32.gmra.mrb[12].mxu1 %vm412_vm0, %v14225_v27 }
 0x5b4   : > { %10305 = vmatprep.mubr.msk.f32.mxu1 %vm412_vm0, %v14226_v23 }
 0x5b7   : > { %10306 = vmatmul.mubr.msk.f32.gmra.mrb[14].mxu1 %vm412_vm0, %v14240_v47 }
 0x5b8   : > { %10308 = vmatprep.mubr.msk.f32.mxu1 %vm412_vm0, %v14241_v42 }
 0x5bb   : > { %10309 = vmatmul.mubr.msk.f32.gmra.mrb[16].mxu1 %vm412_vm0, %v14229_v36 }
 0x5bc   : > { %10311 = vmatprep.mubr.msk.f32.mxu1 %vm412_vm0, %v14242_v54 }
 0x5bf   : > { %10312 = vmatmul.mubr.msk.f32.gmra.mrb[18].mxu1 %vm412_vm0, %v14231_v40 }
 0x5c0   : > { %10314 = vmatprep.mubr.msk.f32.mxu1 %vm412_vm0, %v14243_v53 }
 0x5c3   : > { %10315 = vmatmul.mubr.msk.f32.gmra.mrb[20].mxu1 %vm412_vm0, %v14244_v58 }
 0x5c4   : > { %10317 = vmatprep.mubr.msk.f32.mxu1 %vm412_vm0, %v14245_v8 }
 0x5c7   : > { %10318 = vmatmul.mubr.msk.f32.gmra.mrb[22].mxu1 %vm412_vm0, %v14246_v4 }
 0x5c8   : > { %10320 = vmatprep.mubr.msk.f32.mxu1 %vm412_vm0, %v14247_v6 }
 0x5cb   : > { %10321 = vmatmul.mubr.msk.f32.gmra.mrb[24].mxu1 %vm412_vm0, %v14248_v10 }
 0x5cc   : > { %10323 = vmatprep.mubr.msk.f32.mxu1 %vm412_vm0, %v14249_v26 }
 0x5cf   : > { %10324 = vmatmul.mubr.msk.f32.gmra.mrb[26].mxu1 %vm412_vm0, %v13130_v45  ;;  %v7697_v45 = vld [vmem:[%s13881_s5 + $0x8] sm:$0xff] }
 0x5d0   : > { %10326 = vmatprep.mubr.msk.f32.mxu1 %vm412_vm0, %v14250_v30  ;;  %v10493_v5 = vpack.c.bf16 %v7697_v45, %v7696_v59 }
 0x5d2   : > { %10494 = vmatpush3.bf16.msra.mxu0 %v10493_v5 }
 0x5d3   : > { %10327 = vmatmul.mubr.msk.f32.gmra.mrb[28].mxu1 %vm412_vm0, %v13335_v12  ;;  %10495 = vmatprep.subr.bf16.mxu0 %v11252_v63 }
 0x5d4   : > { %10329 = vmatprep.mubr.msk.f32.mxu1 %vm412_vm0, %v7226_v50 }
 0x5d6   : > { %10497 = vmatpush3.bf16.msra.mxu0 %v10496_v38 }
 0x5d7   : > { %10330 = vmatmul.mubr.msk.f32.gmra.mrb[30].mxu1 %vm412_vm0, %v7227_v46 }
 0x5d8   : > { %10345 = vmatprep.mubr.msk.f32.mxu1 %vm11253_vm1, %v14239_v28 }
 0x66e   : > { %v10286_v31 = vpop.f32.mrb[0].mxu1 }
 0x66f   : > { %v13527_v34 = vadd.f32 %v10286_v31, %v13524_v0  ;;  %v7395_v27 = vpop.f32.mrb[1].mxu1 }
 0x670   : > { %v13530_v23 = vadd.f32 %v13524_v0, %v7395_v27 }
 0x671   : > { %v7626_v48 = vsel %vm412_vm0, %v13527_v34, 0.0 }
 0x672   : > { %v7625_v52 = vsel %vm412_vm0, %v13530_v23, 0.0  ;;  %v10289_v36 = vpop.f32.mrb[2].mxu1 }
 0x673   : > { %v7405_v41 = vpop.f32.mrb[3].mxu1  ;;  %v13537_v40 = vadd.f32 %v10289_v36, %v13524_v0  ;;  %v7627_v19 = vadd.f32 %v7626_v48, %v7625_v52 }
 0x674   : > { %v13540_v60 = vadd.f32 %v13524_v0, %v7405_v41 }
 0x675   : > { %v7630_v56 = vsel %vm412_vm0, %v13537_v40, 0.0 }
 0x676   : > { %v7628_v12 = vsel %vm412_vm0, %v13540_v60, 0.0  ;;  %v10292_v44 = vpop.f32.mrb[4].mxu1 }
 0x677   : > { %v7629_v49 = vadd.f32 %v7628_v12, %v7627_v19  ;;  %v7415_v43 = vpop.f32.mrb[5].mxu1  ;;  %v13547_v55 = vadd.f32 %v10292_v44, %v13524_v0 }
 0x678   : > { %v13550_v57 = vadd.f32 %v13524_v0, %v7415_v43 }
 0x679   : > { %v7631_v1 = vadd.f32 %v7630_v56, %v7629_v49  ;;  %v7634_v14 = vsel %vm412_vm0, %v13547_v55, 0.0 }
 0x67a   : > { %v7632_v2 = vsel %vm412_vm0, %v13550_v57, 0.0  ;;  %v10295_v3 = vpop.f32.mrb[6].mxu1 }
 0x67b   : > { %v7633_v9 = vadd.f32 %v7632_v2, %v7631_v1  ;;  %v7425_v28 = vpop.f32.mrb[7].mxu1  ;;  %v13557_v7 = vadd.f32 %v10295_v3, %v13524_v0 }
 0x67c   : > { %v13560_v11 = vadd.f32 %v13524_v0, %v7425_v28 }
 0x67d   : > { %v7635_v17 = vadd.f32 %v7634_v14, %v7633_v9  ;;  %v7638_v62 = vsel %vm412_vm0, %v13557_v7, 0.0 }
 0x67e   : > { %v7636_v35 = vsel %vm412_vm0, %v13560_v11, 0.0  ;;  %v10298_v39 = vpop.f32.mrb[8].mxu1 }
 0x67f   : > { %v7637_v51 = vadd.f32 %v7636_v35, %v7635_v17  ;;  %v7435_v61 = vpop.f32.mrb[9].mxu1  ;;  %v13567_v20 = vadd.f32 %v10298_v39, %v13524_v0 }
 0x680   : > { %v13570_v16 = vadd.f32 %v13524_v0, %v7435_v61 }
 0x681   : > { %v7639_v13 = vadd.f32 %v7638_v62, %v7637_v51  ;;  %v7642_v37 = vsel %vm412_vm0, %v13567_v20, 0.0 }
 0x682   : > { %v7640_v15 = vsel %vm412_vm0, %v13570_v16, 0.0  ;;  %v10301_v25 = vpop.f32.mrb[10].mxu1 }
 0x683   : > { %v7641_v32 = vadd.f32 %v7640_v15, %v7639_v13  ;;  %v7445_v33 = vpop.f32.mrb[11].mxu1  ;;  %v13577_v24 = vadd.f32 %v10301_v25, %v13524_v0 }
 0x684   : > { %v13580_v18 = vadd.f32 %v13524_v0, %v7445_v33 }
 0x685   : > { %v7643_v47 = vadd.f32 %v7642_v37, %v7641_v32  ;;  %v7646_v8 = vsel %vm412_vm0, %v13577_v24, 0.0 }
 0x686   : > { %v7644_v42 = vsel %vm412_vm0, %v13580_v18, 0.0  ;;  %v10304_v54 = vpop.f32.mrb[12].mxu1 }
 0x687   : > { %v7645_v53 = vadd.f32 %v7644_v42, %v7643_v47  ;;  %v7455_v58 = vpop.f32.mrb[13].mxu1  ;;  %v13587_v4 = vadd.f32 %v10304_v54, %v13524_v0 }
 0x688   : > { %v13590_v6 = vadd.f32 %v13524_v0, %v7455_v58 }
 0x689   : > { %v7647_v10 = vadd.f32 %v7646_v8, %v7645_v53  ;;  %v7650_v63 = vsel %vm412_vm0, %v13587_v4, 0.0 }
 0x68a   : > { %v7648_v26 = vsel %vm412_vm0, %v13590_v6, 0.0  ;;  %v10307_v30 = vpop.f32.mrb[14].mxu1 }
 0x68b   : > { %v7649_v50 = vadd.f32 %v7648_v26, %v7647_v10  ;;  %v7465_v46 = vpop.f32.mrb[15].mxu1  ;;  %v13597_v59 = vadd.f32 %v10307_v30, %v13524_v0 }
 0x68c   : > { %v13600_v45 = vadd.f32 %v13524_v0, %v7465_v46 }
 0x68d   : > { %v7651_v5 = vadd.f32 %v7650_v63, %v7649_v50  ;;  %v7654_v31 = vsel %vm412_vm0, %v13597_v59, 0.0 }
 0x68e   : > { %v7652_v29 = vsel %vm412_vm0, %v13600_v45, 0.0  ;;  %v10310_v21 = vpop.f32.mrb[16].mxu1 }
 0x68f   : > { %v7653_v38 = vadd.f32 %v7652_v29, %v7651_v5  ;;  %v7475_v22 = vpop.f32.mrb[17].mxu1  ;;  %v13607_v27 = vadd.f32 %v10310_v21, %v13524_v0 }
 0x690   : > { %v13610_v48 = vadd.f32 %v13524_v0, %v7475_v22 }
 0x691   : > { %v7655_v52 = vadd.f32 %v7654_v31, %v7653_v38  ;;  %v7658_v44 = vsel %vm412_vm0, %v13607_v27, 0.0 }
 0x692   : > { %v7656_v36 = vsel %vm412_vm0, %v13610_v48, 0.0  ;;  %v10313_v41 = vpop.f32.mrb[18].mxu1 }
 0x693   : > { %v7657_v19 = vadd.f32 %v7656_v36, %v7655_v52  ;;  %v7485_v12 = vpop.f32.mrb[19].mxu1  ;;  %v13617_v49 = vadd.f32 %v10313_v41, %v13524_v0 }
 0x694   : > { %v13620_v43 = vadd.f32 %v13524_v0, %v7485_v12 }
 0x695   : > { %v7659_v56 = vadd.f32 %v7658_v44, %v7657_v19  ;;  %v7662_v28 = vsel %vm412_vm0, %v13617_v49, 0.0 }
 0x696   : > { %v7660_v1 = vsel %vm412_vm0, %v13620_v43, 0.0  ;;  %v10316_v2 = vpop.f32.mrb[20].mxu1 }
 0x697   : > { %v7661_v3 = vadd.f32 %v7660_v1, %v7659_v56  ;;  %v7495_v9 = vpop.f32.mrb[21].mxu1  ;;  %v13627_v14 = vadd.f32 %v10316_v2, %v13524_v0 }
 0x698   : > { %v13630_v17 = vadd.f32 %v13524_v0, %v7495_v9 }
 0x699   : > { %v7663_v35 = vadd.f32 %v7662_v28, %v7661_v3  ;;  %v7666_v13 = vsel %vm412_vm0, %v13627_v14, 0.0 }
 0x69a   : > { %v7664_v39 = vsel %vm412_vm0, %v13630_v17, 0.0  ;;  %v10319_v51 = vpop.f32.mrb[22].mxu1 }
 0x69b   : > { %v7665_v61 = vadd.f32 %v7664_v39, %v7663_v35  ;;  %v7505_v62 = vpop.f32.mrb[23].mxu1  ;;  %v13637_v15 = vadd.f32 %v10319_v51, %v13524_v0 }
 0x69c   : > { %v13640_v25 = vadd.f32 %v13524_v0, %v7505_v62 }
 0x69d   : > { %v7667_v32 = vadd.f32 %v7666_v13, %v7665_v61  ;;  %v7670_v54 = vsel %vm412_vm0, %v13637_v15, 0.0 }
 0x69e   : > { %v7668_v33 = vsel %vm412_vm0, %v13640_v25, 0.0  ;;  %v10322_v37 = vpop.f32.mrb[24].mxu1 }
 0x69f   : > { %v7669_v47 = vadd.f32 %v7668_v33, %v7667_v32  ;;  %v7515_v42 = vpop.f32.mrb[25].mxu1  ;;  %v13647_v53 = vadd.f32 %v10322_v37, %v13524_v0 }
 0x6a0   : > { %v13650_v58 = vadd.f32 %v13524_v0, %v7515_v42 }
 0x6a1   : > { %v7671_v8 = vadd.f32 %v7670_v54, %v7669_v47  ;;  %v7674_v46 = vsel %vm412_vm0, %v13647_v53, 0.0 }
 0x6a2   : > { %v7672_v10 = vsel %vm412_vm0, %v13650_v58, 0.0  ;;  %v10325_v26 = vpop.f32.mrb[26].mxu1 }
 0x6a3   : > { %v7673_v30 = vadd.f32 %v7672_v10, %v7671_v8  ;;  %v7525_v50 = vpop.f32.mrb[27].mxu1  ;;  %v13657_v63 = vadd.f32 %v10325_v26, %v13524_v0 }
 0x6a4   : > { %v13660_v5 = vadd.f32 %v13524_v0, %v7525_v50 }
 0x6a5   : > { %v7675_v29 = vadd.f32 %v7674_v46, %v7673_v30  ;;  %v7678_v52 = vsel %vm412_vm0, %v13657_v63, 0.0  ;;  %v7776_v30 = vld [vmem:[%s13884_s8] sm:$0x1] }
 0x6a6   : > { %v7676_v21 = vsel %vm412_vm0, %v13660_v5, 0.0  ;;  %v10328_v38 = vpop.f32.mrb[28].mxu1 }
 0x6a7   : > { %v7677_v22 = vadd.f32 %v7676_v21, %v7675_v29  ;;  %v7535_v31 = vpop.f32.mrb[29].mxu1  ;;  %v13667_v36 = vadd.f32 %v10328_v38, %v13524_v0 }
 0x6a8   : > { %v13670_v41 = vadd.f32 %v13524_v0, %v7535_v31  ;;  %v7861_v31 = vlaneseq }
 0x6a9   : > { %v7679_v19 = vadd.f32 %v7678_v52, %v7677_v22  ;;  %v7682_v2 = vsel %vm412_vm0, %v13667_v36, 0.0 }
 0x6aa   : > { %v7680_v12 = vsel %vm412_vm0, %v13670_v41, 0.0  ;;  %v10331_v44 = vpop.f32.mrb[30].mxu1  ;;  %v7862_v52 = vshrl.u32 %v7861_v31, 7 }
 0x6ab   : > { %v7681_v56 = vadd.f32 %v7680_v12, %v7679_v19  ;;  %v7545_v1 = vpop.f32.mrb[31].mxu1  ;;  %v13677_v3 = vadd.f32 %v10331_v44, %v13524_v0 }
 0x6ac   : > { %v13680_v9 = vadd.f32 %v13524_v0, %v7545_v1  ;;  %v7700_v0 = vld [vmem:[%s13882_s6] sm:$0x1]  ;;  %v7863_v19 = vsub.s32 0, %v7862_v52  ;;  %v14265_v52 = vld [vmem:[#allocation29_spill] sm:$0xff] }
 0x6ad   : > { %v7683_v28 = vadd.f32 %v7682_v2, %v7681_v56  ;;  %v7686_v51 = vsel %vm412_vm0, %v13677_v3, 0.0 }
 0x6ae   : > { %v7684_v35 = vsel %vm412_vm0, %v13680_v9, 0.0 }
 0x6af   : > { %v7685_v39 = vadd.f32 %v7684_v35, %v7683_v28 }
 0x6b1   : > { %v7687_v61 = vadd.f32 %v7686_v51, %v7685_v39 }
 0x6b3   : > { %v7688_v62 = vrot.slane %v7687_v61, 4 }
 0x6b5   : > { %v7689_v13 = vadd.f32 %v7688_v62, %v7687_v61 }
 0x6b7   : > { %v7690_v32 = vrot.slane %v7689_v13, 2 }
 0x6b9   : > { %v7691_v33 = vadd.f32 %v7690_v32, %v7689_v13 }
 0x6bb   : > { %v7692_v37 = vrot.slane %v7691_v33, 1 }
 0x6bd   : > { %v7693_v47 = vadd.f32 %v7692_v37, %v7691_v33 }
 0x6bf   : > { %v7695_v42 = vmul.f32 0.00390625, %v7693_v47 }
 0x6c1   : > { %10341 = vmatmul.mubr.msk.f32.vlgmr.msra.gmra.mrb[32].mxu0 %vm412_vm0, %v7695_v42 }
 0x794   : > { %v7770_v54 = vpop.f32.mrb[32].mxu0 }
 0x795   : > { %v7771_v8 = vadd.f32 %v7770_v54, %v7700_v0  ;;  %v10342_v10 = vpop.f32.mrb[33].mxu0 }
 0x796   : > { %v14259_v10 = vld [vmem:[#allocation23_spill] sm:$0xff] }
 0x797   : > { %v7774_v26 = vmax.f32 %v7771_v8, 0.0  ;;  %v14258_v8 = vld [vmem:[#allocation22_spill] sm:$0xff] }
 0x799   : > { %10346 = vmatmul.mubr.msk.f32.vlgmr.msra.gmra.mrb[32].mxu1 %vm7777_vm3, %v7774_v26  ;;  %v14260_v26 = vld [vmem:[#allocation24_spill] sm:$0xff] }
 0x86c   : > { %v7851_v50 = vpop.f32.mrb[32].mxu1 }
 0x86d   : > { %v7852_v46 = vadd.f32 %v7851_v50, %v7776_v30  ;;  %v10347_v29 = vpop.f32.mrb[33].mxu1  ;;  %v14261_v30 = vld [vmem:[#allocation25_spill] sm:$0xff] }
 0x86f   : > { %v8661_v21 = vmul.f32 -1.442695, %v7852_v46  ;;  %v14262_v46 = vld [vmem:[#allocation26_spill] sm:$0xff] }
 0x871   : > { %11084 = vpow2.f32 %v8661_v21  ;;  %v14263_v21 = vld [vmem:[#allocation27_spill] sm:$0xff] }
 0x87b   : > { %v11085_v38 = vpop.eup %11084 }
 0x87c   : > { %v7858_v22 = vadd.f32 1.0, %v11085_v38 }
 0x87e   : > { %11086 = vrcp.f32 %v7858_v22  ;;  %v14264_v22 = vld [vmem:[#allocation28_spill] sm:$0xff] }
 0x888   : > { %v11087_v12 = vpop.eup %11086 }
 0x889   : > { %v7864_v44 = vrot.slane %v11087_v12, %v7863_v19  ;;  %v14266_v12 = vld [vmem:[#allocation30_spill] sm:$0xff] }
 0x88b   : > { %v7865_v56 = vmul.f32 %v7864_v44, %v13530_v23  ;;  %v7866_v1 = vmul.f32 %v7864_v44, %v13527_v34  ;;  %v7867_v2 = vmul.f32 %v7864_v44, %v13540_v60  ;;  %v7868_v28 = vmul.f32 %v7864_v44, %v13537_v40 }
 0x88c   : > { %v7869_v35 = vmul.f32 %v7864_v44, %v13550_v57  ;;  %v7870_v39 = vmul.f32 %v7864_v44, %v13547_v55  ;;  %v7871_v51 = vmul.f32 %v7864_v44, %v13560_v11  ;;  %v7872_v61 = vmul.f32 %v7864_v44, %v13557_v7 }
 0x88d   : > { %v7873_v62 = vmul.f32 %v7864_v44, %v13570_v16  ;;  %v7874_v13 = vmul.f32 %v7864_v44, %v13567_v20  ;;  %v7875_v23 = vmul.f32 %v7864_v44, %v13580_v18  ;;  %v7876_v34 = vmul.f32 %v7864_v44, %v13577_v24 }
 0x88e   : > { %v7877_v60 = vmul.f32 %v7864_v44, %v13590_v6  ;;  %v7878_v40 = vmul.f32 %v7864_v44, %v13587_v4  ;;  %v7879_v57 = vmul.f32 %v7864_v44, %v13600_v45  ;;  %v7880_v55 = vmul.f32 %v7864_v44, %v13597_v59 }
 0x88f   : > { %v7881_v11 = vmul.f32 %v7864_v44, %v13610_v48  ;;  %v7882_v7 = vmul.f32 %v7864_v44, %v13607_v27  ;;  %v7883_v16 = vmul.f32 %v7864_v44, %v13620_v43  ;;  %v7884_v20 = vmul.f32 %v7864_v44, %v13617_v49 }
 0x890   : > { %v7885_v18 = vmul.f32 %v7864_v44, %v13630_v17  ;;  %v7886_v24 = vmul.f32 %v7864_v44, %v13627_v14  ;;  %v7887_v6 = vmul.f32 %v7864_v44, %v13640_v25  ;;  %v7888_v4 = vmul.f32 %v7864_v44, %v13637_v15  ;;  %v14251_v25 = vld [vmem:[#allocation15_spill] sm:$0xff]  ;;  %v14252_v15 = vld [vmem:[#allocation16_spill] sm:$0xff] }
 0x891   : > { %v7889_v45 = vmul.f32 %v7864_v44, %v13650_v58  ;;  %v7890_v59 = vmul.f32 %v7864_v44, %v13647_v53  ;;  %v7891_v48 = vmul.f32 %v7864_v44, %v13660_v5  ;;  %v7892_v27 = vmul.f32 %v7864_v44, %v13657_v63  ;;  %v14253_v58 = vld [vmem:[#allocation17_spill] sm:$0xff]  ;;  %v14254_v53 = vld [vmem:[#allocation18_spill] sm:$0xff]  ;;  %v14255_v5 = vld [vmem:[#allocation19_spill] sm:$0xff] }
 0x892   : > { %v7893_v43 = vmul.f32 %v7864_v44, %v13670_v41  ;;  %v7894_v49 = vmul.f32 %v7864_v44, %v13667_v36  ;;  %v7895_v17 = vmul.f32 %v7864_v44, %v13680_v9  ;;  %v7896_v14 = vmul.f32 %v7864_v44, %v13677_v3  ;;  %v14256_v63 = vld [vmem:[#allocation20_spill] sm:$0xff]  ;;  %v14257_v41 = vld [vmem:[#allocation21_spill] sm:$0xff] }
 0x893   : > { %v7897_v32 = vadd.f32 %v7865_v56, %v14251_v25  ;;  %v7898_v33 = vadd.f32 %v7866_v1, %v14252_v15  ;;  %v7899_v37 = vadd.f32 %v7867_v2, %v14253_v58  ;;  %v7900_v47 = vadd.f32 %v7868_v28, %v14254_v53  ;;  %v14267_v56 = vld [vmem:[#allocation31_spill] sm:$0xff]  ;;  %v14268_v2 = vld [vmem:[#allocation32_spill] sm:$0xff]  ;;  %v14281_v25 = vld [vmem:[#allocation53_spill] sm:$0xff] }
 0x894   : > { %v7901_v42 = vadd.f32 %v7869_v35, %v14255_v5  ;;  %v7902_v0 = vadd.f32 %v7870_v39, %v14256_v63  ;;  %v7903_v54 = vadd.f32 %v7871_v51, %v14257_v41  ;;  %v7904_v36 = vadd.f32 %v7872_v61, %v14258_v8  ;;  %v14269_v35 = vld [vmem:[#allocation33_spill] sm:$0xff]  ;;  %v14270_v51 = vld [vmem:[#allocation34_spill] sm:$0xff] }
 0x895   : > { %v7905_v9 = vadd.f32 %v7873_v62, %v14259_v10  ;;  %v7906_v3 = vadd.f32 %v7874_v13, %v14260_v26  ;;  %v7907_v50 = vadd.f32 %v7875_v23, %v14261_v30  ;;  %v7908_v29 = vadd.f32 %v7876_v34, %v14262_v46  ;;  %7929 = vst.msk [vmem:[%s13739_s21] sm:$0xff] %vm412_vm0, %v7897_v32  ;;  %v14271_v62 = vld [vmem:[#allocation35_spill] sm:$0xff]  ;;  %v14272_v23 = vld [vmem:[#allocation36_spill] sm:$0xff]  ;;  %v14282_v15 = vld [vmem:[#allocation54_spill] sm:$0xff] }
 0x896   : > { %7930 = vst.msk [vmem:[%s13739_s21 + $0x8] sm:$0xff] %vm412_vm0, %v7898_v33  ;;  %7931 = vst.msk [vmem:[%s13739_s21 + $0x10] sm:$0xff] %vm412_vm0, %v7899_v37  ;;  %v7909_v38 = vadd.f32 %v7877_v60, %v14263_v21  ;;  %v7910_v31 = vadd.f32 %v7878_v40, %v14264_v22  ;;  %v7911_v19 = vadd.f32 %v7879_v57, %v14265_v52  ;;  %v14273_v60 = vld [vmem:[#allocation37_spill] sm:$0xff]  ;;  %v14274_v57 = vld [vmem:[#allocation38_spill] sm:$0xff] }
 0x897   : > { %7932 = vst.msk [vmem:[%s13739_s21 + $0x18] sm:$0xff] %vm412_vm0, %v7900_v47  ;;  %v7912_v44 = vadd.f32 %v7880_v55, %v14266_v12  ;;  %7933 = vst.msk [vmem:[%s13739_s21 + $0x20] sm:$0xff] %vm412_vm0, %v7901_v42  ;;  %v7913_v1 = vadd.f32 %v7881_v11, %v14267_v56  ;;  %v7914_v28 = vadd.f32 %v7882_v7, %v14268_v2  ;;  %v14275_v11 = vld [vmem:[#allocation39_spill] sm:$0xff] }
 0x898   : > { %7934 = vst.msk [vmem:[%s13739_s21 + $0x28] sm:$0xff] %vm412_vm0, %v7902_v0  ;;  %7935 = vst.msk [vmem:[%s13739_s21 + $0x30] sm:$0xff] %vm412_vm0, %v7903_v54  ;;  %v7915_v39 = vadd.f32 %v7883_v16, %v14269_v35  ;;  %v7916_v61 = vadd.f32 %v7884_v20, %v14270_v51  ;;  %v7917_v13 = vadd.f32 %v7885_v18, %v14271_v62  ;;  %v14276_v16 = vld [vmem:[#allocation40_spill] sm:$0xff]  ;;  %v14277_v18 = vld [vmem:[#allocation41_spill] sm:$0xff] }
 0x899   : > { %7936 = vst.msk [vmem:[%s13739_s21 + $0x38] sm:$0xff] %vm412_vm0, %v7904_v36  ;;  %7937 = vst.msk [vmem:[%s13739_s21 + $0x40] sm:$0xff] %vm412_vm0, %v7905_v9  ;;  %v7918_v34 = vadd.f32 %v7886_v24, %v14272_v23  ;;  %v7919_v40 = vadd.f32 %v7887_v6, %v14273_v60  ;;  %v7920_v55 = vadd.f32 %v7888_v4, %v14274_v57  ;;  %v14278_v6 = vld [vmem:[#allocation42_spill] sm:$0xff] }
 0x89a   : > { %7938 = vst.msk [vmem:[%s13739_s21 + $0x48] sm:$0xff] %vm412_vm0, %v7906_v3  ;;  %7939 = vst.msk [vmem:[%s13739_s21 + $0x50] sm:$0xff] %vm412_vm0, %v7907_v50  ;;  %v7921_v7 = vadd.f32 %v7889_v45, %v14275_v11  ;;  %v7922_v20 = vadd.f32 %v7890_v59, %v14276_v16  ;;  %v7923_v24 = vadd.f32 %v7891_v48, %v14277_v18  ;;  %v14279_v45 = vld [vmem:[#allocation43_spill] sm:$0xff]  ;;  %v14280_v48 = vld [vmem:[#allocation44_spill] sm:$0xff] }
 0x89b   : > { %7940 = vst.msk [vmem:[%s13739_s21 + $0x58] sm:$0xff] %vm412_vm0, %v7908_v29  ;;  %7941 = vst.msk [vmem:[%s13739_s21 + $0x60] sm:$0xff] %vm412_vm0, %v7909_v38  ;;  %v7924_v4 = vadd.f32 %v7892_v27, %v14278_v6  ;;  %v7925_v59 = vadd.f32 %v7893_v43, %v14279_v45  ;;  %v7926_v27 = vadd.f32 %v7894_v49, %v14280_v48 }
 0x89c   : > { %7942 = vst.msk [vmem:[%s13739_s21 + $0x68] sm:$0xff] %vm412_vm0, %v7910_v31  ;;  %7943 = vst.msk [vmem:[%s13739_s21 + $0x70] sm:$0xff] %vm412_vm0, %v7911_v19  ;;  %v7927_v32 = vadd.f32 %v7895_v17, %v14281_v25  ;;  %v7928_v33 = vadd.f32 %v7896_v14, %v14282_v15 }
 0x89d   : > { %7944 = vst.msk [vmem:[%s13739_s21 + $0x78] sm:$0xff] %vm412_vm0, %v7912_v44  ;;  %7945 = vst.msk [vmem:[%s13739_s21 + $0x80] sm:$0xff] %vm412_vm0, %v7913_v1 }
 0x89e   : > { %7946 = vst.msk [vmem:[%s13739_s21 + $0x88] sm:$0xff] %vm412_vm0, %v7914_v28  ;;  %7947 = vst.msk [vmem:[%s13739_s21 + $0x90] sm:$0xff] %vm412_vm0, %v7915_v39 }
 0x89f   : > { %7948 = vst.msk [vmem:[%s13739_s21 + $0x98] sm:$0xff] %vm412_vm0, %v7916_v61  ;;  %7949 = vst.msk [vmem:[%s13739_s21 + $0xa0] sm:$0xff] %vm412_vm0, %v7917_v13 }
 0x8a0   : > { %7950 = vst.msk [vmem:[%s13739_s21 + $0xa8] sm:$0xff] %vm412_vm0, %v7918_v34  ;;  %7951 = vst.msk [vmem:[%s13739_s21 + $0xb0] sm:$0xff] %vm412_vm0, %v7919_v40 }
 0x8a1   : > { %7952 = vst.msk [vmem:[%s13739_s21 + $0xb8] sm:$0xff] %vm412_vm0, %v7920_v55  ;;  %7953 = vst.msk [vmem:[%s13739_s21 + $0xc0] sm:$0xff] %vm412_vm0, %v7921_v7 }
 0x8a2   : > { %7954 = vst.msk [vmem:[%s13739_s21 + $0xc8] sm:$0xff] %vm412_vm0, %v7922_v20  ;;  %7955 = vst.msk [vmem:[%s13739_s21 + $0xd0] sm:$0xff] %vm412_vm0, %v7923_v24 }
 0x8a3   : > { %7956 = vst.msk [vmem:[%s13739_s21 + $0xd8] sm:$0xff] %vm412_vm0, %v7924_v4  ;;  %7957 = vst.msk [vmem:[%s13739_s21 + $0xe0] sm:$0xff] %vm412_vm0, %v7925_v59 }
 0x8a4   : > { %7958 = vst.msk [vmem:[%s13739_s21 + $0xe8] sm:$0xff] %vm412_vm0, %v7926_v27  ;;  %7959 = vst.msk [vmem:[%s13739_s21 + $0xf0] sm:$0xff] %vm412_vm0, %v7927_v32 }
 0x8a5   : > { %7960 = vst.msk [vmem:[%s13739_s21 + $0xf8] sm:$0xff] %vm412_vm0, %v7928_v33 }
 0x8a6   : > { %11187 = shalt.err (!%p11184_p1)
}
 0x8a7   : > { %s11188_s22 = scalar_lea.hbm %s13802_s24, 4096  ;;  %s11192_s28 = scalar_lea.hbm %s13885_s9, 8192 }
 0x8a8   : > { %p11189_p13 = scmp.ne.s32.totalorder %s13802_s24, %s11188_s22  ;;  %p11193_p4 = scmp.lt.u32.totalorder %s13802_s24, %s13885_s9 }
 0x8a9   : > { %p11194_p5 = scmp.lt.u32.totalorder %s11192_s28, %s11188_s22  ;;  %p11196_p11 = scmp.lt.u32.totalorder %s11188_s22, %s13802_s24 }
 0x8aa   : > { %p11190_p6 = pnand %p11189_p13, %p14283_p0 }
 0x8ab   : > { %p11195_p8 = por %p11194_p5, %p11193_p4 }
 0x8ac   : > { %p11191_p10 = pneg %p11190_p6 }
 0x8ad   : > { %p11197_p2 = por %p11196_p11, %p11195_p8 }
 0x8af   : > { %p11198_p3 = pnand %p11197_p2, %p11191_p10 }
 0x8b1   : > { %11201 = shalt.err (!%p11198_p3)
}
 0x8b2   : > { %s11255_s17 = smov 128   ;;  %s11256_s18 = smov 8  }
 0x8b3   : > { %11020 = dma.vmem_to_hbm [thread:$0]  (%p14283_p0), %s13804_s14, 4096, %s13802_s24, %s7962_s15, %s11255_s17, %s11255_s17, %s11256_s18  }
 0x8b4 PF: > { %s14284_s16 = sld [smem:[#allocation14_spill]]  ;;  %s7990_s25 = sand.u32 1, %s11232_s30  }
 0x8b5   : > { %p14286_p9 = scmp.ge.s32.totalorder %s11244_s12, 2  ;;  %s7991_s22 = scalar_lea.sflag [#allocation6], %s7990_s25 }
 0x8ba   : > { %p14285_p7 = scmp.ne.s32.totalorder %s14284_s16, 0 }
 0x8bc   : > { %p11034_p12 = pnand %p14286_p9, %p14285_p7 }
 0x8be   : > { %11227 = dma.done.wait (!%p11034_p12), %s7991_s22, 4096  }
 0x8bf   : > { %11229 = vsyncadd (!%p11034_p12), %s7991_s22, 4294963200  ;;  %p23_p1 = scmp.ge.s32.totalorder %s11423_s20, 4   ;;  %s14287_s30 = smov %s11236_s10 }
 0x8c0   : > { %s14288_s10 = smov %s11240_s11  ;;  %s14289_s11 = smov %s11439_s27 }
 0x8c1   : > { %s14290_s12 = smov %s11423_s20  ;;  %25 = sbr.rel (!%p23_p1) target bundleno = 6 (0x6), region = 129 }
 0x8c8   :  { %7996 = vsyncpa [#allocation5], 1 }
 0x8c9   :  { %7998 = vsyncpa [#allocation5 + $0x1], 1 }
 0x8ca   :  { %7999 = vsyncpa [#allocation8], 1 }
 0x8cb   :  { %8000 = vsyncpa [#allocation6], 1 }
 0x8cc   :  { %8002 = vsyncpa [#allocation6 + $0x1], 1 }

</bundles_post_ra>
